<compile_context>
chip_gen: v7x
topology: tpu7x:2x2x1
jax: 0.10.0
libtpu: 0.0.40
codegen_flags: <defaults>
</compile_context>

<pallas_src>
import functools
import math

import jax
import jax.numpy as jnp
from jax import lax
from jax.experimental import pallas as pl
from jax.experimental.pallas import tpu as pltpu


_KERNELS = (3, 5, 7)      # conv1 / conv2 / conv3 kernel sizes
_CHANNELS = (12, 20, 20)  # conv1 / conv2 / conv3 output channels


# ----------------------------------------------------------------------------
# In-kernel building blocks (operate on VMEM refs only)
# ----------------------------------------------------------------------------
def _conv_rows(read_row, w_ref, k, ho, wo, cin, cout, conv_ref):
    """conv_ref[h] = sum_{i,j} read_row(h+i, j) @ w_ref[i*k+j]   (valid conv)."""

    def body(h, carry):
        acc = jnp.zeros((wo, cout), jnp.float32)
        for i in range(k):
            for j in range(k):
                xr = read_row(h + i, j)          # (wo, cin)
                wt = w_ref[i * k + j]            # (cin, cout)
                if cin == 1:
                    # Cin == 1: (wo,1)x(1,cout) broadcast MAC on the VPU is
                    # cheaper than a K=1 MXU pass (esp. on v5e).
                    acc = acc + xr * wt
                else:
                    acc = acc + jnp.dot(xr, wt,
                                        preferred_element_type=jnp.float32)
        conv_ref[h] = acc
        return carry

    lax.fori_loop(0, ho, body, 0)


def _pool2x2_relu(conv_ref, b_ref, hp, wp, write_row):
    """write_row(r, relu(maxpool2x2(conv + bias))[r]) for r in [0, hp)."""

    def body(r, carry):
        r0 = 2 * r
        c00 = conv_ref[r0, pl.ds(0, wp, stride=2), :]
        c01 = conv_ref[r0, pl.ds(1, wp, stride=2), :]
        c10 = conv_ref[r0 + 1, pl.ds(0, wp, stride=2), :]
        c11 = conv_ref[r0 + 1, pl.ds(1, wp, stride=2), :]
        m = jnp.maximum(jnp.maximum(c00, c01), jnp.maximum(c10, c11))
        # bias is window-constant, so pool(conv)+b == pool(conv+b); relu last
        # matches the module's pool -> relu order.
        write_row(r, jnp.maximum(m + b_ref[...], 0.0))
        return carry

    lax.fori_loop(0, hp, body, 0)


# ----------------------------------------------------------------------------
# Fused conv/pool/relu stack kernel (one grid step == one sample)
# ----------------------------------------------------------------------------
def _conv_stack_kernel(x_ref, w1_ref, b1_ref, w2_ref, b2_ref, w3_ref, b3_ref,
                       out_ref, c1_ref, a1_ref, c2_ref, a2_ref, c3_ref,
                       *, geom, chans):
    (k1, ho1, wo1, hp1, wp1), (k2, ho2, wo2, hp2, wp2), (k3, ho3, wo3, hp3, wp3) = geom
    c1, c2, c3 = chans

    # ---- stage 1: conv1 (3x3, Cin=1) -> maxpool 2x2 -> ReLU ----------------
    _conv_rows(lambda h, j: x_ref[0, h, pl.ds(j, wo1), :],
               w1_ref, k1, ho1, wo1, 1, c1, c1_ref)

    def _w1(r, v):
        a1_ref[r] = v
    _pool2x2_relu(c1_ref, b1_ref, hp1, wp1, _w1)

    # ---- stage 2: conv2 (5x5, 12->20) -> maxpool 2x2 -> ReLU ---------------
    _conv_rows(lambda h, j: a1_ref[h, pl.ds(j, wo2), :],
               w2_ref, k2, ho2, wo2, c1, c2, c2_ref)

    def _w2(r, v):
        a2_ref[r] = v
    _pool2x2_relu(c2_ref, b2_ref, hp2, wp2, _w2)

    # ---- stage 3: conv3 (7x7, 20->20) -> maxpool 2x2 -> ReLU ---------------
    _conv_rows(lambda h, j: a2_ref[h, pl.ds(j, wo3), :],
               w3_ref, k3, ho3, wo3, c2, c3, c3_ref)

    def _w3(r, v):
        # Final pooled map is 1x1 spatial at the supported geometry, so this
        # (1, c3) row IS the torch.flatten(x, 1) vector for the sample.
        out_ref[0] = v
    _pool2x2_relu(c3_ref, b3_ref, hp3, wp3, _w3)


# ----------------------------------------------------------------------------
# Fused fc1 + ReLU + fc2 + ReLU + fc3 kernel
# ----------------------------------------------------------------------------
def _fc_stack_kernel(x_ref, w1_ref, b1_ref, w2_ref, b2_ref, w3_ref, b3_ref,
                     o_ref):
    h = jnp.dot(x_ref[...], w1_ref[...], preferred_element_type=jnp.float32)
    h = jnp.maximum(h + b1_ref[...], 0.0)
    h = jnp.dot(h, w2_ref[...], preferred_element_type=jnp.float32)
    h = jnp.maximum(h + b2_ref[...], 0.0)
    o_ref[...] = jnp.dot(h, w3_ref[...],
                         preferred_element_type=jnp.float32) + b3_ref[...]


# ----------------------------------------------------------------------------
# Host-side wrappers
# ----------------------------------------------------------------------------
def _conv_geometry(H, W):
    stages = []
    h, w = H, W
    for k in _KERNELS:
        ho, wo = h - k + 1, w - k + 1
        hp, wp = ho // 2, wo // 2
        stages.append((k, ho, wo, hp, wp))
        h, w = hp, wp
    return tuple(stages), (h, w)


def conv_pool_stack(x_nhwc, params):
    B, H, W, cin = x_nhwc.shape
    assert cin == 1
    geom, (hf, wf) = _conv_geometry(H, W)
    if (hf, wf) != (1, 1):
        # TODO(synk): general torch.flatten(x, 1) (CHW-ordered) for inputs whose
        # final pooled feature map is larger than 1x1.
        raise NotImplementedError("conv stack assumes the final pooled map is 1x1")
    c1, c2, c3 = _CHANNELS
    (k1, ho1, wo1, _, _), (k2, ho2, wo2, _, _), (k3, ho3, wo3, _, _) = geom
    (_, _, _, hp1, wp1), (_, _, _, hp2, wp2), (_, _, _, hp3, wp3) = geom

    kernel = functools.partial(_conv_stack_kernel, geom=geom, chans=_CHANNELS)

    inputs = (x_nhwc, params["conv1_w"], params["conv1_b"],
              params["conv2_w"], params["conv2_b"],
              params["conv3_w"], params["conv3_b"])
    flops = 2 * B * (ho1 * wo1 * k1 * k1 * 1 * c1
                     + ho2 * wo2 * k2 * k2 * c1 * c2
                     + ho3 * wo3 * k3 * k3 * c2 * c3)
    bytes_accessed = 4 * (sum(int(a.size) for a in inputs) + B * c3)

    out = pl.pallas_call(
        kernel,
        out_shape=jax.ShapeDtypeStruct((B, 1, c3), jnp.float32),
        grid=(B,),
        in_specs=[
            pl.BlockSpec((1, H, W, 1), lambda n: (n, 0, 0, 0)),
            pl.BlockSpec((k1 * k1, 1, c1), lambda n: (0, 0, 0)),
            pl.BlockSpec((1, c1), lambda n: (0, 0)),
            pl.BlockSpec((k2 * k2, c1, c2), lambda n: (0, 0, 0)),
            pl.BlockSpec((1, c2), lambda n: (0, 0)),
            pl.BlockSpec((k3 * k3, c2, c3), lambda n: (0, 0, 0)),
            pl.BlockSpec((1, c3), lambda n: (0, 0)),
        ],
        out_specs=pl.BlockSpec((1, 1, c3), lambda n: (n, 0, 0)),
        scratch_shapes=[
            pltpu.VMEM((ho1, wo1, c1), jnp.float32),   # conv1 rows
            pltpu.VMEM((hp1, wp1, c1), jnp.float32),   # pooled act1
            pltpu.VMEM((ho2, wo2, c2), jnp.float32),   # conv2 rows
            pltpu.VMEM((hp2, wp2, c2), jnp.float32),   # pooled act2
            pltpu.VMEM((ho3, wo3, c3), jnp.float32),   # conv3 rows
        ],
        compiler_params=pltpu.CompilerParams(
            dimension_semantics=("parallel",),
            vmem_limit_bytes=32 * 1024 * 1024,
        ),
        cost_estimate=pl.CostEstimate(
            flops=flops, transcendentals=0, bytes_accessed=bytes_accessed),
    )(*inputs)
    return out.reshape(B, c3)


def fc_stack(x_flat, params):
    B, fin = x_flat.shape
    n1 = params["fc1_w"].shape[1]
    n2 = params["fc2_w"].shape[1]
    n3 = params["fc3_w"].shape[1]
    return pl.pallas_call(
        _fc_stack_kernel,
        out_shape=jax.ShapeDtypeStruct((B, n3), jnp.float32),
        grid=(1,),
        in_specs=[
            pl.BlockSpec((B, fin), lambda i: (0, 0)),
            pl.BlockSpec((fin, n1), lambda i: (0, 0)),
            pl.BlockSpec((1, n1), lambda i: (0, 0)),
            pl.BlockSpec((n1, n2), lambda i: (0, 0)),
            pl.BlockSpec((1, n2), lambda i: (0, 0)),
            pl.BlockSpec((n2, n3), lambda i: (0, 0)),
            pl.BlockSpec((1, n3), lambda i: (0, 0)),
        ],
        out_specs=pl.BlockSpec((B, n3), lambda i: (0, 0)),
        compiler_params=pltpu.CompilerParams(
            dimension_semantics=("arbitrary",)),
    )(x_flat, params["fc1_w"], params["fc1_b"],
      params["fc2_w"], params["fc2_b"],
      params["fc3_w"], params["fc3_b"])


# ----------------------------------------------------------------------------
# Deterministic parameter construction (pre-laid-out for the kernels)
# ----------------------------------------------------------------------------
_RIDGE = [
    [[0, 1, 0], [0, 1, 0], [0, 1, 0]],
    [[0, 0, 0], [1, 1, 1], [0, 0, 0]],
    [[1, 0, 0], [0, 1, 0], [0, 0, 1]],
    [[0, 0, 1], [0, 1, 0], [1, 0, 0]],
]
_FACE = [
    [[1, 0.5, 0], [0.5, 0, -0.5], [0, -0.5, -1]],
    [[0, 0.5, 1], [-0.5, 0, 0.5], [-1, -0.5, 0]],
    [[-1, -0.5, 0], [-0.5, 0, 0.5], [0, 0.5, 1]],
    [[0, -0.5, -1], [0.5, 0, -0.5], [1, 0.5, 0]],
    [[1, 1, 1], [0, 0, 0], [-1, -1, -1]],
    [[-1, -1, -1], [0, 0, 0], [1, 1, 1]],
    [[-1, 0, 1], [-1, 0, 1], [-1, 0, 1]],
    [[1, 0, -1], [1, 0, -1], [1, 0, -1]],
]


def _uniform(key, shape, fan_in):
    bound = 1.0 / math.sqrt(fan_in)
    return jax.random.uniform(key, shape, jnp.float32, -bound, bound)


def _conv_taps(w_oihw):
    """(Cout, Cin, KH, KW) -> (KH*KW, Cin, Cout), matching the kernel tap order."""
    co, ci, kh, kw = w_oihw.shape
    return jnp.transpose(w_oihw, (2, 3, 1, 0)).reshape(kh * kw, ci, co)


def init_params(key, fc1_in):
    ks = jax.random.split(key, 10)
    c1, c2, c3 = _CHANNELS
    p = {}
    # conv1: fixed RIDGE + FACE filters, zero bias (mirrors _initialize_conv1_weights).
    w1 = jnp.asarray(_RIDGE + _FACE, jnp.float32).reshape(c1, 1, 3, 3)
    p["conv1_w"] = _conv_taps(w1)
    p["conv1_b"] = jnp.zeros((1, c1), jnp.float32)
    # conv2 / conv3: PyTorch-style default init, pre-laid-out as (KH*KW, Cin, Cout).
    p["conv2_w"] = _conv_taps(_uniform(ks[0], (c2, c1, 5, 5), c1 * 5 * 5))
    p["conv2_b"] = _uniform(ks[1], (1, c2), c1 * 5 * 5)
    p["conv3_w"] = _conv_taps(_uniform(ks[2], (c3, c2, 7, 7), c2 * 7 * 7))
    p["conv3_b"] = _uniform(ks[3], (1, c3), c2 * 7 * 7)
    # fc layers stored as (in, out) / (1, out).
    p["fc1_w"] = _uniform(ks[4], (fc1_in, 100), fc1_in)
    p["fc1_b"] = _uniform(ks[5], (1, 100), fc1_in)
    p["fc2_w"] = _uniform(ks[6], (100, 10), 100)
    p["fc2_b"] = _uniform(ks[7], (1, 10), 100)
    p["fc3_w"] = _uniform(ks[8], (10, 1), 10)
    p["fc3_b"] = _uniform(ks[9], (1, 1), 10)
    return p


# ----------------------------------------------------------------------------
# Forward pass (mirrors RidgeFaceCNN.forward)
# ----------------------------------------------------------------------------
def ridgeface_forward(x_nchw, params):
    x = jnp.transpose(x_nchw, (0, 2, 3, 1))       # NCHW -> NHWC (Cin = 1)
    flat = conv_pool_stack(x, params)             # (B, 20): 3x fused conv+pool+relu
    return fc_stack(flat, params)                 # (B, 1):  fused fc1+relu+fc2+relu+fc3


if __name__ == "__main__":
    B, C, H, W = 2, 1, 48, 48    # 48 -> 46 -> 23 -> 19 -> 9 -> 3 -> 1
    _, (hf, wf) = _conv_geometry(H, W)
    fc1_in = _CHANNELS[-1] * hf * wf              # LazyLinear resolves to 20

    key = jax.random.PRNGKey(0)
    kx, kp = jax.random.split(key)
    x = jax.random.normal(kx, (B, C, H, W), dtype=jnp.float32)
    params = init_params(kp, fc1_in)

    fwd = jax.jit(ridgeface_forward)
    out = jax.block_until_ready(fwd(x, params))
    assert out.shape == (B, 1) and out.dtype == jnp.float32
    print("KERNEL_OK")
</pallas_src>

<mosaic_0001>
module attributes {stable_mosaic.version = 11 : i64} {
  func.func @_conv_stack_kernel(%arg0: i32, %arg1: memref<1x48x48x1xf32, #tpu.memory_space<vmem>>, %arg2: memref<9x1x12xf32, #tpu.memory_space<vmem>>, %arg3: memref<1x12xf32, #tpu.memory_space<vmem>>, %arg4: memref<25x12x20xf32, #tpu.memory_space<vmem>>, %arg5: memref<1x20xf32, #tpu.memory_space<vmem>>, %arg6: memref<49x20x20xf32, #tpu.memory_space<vmem>>, %arg7: memref<1x20xf32, #tpu.memory_space<vmem>>, %arg8: memref<1x1x20xf32, #tpu.memory_space<vmem>>, %arg9: memref<46x46x12xf32, #tpu.memory_space<vmem>>, %arg10: memref<23x23x12xf32, #tpu.memory_space<vmem>>, %arg11: memref<19x19x20xf32, #tpu.memory_space<vmem>>, %arg12: memref<9x9x20xf32, #tpu.memory_space<vmem>>, %arg13: memref<3x3x20xf32, #tpu.memory_space<vmem>>) attributes {dimension_semantics = [#tpu.dimension_semantics<parallel>], iteration_bounds = array<i64: 2>, scalar_prefetch = 0 : i64, scratch_operands = 5 : i64, tpu.core_type = #tpu.core_type<tc>, window_params = [{transform_indices = @transform_0, window_bounds = array<i64: 1, 48, 48, 1>}, {pipeline_mode = #tpu.pipeline_mode<synchronous>, transform_indices = @transform_1, window_bounds = array<i64: 9, 1, 12>}, {pipeline_mode = #tpu.pipeline_mode<synchronous>, transform_indices = @transform_2, window_bounds = array<i64: 1, 12>}, {pipeline_mode = #tpu.pipeline_mode<synchronous>, transform_indices = @transform_3, window_bounds = array<i64: 25, 12, 20>}, {pipeline_mode = #tpu.pipeline_mode<synchronous>, transform_indices = @transform_4, window_bounds = array<i64: 1, 20>}, {pipeline_mode = #tpu.pipeline_mode<synchronous>, transform_indices = @transform_5, window_bounds = array<i64: 49, 20, 20>}, {pipeline_mode = #tpu.pipeline_mode<synchronous>, transform_indices = @transform_6, window_bounds = array<i64: 1, 20>}, {transform_indices = @transform_7, window_bounds = array<i64: 1, 1, 20>}]} {
    %c0_i32 = arith.constant 0 : i32
    %c46_i32 = arith.constant 46 : i32
    %0 = arith.addi %c0_i32, %c46_i32 : i32
    %c1_i32 = arith.constant 1 : i32
    scf.for %arg14 = %c0_i32 to %0 step %c1_i32  : i32 {
      %cst_28 = arith.constant 0.000000e+00 : f32
      %30 = vector.broadcast %cst_28 : f32 to vector<46x12xf32>
      %c0_i32_29 = arith.constant 0 : i32
      %31 = arith.addi %arg14, %c0_i32_29 : i32
      %c0_30 = arith.constant 0 : index
      %32 = arith.index_cast %31 : i32 to index
      %c0_31 = arith.constant 0 : index
      %c0_32 = arith.constant 0 : index
      %33 = vector.load %arg1[%c0_30, %32, %c0_31, %c0_32] : memref<1x48x48x1xf32, #tpu.memory_space<vmem>>, vector<1x1x46x1xf32>
      %34 = vector.shape_cast %33 : vector<1x1x46x1xf32> to vector<46x1xf32>
      %c0_33 = arith.constant 0 : index
      %c0_34 = arith.constant 0 : index
      %c0_35 = arith.constant 0 : index
      %35 = vector.load %arg2[%c0_33, %c0_34, %c0_35] : memref<9x1x12xf32, #tpu.memory_space<vmem>>, vector<1x1x12xf32>
      %36 = vector.shape_cast %35 : vector<1x1x12xf32> to vector<1x12xf32>
      %37 = vector.broadcast %34 : vector<46x1xf32> to vector<46x12xf32>
      %38 = vector.broadcast %36 : vector<1x12xf32> to vector<46x12xf32>
      %39 = arith.mulf %37, %38 : vector<46x12xf32>
      %40 = arith.addf %30, %39 : vector<46x12xf32>
      %c0_i32_36 = arith.constant 0 : i32
      %41 = arith.addi %arg14, %c0_i32_36 : i32
      %c0_37 = arith.constant 0 : index
      %42 = arith.index_cast %41 : i32 to index
      %c1_38 = arith.constant 1 : index
      %c0_39 = arith.constant 0 : index
      %43 = vector.load %arg1[%c0_37, %42, %c1_38, %c0_39] : memref<1x48x48x1xf32, #tpu.memory_space<vmem>>, vector<1x1x46x1xf32>
      %44 = vector.shape_cast %43 : vector<1x1x46x1xf32> to vector<46x1xf32>
      %c1_40 = arith.constant 1 : index
      %c0_41 = arith.constant 0 : index
      %c0_42 = arith.constant 0 : index
      %45 = vector.load %arg2[%c1_40, %c0_41, %c0_42] : memref<9x1x12xf32, #tpu.memory_space<vmem>>, vector<1x1x12xf32>
      %46 = vector.shape_cast %45 : vector<1x1x12xf32> to vector<1x12xf32>
      %47 = vector.broadcast %44 : vector<46x1xf32> to vector<46x12xf32>
      %48 = vector.broadcast %46 : vector<1x12xf32> to vector<46x12xf32>
      %49 = arith.mulf %47, %48 : vector<46x12xf32>
      %50 = arith.addf %40, %49 : vector<46x12xf32>
      %c0_i32_43 = arith.constant 0 : i32
      %51 = arith.addi %arg14, %c0_i32_43 : i32
      %c0_44 = arith.constant 0 : index
      %52 = arith.index_cast %51 : i32 to index
      %c2 = arith.constant 2 : index
      %c0_45 = arith.constant 0 : index
      %53 = vector.load %arg1[%c0_44, %52, %c2, %c0_45] : memref<1x48x48x1xf32, #tpu.memory_space<vmem>>, vector<1x1x46x1xf32>
      %54 = vector.shape_cast %53 : vector<1x1x46x1xf32> to vector<46x1xf32>
      %c2_46 = arith.constant 2 : index
      %c0_47 = arith.constant 0 : index
      %c0_48 = arith.constant 0 : index
      %55 = vector.load %arg2[%c2_46, %c0_47, %c0_48] : memref<9x1x12xf32, #tpu.memory_space<vmem>>, vector<1x1x12xf32>
      %56 = vector.shape_cast %55 : vector<1x1x12xf32> to vector<1x12xf32>
      %57 = vector.broadcast %54 : vector<46x1xf32> to vector<46x12xf32>
      %58 = vector.broadcast %56 : vector<1x12xf32> to vector<46x12xf32>
      %59 = arith.mulf %57, %58 : vector<46x12xf32>
      %60 = arith.addf %50, %59 : vector<46x12xf32>
      %c1_i32_49 = arith.constant 1 : i32
      %61 = arith.addi %arg14, %c1_i32_49 : i32
      %c0_50 = arith.constant 0 : index
      %62 = arith.index_cast %61 : i32 to index
      %c0_51 = arith.constant 0 : index
      %c0_52 = arith.constant 0 : index
      %63 = vector.load %arg1[%c0_50, %62, %c0_51, %c0_52] : memref<1x48x48x1xf32, #tpu.memory_space<vmem>>, vector<1x1x46x1xf32>
      %64 = vector.shape_cast %63 : vector<1x1x46x1xf32> to vector<46x1xf32>
      %c3 = arith.constant 3 : index
      %c0_53 = arith.constant 0 : index
      %c0_54 = arith.constant 0 : index
      %65 = vector.load %arg2[%c3, %c0_53, %c0_54] : memref<9x1x12xf32, #tpu.memory_space<vmem>>, vector<1x1x12xf32>
      %66 = vector.shape_cast %65 : vector<1x1x12xf32> to vector<1x12xf32>
      %67 = vector.broadcast %64 : vector<46x1xf32> to vector<46x12xf32>
      %68 = vector.broadcast %66 : vector<1x12xf32> to vector<46x12xf32>
      %69 = arith.mulf %67, %68 : vector<46x12xf32>
      %70 = arith.addf %60, %69 : vector<46x12xf32>
      %c1_i32_55 = arith.constant 1 : i32
      %71 = arith.addi %arg14, %c1_i32_55 : i32
      %c0_56 = arith.constant 0 : index
      %72 = arith.index_cast %71 : i32 to index
      %c1_57 = arith.constant 1 : index
      %c0_58 = arith.constant 0 : index
      %73 = vector.load %arg1[%c0_56, %72, %c1_57, %c0_58] : memref<1x48x48x1xf32, #tpu.memory_space<vmem>>, vector<1x1x46x1xf32>
      %74 = vector.shape_cast %73 : vector<1x1x46x1xf32> to vector<46x1xf32>
      %c4 = arith.constant 4 : index
      %c0_59 = arith.constant 0 : index
      %c0_60 = arith.constant 0 : index
      %75 = vector.load %arg2[%c4, %c0_59, %c0_60] : memref<9x1x12xf32, #tpu.memory_space<vmem>>, vector<1x1x12xf32>
      %76 = vector.shape_cast %75 : vector<1x1x12xf32> to vector<1x12xf32>
      %77 = vector.broadcast %74 : vector<46x1xf32> to vector<46x12xf32>
      %78 = vector.broadcast %76 : vector<1x12xf32> to vector<46x12xf32>
      %79 = arith.mulf %77, %78 : vector<46x12xf32>
      %80 = arith.addf %70, %79 : vector<46x12xf32>
      %c1_i32_61 = arith.constant 1 : i32
      %81 = arith.addi %arg14, %c1_i32_61 : i32
      %c0_62 = arith.constant 0 : index
      %82 = arith.index_cast %81 : i32 to index
      %c2_63 = arith.constant 2 : index
      %c0_64 = arith.constant 0 : index
      %83 = vector.load %arg1[%c0_62, %82, %c2_63, %c0_64] : memref<1x48x48x1xf32, #tpu.memory_space<vmem>>, vector<1x1x46x1xf32>
      %84 = vector.shape_cast %83 : vector<1x1x46x1xf32> to vector<46x1xf32>
      %c5 = arith.constant 5 : index
      %c0_65 = arith.constant 0 : index
      %c0_66 = arith.constant 0 : index
      %85 = vector.load %arg2[%c5, %c0_65, %c0_66] : memref<9x1x12xf32, #tpu.memory_space<vmem>>, vector<1x1x12xf32>
      %86 = vector.shape_cast %85 : vector<1x1x12xf32> to vector<1x12xf32>
      %87 = vector.broadcast %84 : vector<46x1xf32> to vector<46x12xf32>
      %88 = vector.broadcast %86 : vector<1x12xf32> to vector<46x12xf32>
      %89 = arith.mulf %87, %88 : vector<46x12xf32>
      %90 = arith.addf %80, %89 : vector<46x12xf32>
      %c2_i32_67 = arith.constant 2 : i32
      %91 = arith.addi %arg14, %c2_i32_67 : i32
      %c0_68 = arith.constant 0 : index
      %92 = arith.index_cast %91 : i32 to index
      %c0_69 = arith.constant 0 : index
      %c0_70 = arith.constant 0 : index
      %93 = vector.load %arg1[%c0_68, %92, %c0_69, %c0_70] : memref<1x48x48x1xf32, #tpu.memory_space<vmem>>, vector<1x1x46x1xf32>
      %94 = vector.shape_cast %93 : vector<1x1x46x1xf32> to vector<46x1xf32>
      %c6 = arith.constant 6 : index
      %c0_71 = arith.constant 0 : index
      %c0_72 = arith.constant 0 : index
      %95 = vector.load %arg2[%c6, %c0_71, %c0_72] : memref<9x1x12xf32, #tpu.memory_space<vmem>>, vector<1x1x12xf32>
      %96 = vector.shape_cast %95 : vector<1x1x12xf32> to vector<1x12xf32>
      %97 = vector.broadcast %94 : vector<46x1xf32> to vector<46x12xf32>
      %98 = vector.broadcast %96 : vector<1x12xf32> to vector<46x12xf32>
      %99 = arith.mulf %97, %98 : vector<46x12xf32>
      %100 = arith.addf %90, %99 : vector<46x12xf32>
      %c2_i32_73 = arith.constant 2 : i32
      %101 = arith.addi %arg14, %c2_i32_73 : i32
      %c0_74 = arith.constant 0 : index
      %102 = arith.index_cast %101 : i32 to index
      %c1_75 = arith.constant 1 : index
      %c0_76 = arith.constant 0 : index
      %103 = vector.load %arg1[%c0_74, %102, %c1_75, %c0_76] : memref<1x48x48x1xf32, #tpu.memory_space<vmem>>, vector<1x1x46x1xf32>
      %104 = vector.shape_cast %103 : vector<1x1x46x1xf32> to vector<46x1xf32>
      %c7 = arith.constant 7 : index
      %c0_77 = arith.constant 0 : index
      %c0_78 = arith.constant 0 : index
      %105 = vector.load %arg2[%c7, %c0_77, %c0_78] : memref<9x1x12xf32, #tpu.memory_space<vmem>>, vector<1x1x12xf32>
      %106 = vector.shape_cast %105 : vector<1x1x12xf32> to vector<1x12xf32>
      %107 = vector.broadcast %104 : vector<46x1xf32> to vector<46x12xf32>
      %108 = vector.broadcast %106 : vector<1x12xf32> to vector<46x12xf32>
      %109 = arith.mulf %107, %108 : vector<46x12xf32>
      %110 = arith.addf %100, %109 : vector<46x12xf32>
      %c2_i32_79 = arith.constant 2 : i32
      %111 = arith.addi %arg14, %c2_i32_79 : i32
      %c0_80 = arith.constant 0 : index
      %112 = arith.index_cast %111 : i32 to index
      %c2_81 = arith.constant 2 : index
      %c0_82 = arith.constant 0 : index
      %113 = vector.load %arg1[%c0_80, %112, %c2_81, %c0_82] : memref<1x48x48x1xf32, #tpu.memory_space<vmem>>, vector<1x1x46x1xf32>
      %114 = vector.shape_cast %113 : vector<1x1x46x1xf32> to vector<46x1xf32>
      %c8 = arith.constant 8 : index
      %c0_83 = arith.constant 0 : index
      %c0_84 = arith.constant 0 : index
      %115 = vector.load %arg2[%c8, %c0_83, %c0_84] : memref<9x1x12xf32, #tpu.memory_space<vmem>>, vector<1x1x12xf32>
      %116 = vector.shape_cast %115 : vector<1x1x12xf32> to vector<1x12xf32>
      %117 = vector.broadcast %114 : vector<46x1xf32> to vector<46x12xf32>
      %118 = vector.broadcast %116 : vector<1x12xf32> to vector<46x12xf32>
      %119 = arith.mulf %117, %118 : vector<46x12xf32>
      %120 = arith.addf %110, %119 : vector<46x12xf32>
      %121 = arith.index_cast %arg14 : i32 to index
      %c0_85 = arith.constant 0 : index
      %c0_86 = arith.constant 0 : index
      %122 = vector.load %arg9[%121, %c0_85, %c0_86] : memref<46x46x12xf32, #tpu.memory_space<vmem>>, vector<1x46x12xf32>
      %123 = vector.shape_cast %122 : vector<1x46x12xf32> to vector<46x12xf32>
      %124 = vector.shape_cast %120 : vector<46x12xf32> to vector<1x46x12xf32>
      tpu.vector_store %arg9[%121, %c0_85, %c0_86], %124 {strides = array<i32>} : memref<46x46x12xf32, #tpu.memory_space<vmem>>, vector<1x46x12xf32>,
    }
    %c46_i32_0 = arith.constant 46 : i32
    %c0_i32_1 = arith.constant 0 : i32
    %c23_i32 = arith.constant 23 : i32
    %1 = arith.addi %c0_i32_1, %c23_i32 : i32
    %c1_i32_2 = arith.constant 1 : i32
    scf.for %arg14 = %c0_i32_1 to %1 step %c1_i32_2  : i32 {
      %c2_i32_28 = arith.constant 2 : i32
      %30 = arith.muli %c2_i32_28, %arg14 : i32
      %31 = arith.index_cast %30 : i32 to index
      %c0_29 = arith.constant 0 : index
      %c0_30 = arith.constant 0 : index
      %32 = tpu.strided_load %arg9[%31, %c0_29, %c0_30] {strides = array<i32: 1, 2, 1>} : memref<46x46x12xf32, #tpu.memory_space<vmem>>, vector<1x23x12xf32>
      %33 = vector.shape_cast %32 : vector<1x23x12xf32> to vector<23x12xf32>
      %34 = arith.index_cast %30 : i32 to index
      %c1_31 = arith.constant 1 : index
      %c0_32 = arith.constant 0 : index
      %35 = tpu.strided_load %arg9[%34, %c1_31, %c0_32] {strides = array<i32: 1, 2, 1>} : memref<46x46x12xf32, #tpu.memory_space<vmem>>, vector<1x23x12xf32>
      %36 = vector.shape_cast %35 : vector<1x23x12xf32> to vector<23x12xf32>
      %c1_i32_33 = arith.constant 1 : i32
      %37 = arith.addi %30, %c1_i32_33 : i32
      %38 = arith.index_cast %37 : i32 to index
      %c0_34 = arith.constant 0 : index
      %c0_35 = arith.constant 0 : index
      %39 = tpu.strided_load %arg9[%38, %c0_34, %c0_35] {strides = array<i32: 1, 2, 1>} : memref<46x46x12xf32, #tpu.memory_space<vmem>>, vector<1x23x12xf32>
      %40 = vector.shape_cast %39 : vector<1x23x12xf32> to vector<23x12xf32>
      %c1_i32_36 = arith.constant 1 : i32
      %41 = arith.addi %30, %c1_i32_36 : i32
      %42 = arith.index_cast %41 : i32 to index
      %c1_37 = arith.constant 1 : index
      %c0_38 = arith.constant 0 : index
      %43 = tpu.strided_load %arg9[%42, %c1_37, %c0_38] {strides = array<i32: 1, 2, 1>} : memref<46x46x12xf32, #tpu.memory_space<vmem>>, vector<1x23x12xf32>
      %44 = vector.shape_cast %43 : vector<1x23x12xf32> to vector<23x12xf32>
      %45 = arith.maximumf %33, %36 : vector<23x12xf32>
      %46 = arith.maximumf %40, %44 : vector<23x12xf32>
      %47 = arith.maximumf %45, %46 : vector<23x12xf32>
      %c0_39 = arith.constant 0 : index
      %c0_40 = arith.constant 0 : index
      %48 = vector.load %arg3[%c0_39, %c0_40] : memref<1x12xf32, #tpu.memory_space<vmem>>, vector<1x12xf32>
      %49 = vector.broadcast %48 : vector<1x12xf32> to vector<23x12xf32>
      %50 = arith.addf %47, %49 : vector<23x12xf32>
      %cst_41 = arith.constant 0.000000e+00 : f32
      %51 = vector.broadcast %cst_41 : f32 to vector<23x12xf32>
      %52 = arith.maximumf %50, %51 : vector<23x12xf32>
      %53 = arith.index_cast %arg14 : i32 to index
      %c0_42 = arith.constant 0 : index
      %c0_43 = arith.constant 0 : index
      %54 = vector.load %arg10[%53, %c0_42, %c0_43] : memref<23x23x12xf32, #tpu.memory_space<vmem>>, vector<1x23x12xf32>
      %55 = vector.shape_cast %54 : vector<1x23x12xf32> to vector<23x12xf32>
      %56 = vector.shape_cast %52 : vector<23x12xf32> to vector<1x23x12xf32>
      tpu.vector_store %arg10[%53, %c0_42, %c0_43], %56 {strides = array<i32>} : memref<23x23x12xf32, #tpu.memory_space<vmem>>, vector<1x23x12xf32>,
    }
    %c23_i32_3 = arith.constant 23 : i32
    %c0_i32_4 = arith.constant 0 : i32
    %c19_i32 = arith.constant 19 : i32
    %2 = arith.addi %c0_i32_4, %c19_i32 : i32
    %c1_i32_5 = arith.constant 1 : i32
    scf.for %arg14 = %c0_i32_4 to %2 step %c1_i32_5  : i32 {
      %cst_28 = arith.constant 0.000000e+00 : f32
      %30 = vector.broadcast %cst_28 : f32 to vector<19x20xf32>
      %c0_i32_29 = arith.constant 0 : i32
      %31 = arith.addi %arg14, %c0_i32_29 : i32
      %32 = arith.index_cast %31 : i32 to index
      %c0_30 = arith.constant 0 : index
      %c0_31 = arith.constant 0 : index
      %33 = vector.load %arg10[%32, %c0_30, %c0_31] : memref<23x23x12xf32, #tpu.memory_space<vmem>>, vector<1x19x12xf32>
      %34 = vector.shape_cast %33 : vector<1x19x12xf32> to vector<19x12xf32>
      %c0_32 = arith.constant 0 : index
      %c0_33 = arith.constant 0 : index
      %c0_34 = arith.constant 0 : index
      %35 = vector.load %arg4[%c0_32, %c0_33, %c0_34] : memref<25x12x20xf32, #tpu.memory_space<vmem>>, vector<1x12x20xf32>
      %36 = vector.shape_cast %35 : vector<1x12x20xf32> to vector<12x20xf32>
      %cst_35 = arith.constant dense<0.000000e+00> : vector<19x20xf32>
      %37 = tpu.matmul %34, %36, %cst_35 {dimension_numbers = #tpu.dot_dimension_numbers<[1], [0], [0], [1], [0, 0, 1, 1], [], []>} : vector<19x12xf32>, vector<12x20xf32>, vector<19x20xf32> -> vector<19x20xf32>
      %38 = arith.addf %30, %37 : vector<19x20xf32>
      %c0_i32_36 = arith.constant 0 : i32
      %39 = arith.addi %arg14, %c0_i32_36 : i32
      %40 = arith.index_cast %39 : i32 to index
      %c1_37 = arith.constant 1 : index
      %c0_38 = arith.constant 0 : index
      %41 = vector.load %arg10[%40, %c1_37, %c0_38] : memref<23x23x12xf32, #tpu.memory_space<vmem>>, vector<1x19x12xf32>
      %42 = vector.shape_cast %41 : vector<1x19x12xf32> to vector<19x12xf32>
      %c1_39 = arith.constant 1 : index
      %c0_40 = arith.constant 0 : index
      %c0_41 = arith.constant 0 : index
      %43 = vector.load %arg4[%c1_39, %c0_40, %c0_41] : memref<25x12x20xf32, #tpu.memory_space<vmem>>, vector<1x12x20xf32>
      %44 = vector.shape_cast %43 : vector<1x12x20xf32> to vector<12x20xf32>
      %cst_42 = arith.constant dense<0.000000e+00> : vector<19x20xf32>
      %45 = tpu.matmul %42, %44, %cst_42 {dimension_numbers = #tpu.dot_dimension_numbers<[1], [0], [0], [1], [0, 0, 1, 1], [], []>} : vector<19x12xf32>, vector<12x20xf32>, vector<19x20xf32> -> vector<19x20xf32>
      %46 = arith.addf %38, %45 : vector<19x20xf32>
      %c0_i32_43 = arith.constant 0 : i32
      %47 = arith.addi %arg14, %c0_i32_43 : i32
      %48 = arith.index_cast %47 : i32 to index
      %c2 = arith.constant 2 : index
      %c0_44 = arith.constant 0 : index
      %49 = vector.load %arg10[%48, %c2, %c0_44] : memref<23x23x12xf32, #tpu.memory_space<vmem>>, vector<1x19x12xf32>
      %50 = vector.shape_cast %49 : vector<1x19x12xf32> to vector<19x12xf32>
      %c2_45 = arith.constant 2 : index
      %c0_46 = arith.constant 0 : index
      %c0_47 = arith.constant 0 : index
      %51 = vector.load %arg4[%c2_45, %c0_46, %c0_47] : memref<25x12x20xf32, #tpu.memory_space<vmem>>, vector<1x12x20xf32>
      %52 = vector.shape_cast %51 : vector<1x12x20xf32> to vector<12x20xf32>
      %cst_48 = arith.constant dense<0.000000e+00> : vector<19x20xf32>
      %53 = tpu.matmul %50, %52, %cst_48 {dimension_numbers = #tpu.dot_dimension_numbers<[1], [0], [0], [1], [0, 0, 1, 1], [], []>} : vector<19x12xf32>, vector<12x20xf32>, vector<19x20xf32> -> vector<19x20xf32>
      %54 = arith.addf %46, %53 : vector<19x20xf32>
      %c0_i32_49 = arith.constant 0 : i32
      %55 = arith.addi %arg14, %c0_i32_49 : i32
      %56 = arith.index_cast %55 : i32 to index
      %c3 = arith.constant 3 : index
      %c0_50 = arith.constant 0 : index
      %57 = vector.load %arg10[%56, %c3, %c0_50] : memref<23x23x12xf32, #tpu.memory_space<vmem>>, vector<1x19x12xf32>
      %58 = vector.shape_cast %57 : vector<1x19x12xf32> to vector<19x12xf32>
      %c3_51 = arith.constant 3 : index
      %c0_52 = arith.constant 0 : index
      %c0_53 = arith.constant 0 : index
      %59 = vector.load %arg4[%c3_51, %c0_52, %c0_53] : memref<25x12x20xf32, #tpu.memory_space<vmem>>, vector<1x12x20xf32>
      %60 = vector.shape_cast %59 : vector<1x12x20xf32> to vector<12x20xf32>
      %cst_54 = arith.constant dense<0.000000e+00> : vector<19x20xf32>
      %61 = tpu.matmul %58, %60, %cst_54 {dimension_numbers = #tpu.dot_dimension_numbers<[1], [0], [0], [1], [0, 0, 1, 1], [], []>} : vector<19x12xf32>, vector<12x20xf32>, vector<19x20xf32> -> vector<19x20xf32>
      %62 = arith.addf %54, %61 : vector<19x20xf32>
      %c0_i32_55 = arith.constant 0 : i32
      %63 = arith.addi %arg14, %c0_i32_55 : i32
      %64 = arith.index_cast %63 : i32 to index
      %c4 = arith.constant 4 : index
      %c0_56 = arith.constant 0 : index
      %65 = vector.load %arg10[%64, %c4, %c0_56] : memref<23x23x12xf32, #tpu.memory_space<vmem>>, vector<1x19x12xf32>
      %66 = vector.shape_cast %65 : vector<1x19x12xf32> to vector<19x12xf32>
      %c4_57 = arith.constant 4 : index
      %c0_58 = arith.constant 0 : index
      %c0_59 = arith.constant 0 : index
      %67 = vector.load %arg4[%c4_57, %c0_58, %c0_59] : memref<25x12x20xf32, #tpu.memory_space<vmem>>, vector<1x12x20xf32>
      %68 = vector.shape_cast %67 : vector<1x12x20xf32> to vector<12x20xf32>
      %cst_60 = arith.constant dense<0.000000e+00> : vector<19x20xf32>
      %69 = tpu.matmul %66, %68, %cst_60 {dimension_numbers = #tpu.dot_dimension_numbers<[1], [0], [0], [1], [0, 0, 1, 1], [], []>} : vector<19x12xf32>, vector<12x20xf32>, vector<19x20xf32> -> vector<19x20xf32>
      %70 = arith.addf %62, %69 : vector<19x20xf32>
      %c1_i32_61 = arith.constant 1 : i32
      %71 = arith.addi %arg14, %c1_i32_61 : i32
      %72 = arith.index_cast %71 : i32 to index
      %c0_62 = arith.constant 0 : index
      %c0_63 = arith.constant 0 : index
      %73 = vector.load %arg10[%72, %c0_62, %c0_63] : memref<23x23x12xf32, #tpu.memory_space<vmem>>, vector<1x19x12xf32>
      %74 = vector.shape_cast %73 : vector<1x19x12xf32> to vector<19x12xf32>
      %c5 = arith.constant 5 : index
      %c0_64 = arith.constant 0 : index
      %c0_65 = arith.constant 0 : index
      %75 = vector.load %arg4[%c5, %c0_64, %c0_65] : memref<25x12x20xf32, #tpu.memory_space<vmem>>, vector<1x12x20xf32>
      %76 = vector.shape_cast %75 : vector<1x12x20xf32> to vector<12x20xf32>
      %cst_66 = arith.constant dense<0.000000e+00> : vector<19x20xf32>
      %77 = tpu.matmul %74, %76, %cst_66 {dimension_numbers = #tpu.dot_dimension_numbers<[1], [0], [0], [1], [0, 0, 1, 1], [], []>} : vector<19x12xf32>, vector<12x20xf32>, vector<19x20xf32> -> vector<19x20xf32>
      %78 = arith.addf %70, %77 : vector<19x20xf32>
      %c1_i32_67 = arith.constant 1 : i32
      %79 = arith.addi %arg14, %c1_i32_67 : i32
      %80 = arith.index_cast %79 : i32 to index
      %c1_68 = arith.constant 1 : index
      %c0_69 = arith.constant 0 : index
      %81 = vector.load %arg10[%80, %c1_68, %c0_69] : memref<23x23x12xf32, #tpu.memory_space<vmem>>, vector<1x19x12xf32>
      %82 = vector.shape_cast %81 : vector<1x19x12xf32> to vector<19x12xf32>
      %c6 = arith.constant 6 : index
      %c0_70 = arith.constant 0 : index
      %c0_71 = arith.constant 0 : index
      %83 = vector.load %arg4[%c6, %c0_70, %c0_71] : memref<25x12x20xf32, #tpu.memory_space<vmem>>, vector<1x12x20xf32>
      %84 = vector.shape_cast %83 : vector<1x12x20xf32> to vector<12x20xf32>
      %cst_72 = arith.constant dense<0.000000e+00> : vector<19x20xf32>
      %85 = tpu.matmul %82, %84, %cst_72 {dimension_numbers = #tpu.dot_dimension_numbers<[1], [0], [0], [1], [0, 0, 1, 1], [], []>} : vector<19x12xf32>, vector<12x20xf32>, vector<19x20xf32> -> vector<19x20xf32>
      %86 = arith.addf %78, %85 : vector<19x20xf32>
      %c1_i32_73 = arith.constant 1 : i32
      %87 = arith.addi %arg14, %c1_i32_73 : i32
      %88 = arith.index_cast %87 : i32 to index
      %c2_74 = arith.constant 2 : index
      %c0_75 = arith.constant 0 : index
      %89 = vector.load %arg10[%88, %c2_74, %c0_75] : memref<23x23x12xf32, #tpu.memory_space<vmem>>, vector<1x19x12xf32>
      %90 = vector.shape_cast %89 : vector<1x19x12xf32> to vector<19x12xf32>
      %c7 = arith.constant 7 : index
      %c0_76 = arith.constant 0 : index
      %c0_77 = arith.constant 0 : index
      %91 = vector.load %arg4[%c7, %c0_76, %c0_77] : memref<25x12x20xf32, #tpu.memory_space<vmem>>, vector<1x12x20xf32>
      %92 = vector.shape_cast %91 : vector<1x12x20xf32> to vector<12x20xf32>
      %cst_78 = arith.constant dense<0.000000e+00> : vector<19x20xf32>
      %93 = tpu.matmul %90, %92, %cst_78 {dimension_numbers = #tpu.dot_dimension_numbers<[1], [0], [0], [1], [0, 0, 1, 1], [], []>} : vector<19x12xf32>, vector<12x20xf32>, vector<19x20xf32> -> vector<19x20xf32>
      %94 = arith.addf %86, %93 : vector<19x20xf32>
      %c1_i32_79 = arith.constant 1 : i32
      %95 = arith.addi %arg14, %c1_i32_79 : i32
      %96 = arith.index_cast %95 : i32 to index
      %c3_80 = arith.constant 3 : index
      %c0_81 = arith.constant 0 : index
      %97 = vector.load %arg10[%96, %c3_80, %c0_81] : memref<23x23x12xf32, #tpu.memory_space<vmem>>, vector<1x19x12xf32>
      %98 = vector.shape_cast %97 : vector<1x19x12xf32> to vector<19x12xf32>
      %c8 = arith.constant 8 : index
      %c0_82 = arith.constant 0 : index
      %c0_83 = arith.constant 0 : index
      %99 = vector.load %arg4[%c8, %c0_82, %c0_83] : memref<25x12x20xf32, #tpu.memory_space<vmem>>, vector<1x12x20xf32>
      %100 = vector.shape_cast %99 : vector<1x12x20xf32> to vector<12x20xf32>
      %cst_84 = arith.constant dense<0.000000e+00> : vector<19x20xf32>
      %101 = tpu.matmul %98, %100, %cst_84 {dimension_numbers = #tpu.dot_dimension_numbers<[1], [0], [0], [1], [0, 0, 1, 1], [], []>} : vector<19x12xf32>, vector<12x20xf32>, vector<19x20xf32> -> vector<19x20xf32>
      %102 = arith.addf %94, %101 : vector<19x20xf32>
      %c1_i32_85 = arith.constant 1 : i32
      %103 = arith.addi %arg14, %c1_i32_85 : i32
      %104 = arith.index_cast %103 : i32 to index
      %c4_86 = arith.constant 4 : index
      %c0_87 = arith.constant 0 : index
      %105 = vector.load %arg10[%104, %c4_86, %c0_87] : memref<23x23x12xf32, #tpu.memory_space<vmem>>, vector<1x19x12xf32>
      %106 = vector.shape_cast %105 : vector<1x19x12xf32> to vector<19x12xf32>
      %c9 = arith.constant 9 : index
      %c0_88 = arith.constant 0 : index
      %c0_89 = arith.constant 0 : index
      %107 = vector.load %arg4[%c9, %c0_88, %c0_89] : memref<25x12x20xf32, #tpu.memory_space<vmem>>, vector<1x12x20xf32>
      %108 = vector.shape_cast %107 : vector<1x12x20xf32> to vector<12x20xf32>
      %cst_90 = arith.constant dense<0.000000e+00> : vector<19x20xf32>
      %109 = tpu.matmul %106, %108, %cst_90 {dimension_numbers = #tpu.dot_dimension_numbers<[1], [0], [0], [1], [0, 0, 1, 1], [], []>} : vector<19x12xf32>, vector<12x20xf32>, vector<19x20xf32> -> vector<19x20xf32>
      %110 = arith.addf %102, %109 : vector<19x20xf32>
      %c2_i32_91 = arith.constant 2 : i32
      %111 = arith.addi %arg14, %c2_i32_91 : i32
      %112 = arith.index_cast %111 : i32 to index
      %c0_92 = arith.constant 0 : index
      %c0_93 = arith.constant 0 : index
      %113 = vector.load %arg10[%112, %c0_92, %c0_93] : memref<23x23x12xf32, #tpu.memory_space<vmem>>, vector<1x19x12xf32>
      %114 = vector.shape_cast %113 : vector<1x19x12xf32> to vector<19x12xf32>
      %c10 = arith.constant 10 : index
      %c0_94 = arith.constant 0 : index
      %c0_95 = arith.constant 0 : index
      %115 = vector.load %arg4[%c10, %c0_94, %c0_95] : memref<25x12x20xf32, #tpu.memory_space<vmem>>, vector<1x12x20xf32>
      %116 = vector.shape_cast %115 : vector<1x12x20xf32> to vector<12x20xf32>
      %cst_96 = arith.constant dense<0.000000e+00> : vector<19x20xf32>
      %117 = tpu.matmul %114, %116, %cst_96 {dimension_numbers = #tpu.dot_dimension_numbers<[1], [0], [0], [1], [0, 0, 1, 1], [], []>} : vector<19x12xf32>, vector<12x20xf32>, vector<19x20xf32> -> vector<19x20xf32>
      %118 = arith.addf %110, %117 : vector<19x20xf32>
      %c2_i32_97 = arith.constant 2 : i32
      %119 = arith.addi %arg14, %c2_i32_97 : i32
      %120 = arith.index_cast %119 : i32 to index
      %c1_98 = arith.constant 1 : index
      %c0_99 = arith.constant 0 : index
      %121 = vector.load %arg10[%120, %c1_98, %c0_99] : memref<23x23x12xf32, #tpu.memory_space<vmem>>, vector<1x19x12xf32>
      %122 = vector.shape_cast %121 : vector<1x19x12xf32> to vector<19x12xf32>
      %c11 = arith.constant 11 : index
      %c0_100 = arith.constant 0 : index
      %c0_101 = arith.constant 0 : index
      %123 = vector.load %arg4[%c11, %c0_100, %c0_101] : memref<25x12x20xf32, #tpu.memory_space<vmem>>, vector<1x12x20xf32>
      %124 = vector.shape_cast %123 : vector<1x12x20xf32> to vector<12x20xf32>
      %cst_102 = arith.constant dense<0.000000e+00> : vector<19x20xf32>
      %125 = tpu.matmul %122, %124, %cst_102 {dimension_numbers = #tpu.dot_dimension_numbers<[1], [0], [0], [1], [0, 0, 1, 1], [], []>} : vector<19x12xf32>, vector<12x20xf32>, vector<19x20xf32> -> vector<19x20xf32>
      %126 = arith.addf %118, %125 : vector<19x20xf32>
      %c2_i32_103 = arith.constant 2 : i32
      %127 = arith.addi %arg14, %c2_i32_103 : i32
      %128 = arith.index_cast %127 : i32 to index
      %c2_104 = arith.constant 2 : index
      %c0_105 = arith.constant 0 : index
      %129 = vector.load %arg10[%128, %c2_104, %c0_105] : memref<23x23x12xf32, #tpu.memory_space<vmem>>, vector<1x19x12xf32>
      %130 = vector.shape_cast %129 : vector<1x19x12xf32> to vector<19x12xf32>
      %c12 = arith.constant 12 : index
      %c0_106 = arith.constant 0 : index
      %c0_107 = arith.constant 0 : index
      %131 = vector.load %arg4[%c12, %c0_106, %c0_107] : memref<25x12x20xf32, #tpu.memory_space<vmem>>, vector<1x12x20xf32>
      %132 = vector.shape_cast %131 : vector<1x12x20xf32> to vector<12x20xf32>
      %cst_108 = arith.constant dense<0.000000e+00> : vector<19x20xf32>
      %133 = tpu.matmul %130, %132, %cst_108 {dimension_numbers = #tpu.dot_dimension_numbers<[1], [0], [0], [1], [0, 0, 1, 1], [], []>} : vector<19x12xf32>, vector<12x20xf32>, vector<19x20xf32> -> vector<19x20xf32>
      %134 = arith.addf %126, %133 : vector<19x20xf32>
      %c2_i32_109 = arith.constant 2 : i32
      %135 = arith.addi %arg14, %c2_i32_109 : i32
      %136 = arith.index_cast %135 : i32 to index
      %c3_110 = arith.constant 3 : index
      %c0_111 = arith.constant 0 : index
      %137 = vector.load %arg10[%136, %c3_110, %c0_111] : memref<23x23x12xf32, #tpu.memory_space<vmem>>, vector<1x19x12xf32>
      %138 = vector.shape_cast %137 : vector<1x19x12xf32> to vector<19x12xf32>
      %c13 = arith.constant 13 : index
      %c0_112 = arith.constant 0 : index
      %c0_113 = arith.constant 0 : index
      %139 = vector.load %arg4[%c13, %c0_112, %c0_113] : memref<25x12x20xf32, #tpu.memory_space<vmem>>, vector<1x12x20xf32>
      %140 = vector.shape_cast %139 : vector<1x12x20xf32> to vector<12x20xf32>
      %cst_114 = arith.constant dense<0.000000e+00> : vector<19x20xf32>
      %141 = tpu.matmul %138, %140, %cst_114 {dimension_numbers = #tpu.dot_dimension_numbers<[1], [0], [0], [1], [0, 0, 1, 1], [], []>} : vector<19x12xf32>, vector<12x20xf32>, vector<19x20xf32> -> vector<19x20xf32>
      %142 = arith.addf %134, %141 : vector<19x20xf32>
      %c2_i32_115 = arith.constant 2 : i32
      %143 = arith.addi %arg14, %c2_i32_115 : i32
      %144 = arith.index_cast %143 : i32 to index
      %c4_116 = arith.constant 4 : index
      %c0_117 = arith.constant 0 : index
      %145 = vector.load %arg10[%144, %c4_116, %c0_117] : memref<23x23x12xf32, #tpu.memory_space<vmem>>, vector<1x19x12xf32>
      %146 = vector.shape_cast %145 : vector<1x19x12xf32> to vector<19x12xf32>
      %c14 = arith.constant 14 : index
      %c0_118 = arith.constant 0 : index
      %c0_119 = arith.constant 0 : index
      %147 = vector.load %arg4[%c14, %c0_118, %c0_119] : memref<25x12x20xf32, #tpu.memory_space<vmem>>, vector<1x12x20xf32>
      %148 = vector.shape_cast %147 : vector<1x12x20xf32> to vector<12x20xf32>
      %cst_120 = arith.constant dense<0.000000e+00> : vector<19x20xf32>
      %149 = tpu.matmul %146, %148, %cst_120 {dimension_numbers = #tpu.dot_dimension_numbers<[1], [0], [0], [1], [0, 0, 1, 1], [], []>} : vector<19x12xf32>, vector<12x20xf32>, vector<19x20xf32> -> vector<19x20xf32>
      %150 = arith.addf %142, %149 : vector<19x20xf32>
      %c3_i32_121 = arith.constant 3 : i32
      %151 = arith.addi %arg14, %c3_i32_121 : i32
      %152 = arith.index_cast %151 : i32 to index
      %c0_122 = arith.constant 0 : index
      %c0_123 = arith.constant 0 : index
      %153 = vector.load %arg10[%152, %c0_122, %c0_123] : memref<23x23x12xf32, #tpu.memory_space<vmem>>, vector<1x19x12xf32>
      %154 = vector.shape_cast %153 : vector<1x19x12xf32> to vector<19x12xf32>
      %c15 = arith.constant 15 : index
      %c0_124 = arith.constant 0 : index
      %c0_125 = arith.constant 0 : index
      %155 = vector.load %arg4[%c15, %c0_124, %c0_125] : memref<25x12x20xf32, #tpu.memory_space<vmem>>, vector<1x12x20xf32>
      %156 = vector.shape_cast %155 : vector<1x12x20xf32> to vector<12x20xf32>
      %cst_126 = arith.constant dense<0.000000e+00> : vector<19x20xf32>
      %157 = tpu.matmul %154, %156, %cst_126 {dimension_numbers = #tpu.dot_dimension_numbers<[1], [0], [0], [1], [0, 0, 1, 1], [], []>} : vector<19x12xf32>, vector<12x20xf32>, vector<19x20xf32> -> vector<19x20xf32>
      %158 = arith.addf %150, %157 : vector<19x20xf32>
      %c3_i32_127 = arith.constant 3 : i32
      %159 = arith.addi %arg14, %c3_i32_127 : i32
      %160 = arith.index_cast %159 : i32 to index
      %c1_128 = arith.constant 1 : index
      %c0_129 = arith.constant 0 : index
      %161 = vector.load %arg10[%160, %c1_128, %c0_129] : memref<23x23x12xf32, #tpu.memory_space<vmem>>, vector<1x19x12xf32>
      %162 = vector.shape_cast %161 : vector<1x19x12xf32> to vector<19x12xf32>
      %c16 = arith.constant 16 : index
      %c0_130 = arith.constant 0 : index
      %c0_131 = arith.constant 0 : index
      %163 = vector.load %arg4[%c16, %c0_130, %c0_131] : memref<25x12x20xf32, #tpu.memory_space<vmem>>, vector<1x12x20xf32>
      %164 = vector.shape_cast %163 : vector<1x12x20xf32> to vector<12x20xf32>
      %cst_132 = arith.constant dense<0.000000e+00> : vector<19x20xf32>
      %165 = tpu.matmul %162, %164, %cst_132 {dimension_numbers = #tpu.dot_dimension_numbers<[1], [0], [0], [1], [0, 0, 1, 1], [], []>} : vector<19x12xf32>, vector<12x20xf32>, vector<19x20xf32> -> vector<19x20xf32>
      %166 = arith.addf %158, %165 : vector<19x20xf32>
      %c3_i32_133 = arith.constant 3 : i32
      %167 = arith.addi %arg14, %c3_i32_133 : i32
      %168 = arith.index_cast %167 : i32 to index
      %c2_134 = arith.constant 2 : index
      %c0_135 = arith.constant 0 : index
      %169 = vector.load %arg10[%168, %c2_134, %c0_135] : memref<23x23x12xf32, #tpu.memory_space<vmem>>, vector<1x19x12xf32>
      %170 = vector.shape_cast %169 : vector<1x19x12xf32> to vector<19x12xf32>
      %c17 = arith.constant 17 : index
      %c0_136 = arith.constant 0 : index
      %c0_137 = arith.constant 0 : index
      %171 = vector.load %arg4[%c17, %c0_136, %c0_137] : memref<25x12x20xf32, #tpu.memory_space<vmem>>, vector<1x12x20xf32>
      %172 = vector.shape_cast %171 : vector<1x12x20xf32> to vector<12x20xf32>
      %cst_138 = arith.constant dense<0.000000e+00> : vector<19x20xf32>
      %173 = tpu.matmul %170, %172, %cst_138 {dimension_numbers = #tpu.dot_dimension_numbers<[1], [0], [0], [1], [0, 0, 1, 1], [], []>} : vector<19x12xf32>, vector<12x20xf32>, vector<19x20xf32> -> vector<19x20xf32>
      %174 = arith.addf %166, %173 : vector<19x20xf32>
      %c3_i32_139 = arith.constant 3 : i32
      %175 = arith.addi %arg14, %c3_i32_139 : i32
      %176 = arith.index_cast %175 : i32 to index
      %c3_140 = arith.constant 3 : index
      %c0_141 = arith.constant 0 : index
      %177 = vector.load %arg10[%176, %c3_140, %c0_141] : memref<23x23x12xf32, #tpu.memory_space<vmem>>, vector<1x19x12xf32>
      %178 = vector.shape_cast %177 : vector<1x19x12xf32> to vector<19x12xf32>
      %c18 = arith.constant 18 : index
      %c0_142 = arith.constant 0 : index
      %c0_143 = arith.constant 0 : index
      %179 = vector.load %arg4[%c18, %c0_142, %c0_143] : memref<25x12x20xf32, #tpu.memory_space<vmem>>, vector<1x12x20xf32>
      %180 = vector.shape_cast %179 : vector<1x12x20xf32> to vector<12x20xf32>
      %cst_144 = arith.constant dense<0.000000e+00> : vector<19x20xf32>
      %181 = tpu.matmul %178, %180, %cst_144 {dimension_numbers = #tpu.dot_dimension_numbers<[1], [0], [0], [1], [0, 0, 1, 1], [], []>} : vector<19x12xf32>, vector<12x20xf32>, vector<19x20xf32> -> vector<19x20xf32>
      %182 = arith.addf %174, %181 : vector<19x20xf32>
      %c3_i32_145 = arith.constant 3 : i32
      %183 = arith.addi %arg14, %c3_i32_145 : i32
      %184 = arith.index_cast %183 : i32 to index
      %c4_146 = arith.constant 4 : index
      %c0_147 = arith.constant 0 : index
      %185 = vector.load %arg10[%184, %c4_146, %c0_147] : memref<23x23x12xf32, #tpu.memory_space<vmem>>, vector<1x19x12xf32>
      %186 = vector.shape_cast %185 : vector<1x19x12xf32> to vector<19x12xf32>
      %c19 = arith.constant 19 : index
      %c0_148 = arith.constant 0 : index
      %c0_149 = arith.constant 0 : index
      %187 = vector.load %arg4[%c19, %c0_148, %c0_149] : memref<25x12x20xf32, #tpu.memory_space<vmem>>, vector<1x12x20xf32>
      %188 = vector.shape_cast %187 : vector<1x12x20xf32> to vector<12x20xf32>
      %cst_150 = arith.constant dense<0.000000e+00> : vector<19x20xf32>
      %189 = tpu.matmul %186, %188, %cst_150 {dimension_numbers = #tpu.dot_dimension_numbers<[1], [0], [0], [1], [0, 0, 1, 1], [], []>} : vector<19x12xf32>, vector<12x20xf32>, vector<19x20xf32> -> vector<19x20xf32>
      %190 = arith.addf %182, %189 : vector<19x20xf32>
      %c4_i32 = arith.constant 4 : i32
      %191 = arith.addi %arg14, %c4_i32 : i32
      %192 = arith.index_cast %191 : i32 to index
      %c0_151 = arith.constant 0 : index
      %c0_152 = arith.constant 0 : index
      %193 = vector.load %arg10[%192, %c0_151, %c0_152] : memref<23x23x12xf32, #tpu.memory_space<vmem>>, vector<1x19x12xf32>
      %194 = vector.shape_cast %193 : vector<1x19x12xf32> to vector<19x12xf32>
      %c20 = arith.constant 20 : index
      %c0_153 = arith.constant 0 : index
      %c0_154 = arith.constant 0 : index
      %195 = vector.load %arg4[%c20, %c0_153, %c0_154] : memref<25x12x20xf32, #tpu.memory_space<vmem>>, vector<1x12x20xf32>
      %196 = vector.shape_cast %195 : vector<1x12x20xf32> to vector<12x20xf32>
      %cst_155 = arith.constant dense<0.000000e+00> : vector<19x20xf32>
      %197 = tpu.matmul %194, %196, %cst_155 {dimension_numbers = #tpu.dot_dimension_numbers<[1], [0], [0], [1], [0, 0, 1, 1], [], []>} : vector<19x12xf32>, vector<12x20xf32>, vector<19x20xf32> -> vector<19x20xf32>
      %198 = arith.addf %190, %197 : vector<19x20xf32>
      %c4_i32_156 = arith.constant 4 : i32
      %199 = arith.addi %arg14, %c4_i32_156 : i32
      %200 = arith.index_cast %199 : i32 to index
      %c1_157 = arith.constant 1 : index
      %c0_158 = arith.constant 0 : index
      %201 = vector.load %arg10[%200, %c1_157, %c0_158] : memref<23x23x12xf32, #tpu.memory_space<vmem>>, vector<1x19x12xf32>
      %202 = vector.shape_cast %201 : vector<1x19x12xf32> to vector<19x12xf32>
      %c21 = arith.constant 21 : index
      %c0_159 = arith.constant 0 : index
      %c0_160 = arith.constant 0 : index
      %203 = vector.load %arg4[%c21, %c0_159, %c0_160] : memref<25x12x20xf32, #tpu.memory_space<vmem>>, vector<1x12x20xf32>
      %204 = vector.shape_cast %203 : vector<1x12x20xf32> to vector<12x20xf32>
      %cst_161 = arith.constant dense<0.000000e+00> : vector<19x20xf32>
      %205 = tpu.matmul %202, %204, %cst_161 {dimension_numbers = #tpu.dot_dimension_numbers<[1], [0], [0], [1], [0, 0, 1, 1], [], []>} : vector<19x12xf32>, vector<12x20xf32>, vector<19x20xf32> -> vector<19x20xf32>
      %206 = arith.addf %198, %205 : vector<19x20xf32>
      %c4_i32_162 = arith.constant 4 : i32
      %207 = arith.addi %arg14, %c4_i32_162 : i32
      %208 = arith.index_cast %207 : i32 to index
      %c2_163 = arith.constant 2 : index
      %c0_164 = arith.constant 0 : index
      %209 = vector.load %arg10[%208, %c2_163, %c0_164] : memref<23x23x12xf32, #tpu.memory_space<vmem>>, vector<1x19x12xf32>
      %210 = vector.shape_cast %209 : vector<1x19x12xf32> to vector<19x12xf32>
      %c22 = arith.constant 22 : index
      %c0_165 = arith.constant 0 : index
      %c0_166 = arith.constant 0 : index
      %211 = vector.load %arg4[%c22, %c0_165, %c0_166] : memref<25x12x20xf32, #tpu.memory_space<vmem>>, vector<1x12x20xf32>
      %212 = vector.shape_cast %211 : vector<1x12x20xf32> to vector<12x20xf32>
      %cst_167 = arith.constant dense<0.000000e+00> : vector<19x20xf32>
      %213 = tpu.matmul %210, %212, %cst_167 {dimension_numbers = #tpu.dot_dimension_numbers<[1], [0], [0], [1], [0, 0, 1, 1], [], []>} : vector<19x12xf32>, vector<12x20xf32>, vector<19x20xf32> -> vector<19x20xf32>
      %214 = arith.addf %206, %213 : vector<19x20xf32>
      %c4_i32_168 = arith.constant 4 : i32
      %215 = arith.addi %arg14, %c4_i32_168 : i32
      %216 = arith.index_cast %215 : i32 to index
      %c3_169 = arith.constant 3 : index
      %c0_170 = arith.constant 0 : index
      %217 = vector.load %arg10[%216, %c3_169, %c0_170] : memref<23x23x12xf32, #tpu.memory_space<vmem>>, vector<1x19x12xf32>
      %218 = vector.shape_cast %217 : vector<1x19x12xf32> to vector<19x12xf32>
      %c23 = arith.constant 23 : index
      %c0_171 = arith.constant 0 : index
      %c0_172 = arith.constant 0 : index
      %219 = vector.load %arg4[%c23, %c0_171, %c0_172] : memref<25x12x20xf32, #tpu.memory_space<vmem>>, vector<1x12x20xf32>
      %220 = vector.shape_cast %219 : vector<1x12x20xf32> to vector<12x20xf32>
      %cst_173 = arith.constant dense<0.000000e+00> : vector<19x20xf32>
      %221 = tpu.matmul %218, %220, %cst_173 {dimension_numbers = #tpu.dot_dimension_numbers<[1], [0], [0], [1], [0, 0, 1, 1], [], []>} : vector<19x12xf32>, vector<12x20xf32>, vector<19x20xf32> -> vector<19x20xf32>
      %222 = arith.addf %214, %221 : vector<19x20xf32>
      %c4_i32_174 = arith.constant 4 : i32
      %223 = arith.addi %arg14, %c4_i32_174 : i32
      %224 = arith.index_cast %223 : i32 to index
      %c4_175 = arith.constant 4 : index
      %c0_176 = arith.constant 0 : index
      %225 = vector.load %arg10[%224, %c4_175, %c0_176] : memref<23x23x12xf32, #tpu.memory_space<vmem>>, vector<1x19x12xf32>
      %226 = vector.shape_cast %225 : vector<1x19x12xf32> to vector<19x12xf32>
      %c24 = arith.constant 24 : index
      %c0_177 = arith.constant 0 : index
      %c0_178 = arith.constant 0 : index
      %227 = vector.load %arg4[%c24, %c0_177, %c0_178] : memref<25x12x20xf32, #tpu.memory_space<vmem>>, vector<1x12x20xf32>
      %228 = vector.shape_cast %227 : vector<1x12x20xf32> to vector<12x20xf32>
      %cst_179 = arith.constant dense<0.000000e+00> : vector<19x20xf32>
      %229 = tpu.matmul %226, %228, %cst_179 {dimension_numbers = #tpu.dot_dimension_numbers<[1], [0], [0], [1], [0, 0, 1, 1], [], []>} : vector<19x12xf32>, vector<12x20xf32>, vector<19x20xf32> -> vector<19x20xf32>
      %230 = arith.addf %222, %229 : vector<19x20xf32>
      %231 = arith.index_cast %arg14 : i32 to index
      %c0_180 = arith.constant 0 : index
      %c0_181 = arith.constant 0 : index
      %232 = vector.load %arg11[%231, %c0_180, %c0_181] : memref<19x19x20xf32, #tpu.memory_space<vmem>>, vector<1x19x20xf32>
      %233 = vector.shape_cast %232 : vector<1x19x20xf32> to vector<19x20xf32>
      %234 = vector.shape_cast %230 : vector<19x20xf32> to vector<1x19x20xf32>
      tpu.vector_store %arg11[%231, %c0_180, %c0_181], %234 {strides = array<i32>} : memref<19x19x20xf32, #tpu.memory_space<vmem>>, vector<1x19x20xf32>,
    }
    %c19_i32_6 = arith.constant 19 : i32
    %c0_i32_7 = arith.constant 0 : i32
    %c9_i32 = arith.constant 9 : i32
    %3 = arith.addi %c0_i32_7, %c9_i32 : i32
    %c1_i32_8 = arith.constant 1 : i32
    scf.for %arg14 = %c0_i32_7 to %3 step %c1_i32_8  : i32 {
      %c2_i32_28 = arith.constant 2 : i32
      %30 = arith.muli %c2_i32_28, %arg14 : i32
      %31 = arith.index_cast %30 : i32 to index
      %c0_29 = arith.constant 0 : index
      %c0_30 = arith.constant 0 : index
      %32 = tpu.strided_load %arg11[%31, %c0_29, %c0_30] {strides = array<i32: 1, 2, 1>} : memref<19x19x20xf32, #tpu.memory_space<vmem>>, vector<1x9x20xf32>
      %33 = vector.shape_cast %32 : vector<1x9x20xf32> to vector<9x20xf32>
      %34 = arith.index_cast %30 : i32 to index
      %c1_31 = arith.constant 1 : index
      %c0_32 = arith.constant 0 : index
      %35 = tpu.strided_load %arg11[%34, %c1_31, %c0_32] {strides = array<i32: 1, 2, 1>} : memref<19x19x20xf32, #tpu.memory_space<vmem>>, vector<1x9x20xf32>
      %36 = vector.shape_cast %35 : vector<1x9x20xf32> to vector<9x20xf32>
      %c1_i32_33 = arith.constant 1 : i32
      %37 = arith.addi %30, %c1_i32_33 : i32
      %38 = arith.index_cast %37 : i32 to index
      %c0_34 = arith.constant 0 : index
      %c0_35 = arith.constant 0 : index
      %39 = tpu.strided_load %arg11[%38, %c0_34, %c0_35] {strides = array<i32: 1, 2, 1>} : memref<19x19x20xf32, #tpu.memory_space<vmem>>, vector<1x9x20xf32>
      %40 = vector.shape_cast %39 : vector<1x9x20xf32> to vector<9x20xf32>
      %c1_i32_36 = arith.constant 1 : i32
      %41 = arith.addi %30, %c1_i32_36 : i32
      %42 = arith.index_cast %41 : i32 to index
      %c1_37 = arith.constant 1 : index
      %c0_38 = arith.constant 0 : index
      %43 = tpu.strided_load %arg11[%42, %c1_37, %c0_38] {strides = array<i32: 1, 2, 1>} : memref<19x19x20xf32, #tpu.memory_space<vmem>>, vector<1x9x20xf32>
      %44 = vector.shape_cast %43 : vector<1x9x20xf32> to vector<9x20xf32>
      %45 = arith.maximumf %33, %36 : vector<9x20xf32>
      %46 = arith.maximumf %40, %44 : vector<9x20xf32>
      %47 = arith.maximumf %45, %46 : vector<9x20xf32>
      %c0_39 = arith.constant 0 : index
      %c0_40 = arith.constant 0 : index
      %48 = vector.load %arg5[%c0_39, %c0_40] : memref<1x20xf32, #tpu.memory_space<vmem>>, vector<1x20xf32>
      %49 = vector.broadcast %48 : vector<1x20xf32> to vector<9x20xf32>
      %50 = arith.addf %47, %49 : vector<9x20xf32>
      %cst_41 = arith.constant 0.000000e+00 : f32
      %51 = vector.broadcast %cst_41 : f32 to vector<9x20xf32>
      %52 = arith.maximumf %50, %51 : vector<9x20xf32>
      %53 = arith.index_cast %arg14 : i32 to index
      %c0_42 = arith.constant 0 : index
      %c0_43 = arith.constant 0 : index
      %54 = vector.load %arg12[%53, %c0_42, %c0_43] : memref<9x9x20xf32, #tpu.memory_space<vmem>>, vector<1x9x20xf32>
      %55 = vector.shape_cast %54 : vector<1x9x20xf32> to vector<9x20xf32>
      %56 = vector.shape_cast %52 : vector<9x20xf32> to vector<1x9x20xf32>
      tpu.vector_store %arg12[%53, %c0_42, %c0_43], %56 {strides = array<i32>} : memref<9x9x20xf32, #tpu.memory_space<vmem>>, vector<1x9x20xf32>,
    }
    %c9_i32_9 = arith.constant 9 : i32
    %c0_i32_10 = arith.constant 0 : i32
    %c3_i32 = arith.constant 3 : i32
    %4 = arith.addi %c0_i32_10, %c3_i32 : i32
    %c1_i32_11 = arith.constant 1 : i32
    scf.for %arg14 = %c0_i32_10 to %4 step %c1_i32_11  : i32 {
      %cst_28 = arith.constant 0.000000e+00 : f32
      %30 = vector.broadcast %cst_28 : f32 to vector<3x20xf32>
      %c0_i32_29 = arith.constant 0 : i32
      %31 = arith.addi %arg14, %c0_i32_29 : i32
      %32 = arith.index_cast %31 : i32 to index
      %c0_30 = arith.constant 0 : index
      %c0_31 = arith.constant 0 : index
      %33 = vector.load %arg12[%32, %c0_30, %c0_31] : memref<9x9x20xf32, #tpu.memory_space<vmem>>, vector<1x3x20xf32>
      %34 = vector.shape_cast %33 : vector<1x3x20xf32> to vector<3x20xf32>
      %c0_32 = arith.constant 0 : index
      %c0_33 = arith.constant 0 : index
      %c0_34 = arith.constant 0 : index
      %35 = vector.load %arg6[%c0_32, %c0_33, %c0_34] : memref<49x20x20xf32, #tpu.memory_space<vmem>>, vector<1x20x20xf32>
      %36 = vector.shape_cast %35 : vector<1x20x20xf32> to vector<20x20xf32>
      %cst_35 = arith.constant dense<0.000000e+00> : vector<3x20xf32>
      %37 = tpu.matmul %34, %36, %cst_35 {dimension_numbers = #tpu.dot_dimension_numbers<[1], [0], [0], [1], [0, 0, 1, 1], [], []>} : vector<3x20xf32>, vector<20x20xf32>, vector<3x20xf32> -> vector<3x20xf32>
      %38 = arith.addf %30, %37 : vector<3x20xf32>
      %c0_i32_36 = arith.constant 0 : i32
      %39 = arith.addi %arg14, %c0_i32_36 : i32
      %40 = arith.index_cast %39 : i32 to index
      %c1_37 = arith.constant 1 : index
      %c0_38 = arith.constant 0 : index
      %41 = vector.load %arg12[%40, %c1_37, %c0_38] : memref<9x9x20xf32, #tpu.memory_space<vmem>>, vector<1x3x20xf32>
      %42 = vector.shape_cast %41 : vector<1x3x20xf32> to vector<3x20xf32>
      %c1_39 = arith.constant 1 : index
      %c0_40 = arith.constant 0 : index
      %c0_41 = arith.constant 0 : index
      %43 = vector.load %arg6[%c1_39, %c0_40, %c0_41] : memref<49x20x20xf32, #tpu.memory_space<vmem>>, vector<1x20x20xf32>
      %44 = vector.shape_cast %43 : vector<1x20x20xf32> to vector<20x20xf32>
      %cst_42 = arith.constant dense<0.000000e+00> : vector<3x20xf32>
      %45 = tpu.matmul %42, %44, %cst_42 {dimension_numbers = #tpu.dot_dimension_numbers<[1], [0], [0], [1], [0, 0, 1, 1], [], []>} : vector<3x20xf32>, vector<20x20xf32>, vector<3x20xf32> -> vector<3x20xf32>
      %46 = arith.addf %38, %45 : vector<3x20xf32>
      %c0_i32_43 = arith.constant 0 : i32
      %47 = arith.addi %arg14, %c0_i32_43 : i32
      %48 = arith.index_cast %47 : i32 to index
      %c2 = arith.constant 2 : index
      %c0_44 = arith.constant 0 : index
      %49 = vector.load %arg12[%48, %c2, %c0_44] : memref<9x9x20xf32, #tpu.memory_space<vmem>>, vector<1x3x20xf32>
      %50 = vector.shape_cast %49 : vector<1x3x20xf32> to vector<3x20xf32>
      %c2_45 = arith.constant 2 : index
      %c0_46 = arith.constant 0 : index
      %c0_47 = arith.constant 0 : index
      %51 = vector.load %arg6[%c2_45, %c0_46, %c0_47] : memref<49x20x20xf32, #tpu.memory_space<vmem>>, vector<1x20x20xf32>
      %52 = vector.shape_cast %51 : vector<1x20x20xf32> to vector<20x20xf32>
      %cst_48 = arith.constant dense<0.000000e+00> : vector<3x20xf32>
      %53 = tpu.matmul %50, %52, %cst_48 {dimension_numbers = #tpu.dot_dimension_numbers<[1], [0], [0], [1], [0, 0, 1, 1], [], []>} : vector<3x20xf32>, vector<20x20xf32>, vector<3x20xf32> -> vector<3x20xf32>
      %54 = arith.addf %46, %53 : vector<3x20xf32>
      %c0_i32_49 = arith.constant 0 : i32
      %55 = arith.addi %arg14, %c0_i32_49 : i32
      %56 = arith.index_cast %55 : i32 to index
      %c3 = arith.constant 3 : index
      %c0_50 = arith.constant 0 : index
      %57 = vector.load %arg12[%56, %c3, %c0_50] : memref<9x9x20xf32, #tpu.memory_space<vmem>>, vector<1x3x20xf32>
      %58 = vector.shape_cast %57 : vector<1x3x20xf32> to vector<3x20xf32>
      %c3_51 = arith.constant 3 : index
      %c0_52 = arith.constant 0 : index
      %c0_53 = arith.constant 0 : index
      %59 = vector.load %arg6[%c3_51, %c0_52, %c0_53] : memref<49x20x20xf32, #tpu.memory_space<vmem>>, vector<1x20x20xf32>
      %60 = vector.shape_cast %59 : vector<1x20x20xf32> to vector<20x20xf32>
      %cst_54 = arith.constant dense<0.000000e+00> : vector<3x20xf32>
      %61 = tpu.matmul %58, %60, %cst_54 {dimension_numbers = #tpu.dot_dimension_numbers<[1], [0], [0], [1], [0, 0, 1, 1], [], []>} : vector<3x20xf32>, vector<20x20xf32>, vector<3x20xf32> -> vector<3x20xf32>
      %62 = arith.addf %54, %61 : vector<3x20xf32>
      %c0_i32_55 = arith.constant 0 : i32
      %63 = arith.addi %arg14, %c0_i32_55 : i32
      %64 = arith.index_cast %63 : i32 to index
      %c4 = arith.constant 4 : index
      %c0_56 = arith.constant 0 : index
      %65 = vector.load %arg12[%64, %c4, %c0_56] : memref<9x9x20xf32, #tpu.memory_space<vmem>>, vector<1x3x20xf32>
      %66 = vector.shape_cast %65 : vector<1x3x20xf32> to vector<3x20xf32>
      %c4_57 = arith.constant 4 : index
      %c0_58 = arith.constant 0 : index
      %c0_59 = arith.constant 0 : index
      %67 = vector.load %arg6[%c4_57, %c0_58, %c0_59] : memref<49x20x20xf32, #tpu.memory_space<vmem>>, vector<1x20x20xf32>
      %68 = vector.shape_cast %67 : vector<1x20x20xf32> to vector<20x20xf32>
      %cst_60 = arith.constant dense<0.000000e+00> : vector<3x20xf32>
      %69 = tpu.matmul %66, %68, %cst_60 {dimension_numbers = #tpu.dot_dimension_numbers<[1], [0], [0], [1], [0, 0, 1, 1], [], []>} : vector<3x20xf32>, vector<20x20xf32>, vector<3x20xf32> -> vector<3x20xf32>
      %70 = arith.addf %62, %69 : vector<3x20xf32>
      %c0_i32_61 = arith.constant 0 : i32
      %71 = arith.addi %arg14, %c0_i32_61 : i32
      %72 = arith.index_cast %71 : i32 to index
      %c5 = arith.constant 5 : index
      %c0_62 = arith.constant 0 : index
      %73 = vector.load %arg12[%72, %c5, %c0_62] : memref<9x9x20xf32, #tpu.memory_space<vmem>>, vector<1x3x20xf32>
      %74 = vector.shape_cast %73 : vector<1x3x20xf32> to vector<3x20xf32>
      %c5_63 = arith.constant 5 : index
      %c0_64 = arith.constant 0 : index
      %c0_65 = arith.constant 0 : index
      %75 = vector.load %arg6[%c5_63, %c0_64, %c0_65] : memref<49x20x20xf32, #tpu.memory_space<vmem>>, vector<1x20x20xf32>
      %76 = vector.shape_cast %75 : vector<1x20x20xf32> to vector<20x20xf32>
      %cst_66 = arith.constant dense<0.000000e+00> : vector<3x20xf32>
      %77 = tpu.matmul %74, %76, %cst_66 {dimension_numbers = #tpu.dot_dimension_numbers<[1], [0], [0], [1], [0, 0, 1, 1], [], []>} : vector<3x20xf32>, vector<20x20xf32>, vector<3x20xf32> -> vector<3x20xf32>
      %78 = arith.addf %70, %77 : vector<3x20xf32>
      %c0_i32_67 = arith.constant 0 : i32
      %79 = arith.addi %arg14, %c0_i32_67 : i32
      %80 = arith.index_cast %79 : i32 to index
      %c6 = arith.constant 6 : index
      %c0_68 = arith.constant 0 : index
      %81 = vector.load %arg12[%80, %c6, %c0_68] : memref<9x9x20xf32, #tpu.memory_space<vmem>>, vector<1x3x20xf32>
      %82 = vector.shape_cast %81 : vector<1x3x20xf32> to vector<3x20xf32>
      %c6_69 = arith.constant 6 : index
      %c0_70 = arith.constant 0 : index
      %c0_71 = arith.constant 0 : index
      %83 = vector.load %arg6[%c6_69, %c0_70, %c0_71] : memref<49x20x20xf32, #tpu.memory_space<vmem>>, vector<1x20x20xf32>
      %84 = vector.shape_cast %83 : vector<1x20x20xf32> to vector<20x20xf32>
      %cst_72 = arith.constant dense<0.000000e+00> : vector<3x20xf32>
      %85 = tpu.matmul %82, %84, %cst_72 {dimension_numbers = #tpu.dot_dimension_numbers<[1], [0], [0], [1], [0, 0, 1, 1], [], []>} : vector<3x20xf32>, vector<20x20xf32>, vector<3x20xf32> -> vector<3x20xf32>
      %86 = arith.addf %78, %85 : vector<3x20xf32>
      %c1_i32_73 = arith.constant 1 : i32
      %87 = arith.addi %arg14, %c1_i32_73 : i32
      %88 = arith.index_cast %87 : i32 to index
      %c0_74 = arith.constant 0 : index
      %c0_75 = arith.constant 0 : index
      %89 = vector.load %arg12[%88, %c0_74, %c0_75] : memref<9x9x20xf32, #tpu.memory_space<vmem>>, vector<1x3x20xf32>
      %90 = vector.shape_cast %89 : vector<1x3x20xf32> to vector<3x20xf32>
      %c7 = arith.constant 7 : index
      %c0_76 = arith.constant 0 : index
      %c0_77 = arith.constant 0 : index
      %91 = vector.load %arg6[%c7, %c0_76, %c0_77] : memref<49x20x20xf32, #tpu.memory_space<vmem>>, vector<1x20x20xf32>
      %92 = vector.shape_cast %91 : vector<1x20x20xf32> to vector<20x20xf32>
      %cst_78 = arith.constant dense<0.000000e+00> : vector<3x20xf32>
      %93 = tpu.matmul %90, %92, %cst_78 {dimension_numbers = #tpu.dot_dimension_numbers<[1], [0], [0], [1], [0, 0, 1, 1], [], []>} : vector<3x20xf32>, vector<20x20xf32>, vector<3x20xf32> -> vector<3x20xf32>
      %94 = arith.addf %86, %93 : vector<3x20xf32>
      %c1_i32_79 = arith.constant 1 : i32
      %95 = arith.addi %arg14, %c1_i32_79 : i32
      %96 = arith.index_cast %95 : i32 to index
      %c1_80 = arith.constant 1 : index
      %c0_81 = arith.constant 0 : index
      %97 = vector.load %arg12[%96, %c1_80, %c0_81] : memref<9x9x20xf32, #tpu.memory_space<vmem>>, vector<1x3x20xf32>
      %98 = vector.shape_cast %97 : vector<1x3x20xf32> to vector<3x20xf32>
      %c8 = arith.constant 8 : index
      %c0_82 = arith.constant 0 : index
      %c0_83 = arith.constant 0 : index
      %99 = vector.load %arg6[%c8, %c0_82, %c0_83] : memref<49x20x20xf32, #tpu.memory_space<vmem>>, vector<1x20x20xf32>
      %100 = vector.shape_cast %99 : vector<1x20x20xf32> to vector<20x20xf32>
      %cst_84 = arith.constant dense<0.000000e+00> : vector<3x20xf32>
      %101 = tpu.matmul %98, %100, %cst_84 {dimension_numbers = #tpu.dot_dimension_numbers<[1], [0], [0], [1], [0, 0, 1, 1], [], []>} : vector<3x20xf32>, vector<20x20xf32>, vector<3x20xf32> -> vector<3x20xf32>
      %102 = arith.addf %94, %101 : vector<3x20xf32>
      %c1_i32_85 = arith.constant 1 : i32
      %103 = arith.addi %arg14, %c1_i32_85 : i32
      %104 = arith.index_cast %103 : i32 to index
      %c2_86 = arith.constant 2 : index
      %c0_87 = arith.constant 0 : index
      %105 = vector.load %arg12[%104, %c2_86, %c0_87] : memref<9x9x20xf32, #tpu.memory_space<vmem>>, vector<1x3x20xf32>
      %106 = vector.shape_cast %105 : vector<1x3x20xf32> to vector<3x20xf32>
      %c9 = arith.constant 9 : index
      %c0_88 = arith.constant 0 : index
      %c0_89 = arith.constant 0 : index
      %107 = vector.load %arg6[%c9, %c0_88, %c0_89] : memref<49x20x20xf32, #tpu.memory_space<vmem>>, vector<1x20x20xf32>
      %108 = vector.shape_cast %107 : vector<1x20x20xf32> to vector<20x20xf32>
      %cst_90 = arith.constant dense<0.000000e+00> : vector<3x20xf32>
      %109 = tpu.matmul %106, %108, %cst_90 {dimension_numbers = #tpu.dot_dimension_numbers<[1], [0], [0], [1], [0, 0, 1, 1], [], []>} : vector<3x20xf32>, vector<20x20xf32>, vector<3x20xf32> -> vector<3x20xf32>
      %110 = arith.addf %102, %109 : vector<3x20xf32>
      %c1_i32_91 = arith.constant 1 : i32
      %111 = arith.addi %arg14, %c1_i32_91 : i32
      %112 = arith.index_cast %111 : i32 to index
      %c3_92 = arith.constant 3 : index
      %c0_93 = arith.constant 0 : index
      %113 = vector.load %arg12[%112, %c3_92, %c0_93] : memref<9x9x20xf32, #tpu.memory_space<vmem>>, vector<1x3x20xf32>
      %114 = vector.shape_cast %113 : vector<1x3x20xf32> to vector<3x20xf32>
      %c10 = arith.constant 10 : index
      %c0_94 = arith.constant 0 : index
      %c0_95 = arith.constant 0 : index
      %115 = vector.load %arg6[%c10, %c0_94, %c0_95] : memref<49x20x20xf32, #tpu.memory_space<vmem>>, vector<1x20x20xf32>
      %116 = vector.shape_cast %115 : vector<1x20x20xf32> to vector<20x20xf32>
      %cst_96 = arith.constant dense<0.000000e+00> : vector<3x20xf32>
      %117 = tpu.matmul %114, %116, %cst_96 {dimension_numbers = #tpu.dot_dimension_numbers<[1], [0], [0], [1], [0, 0, 1, 1], [], []>} : vector<3x20xf32>, vector<20x20xf32>, vector<3x20xf32> -> vector<3x20xf32>
      %118 = arith.addf %110, %117 : vector<3x20xf32>
      %c1_i32_97 = arith.constant 1 : i32
      %119 = arith.addi %arg14, %c1_i32_97 : i32
      %120 = arith.index_cast %119 : i32 to index
      %c4_98 = arith.constant 4 : index
      %c0_99 = arith.constant 0 : index
      %121 = vector.load %arg12[%120, %c4_98, %c0_99] : memref<9x9x20xf32, #tpu.memory_space<vmem>>, vector<1x3x20xf32>
      %122 = vector.shape_cast %121 : vector<1x3x20xf32> to vector<3x20xf32>
      %c11 = arith.constant 11 : index
      %c0_100 = arith.constant 0 : index
      %c0_101 = arith.constant 0 : index
      %123 = vector.load %arg6[%c11, %c0_100, %c0_101] : memref<49x20x20xf32, #tpu.memory_space<vmem>>, vector<1x20x20xf32>
      %124 = vector.shape_cast %123 : vector<1x20x20xf32> to vector<20x20xf32>
      %cst_102 = arith.constant dense<0.000000e+00> : vector<3x20xf32>
      %125 = tpu.matmul %122, %124, %cst_102 {dimension_numbers = #tpu.dot_dimension_numbers<[1], [0], [0], [1], [0, 0, 1, 1], [], []>} : vector<3x20xf32>, vector<20x20xf32>, vector<3x20xf32> -> vector<3x20xf32>
      %126 = arith.addf %118, %125 : vector<3x20xf32>
      %c1_i32_103 = arith.constant 1 : i32
      %127 = arith.addi %arg14, %c1_i32_103 : i32
      %128 = arith.index_cast %127 : i32 to index
      %c5_104 = arith.constant 5 : index
      %c0_105 = arith.constant 0 : index
      %129 = vector.load %arg12[%128, %c5_104, %c0_105] : memref<9x9x20xf32, #tpu.memory_space<vmem>>, vector<1x3x20xf32>
      %130 = vector.shape_cast %129 : vector<1x3x20xf32> to vector<3x20xf32>
      %c12 = arith.constant 12 : index
      %c0_106 = arith.constant 0 : index
      %c0_107 = arith.constant 0 : index
      %131 = vector.load %arg6[%c12, %c0_106, %c0_107] : memref<49x20x20xf32, #tpu.memory_space<vmem>>, vector<1x20x20xf32>
      %132 = vector.shape_cast %131 : vector<1x20x20xf32> to vector<20x20xf32>
      %cst_108 = arith.constant dense<0.000000e+00> : vector<3x20xf32>
      %133 = tpu.matmul %130, %132, %cst_108 {dimension_numbers = #tpu.dot_dimension_numbers<[1], [0], [0], [1], [0, 0, 1, 1], [], []>} : vector<3x20xf32>, vector<20x20xf32>, vector<3x20xf32> -> vector<3x20xf32>
      %134 = arith.addf %126, %133 : vector<3x20xf32>
      %c1_i32_109 = arith.constant 1 : i32
      %135 = arith.addi %arg14, %c1_i32_109 : i32
      %136 = arith.index_cast %135 : i32 to index
      %c6_110 = arith.constant 6 : index
      %c0_111 = arith.constant 0 : index
      %137 = vector.load %arg12[%136, %c6_110, %c0_111] : memref<9x9x20xf32, #tpu.memory_space<vmem>>, vector<1x3x20xf32>
      %138 = vector.shape_cast %137 : vector<1x3x20xf32> to vector<3x20xf32>
      %c13 = arith.constant 13 : index
      %c0_112 = arith.constant 0 : index
      %c0_113 = arith.constant 0 : index
      %139 = vector.load %arg6[%c13, %c0_112, %c0_113] : memref<49x20x20xf32, #tpu.memory_space<vmem>>, vector<1x20x20xf32>
      %140 = vector.shape_cast %139 : vector<1x20x20xf32> to vector<20x20xf32>
      %cst_114 = arith.constant dense<0.000000e+00> : vector<3x20xf32>
      %141 = tpu.matmul %138, %140, %cst_114 {dimension_numbers = #tpu.dot_dimension_numbers<[1], [0], [0], [1], [0, 0, 1, 1], [], []>} : vector<3x20xf32>, vector<20x20xf32>, vector<3x20xf32> -> vector<3x20xf32>
      %142 = arith.addf %134, %141 : vector<3x20xf32>
      %c2_i32_115 = arith.constant 2 : i32
      %143 = arith.addi %arg14, %c2_i32_115 : i32
      %144 = arith.index_cast %143 : i32 to index
      %c0_116 = arith.constant 0 : index
      %c0_117 = arith.constant 0 : index
      %145 = vector.load %arg12[%144, %c0_116, %c0_117] : memref<9x9x20xf32, #tpu.memory_space<vmem>>, vector<1x3x20xf32>
      %146 = vector.shape_cast %145 : vector<1x3x20xf32> to vector<3x20xf32>
      %c14 = arith.constant 14 : index
      %c0_118 = arith.constant 0 : index
      %c0_119 = arith.constant 0 : index
      %147 = vector.load %arg6[%c14, %c0_118, %c0_119] : memref<49x20x20xf32, #tpu.memory_space<vmem>>, vector<1x20x20xf32>
      %148 = vector.shape_cast %147 : vector<1x20x20xf32> to vector<20x20xf32>
      %cst_120 = arith.constant dense<0.000000e+00> : vector<3x20xf32>
      %149 = tpu.matmul %146, %148, %cst_120 {dimension_numbers = #tpu.dot_dimension_numbers<[1], [0], [0], [1], [0, 0, 1, 1], [], []>} : vector<3x20xf32>, vector<20x20xf32>, vector<3x20xf32> -> vector<3x20xf32>
      %150 = arith.addf %142, %149 : vector<3x20xf32>
      %c2_i32_121 = arith.constant 2 : i32
      %151 = arith.addi %arg14, %c2_i32_121 : i32
      %152 = arith.index_cast %151 : i32 to index
      %c1_122 = arith.constant 1 : index
      %c0_123 = arith.constant 0 : index
      %153 = vector.load %arg12[%152, %c1_122, %c0_123] : memref<9x9x20xf32, #tpu.memory_space<vmem>>, vector<1x3x20xf32>
      %154 = vector.shape_cast %153 : vector<1x3x20xf32> to vector<3x20xf32>
      %c15 = arith.constant 15 : index
      %c0_124 = arith.constant 0 : index
      %c0_125 = arith.constant 0 : index
      %155 = vector.load %arg6[%c15, %c0_124, %c0_125] : memref<49x20x20xf32, #tpu.memory_space<vmem>>, vector<1x20x20xf32>
      %156 = vector.shape_cast %155 : vector<1x20x20xf32> to vector<20x20xf32>
      %cst_126 = arith.constant dense<0.000000e+00> : vector<3x20xf32>
      %157 = tpu.matmul %154, %156, %cst_126 {dimension_numbers = #tpu.dot_dimension_numbers<[1], [0], [0], [1], [0, 0, 1, 1], [], []>} : vector<3x20xf32>, vector<20x20xf32>, vector<3x20xf32> -> vector<3x20xf32>
      %158 = arith.addf %150, %157 : vector<3x20xf32>
      %c2_i32_127 = arith.constant 2 : i32
      %159 = arith.addi %arg14, %c2_i32_127 : i32
      %160 = arith.index_cast %159 : i32 to index
      %c2_128 = arith.constant 2 : index
      %c0_129 = arith.constant 0 : index
      %161 = vector.load %arg12[%160, %c2_128, %c0_129] : memref<9x9x20xf32, #tpu.memory_space<vmem>>, vector<1x3x20xf32>
      %162 = vector.shape_cast %161 : vector<1x3x20xf32> to vector<3x20xf32>
      %c16 = arith.constant 16 : index
      %c0_130 = arith.constant 0 : index
      %c0_131 = arith.constant 0 : index
      %163 = vector.load %arg6[%c16, %c0_130, %c0_131] : memref<49x20x20xf32, #tpu.memory_space<vmem>>, vector<1x20x20xf32>
      %164 = vector.shape_cast %163 : vector<1x20x20xf32> to vector<20x20xf32>
      %cst_132 = arith.constant dense<0.000000e+00> : vector<3x20xf32>
      %165 = tpu.matmul %162, %164, %cst_132 {dimension_numbers = #tpu.dot_dimension_numbers<[1], [0], [0], [1], [0, 0, 1, 1], [], []>} : vector<3x20xf32>, vector<20x20xf32>, vector<3x20xf32> -> vector<3x20xf32>
      %166 = arith.addf %158, %165 : vector<3x20xf32>
      %c2_i32_133 = arith.constant 2 : i32
      %167 = arith.addi %arg14, %c2_i32_133 : i32
      %168 = arith.index_cast %167 : i32 to index
      %c3_134 = arith.constant 3 : index
      %c0_135 = arith.constant 0 : index
      %169 = vector.load %arg12[%168, %c3_134, %c0_135] : memref<9x9x20xf32, #tpu.memory_space<vmem>>, vector<1x3x20xf32>
      %170 = vector.shape_cast %169 : vector<1x3x20xf32> to vector<3x20xf32>
      %c17 = arith.constant 17 : index
      %c0_136 = arith.constant 0 : index
      %c0_137 = arith.constant 0 : index
      %171 = vector.load %arg6[%c17, %c0_136, %c0_137] : memref<49x20x20xf32, #tpu.memory_space<vmem>>, vector<1x20x20xf32>
      %172 = vector.shape_cast %171 : vector<1x20x20xf32> to vector<20x20xf32>
      %cst_138 = arith.constant dense<0.000000e+00> : vector<3x20xf32>
      %173 = tpu.matmul %170, %172, %cst_138 {dimension_numbers = #tpu.dot_dimension_numbers<[1], [0], [0], [1], [0, 0, 1, 1], [], []>} : vector<3x20xf32>, vector<20x20xf32>, vector<3x20xf32> -> vector<3x20xf32>
      %174 = arith.addf %166, %173 : vector<3x20xf32>
      %c2_i32_139 = arith.constant 2 : i32
      %175 = arith.addi %arg14, %c2_i32_139 : i32
      %176 = arith.index_cast %175 : i32 to index
      %c4_140 = arith.constant 4 : index
      %c0_141 = arith.constant 0 : index
      %177 = vector.load %arg12[%176, %c4_140, %c0_141] : memref<9x9x20xf32, #tpu.memory_space<vmem>>, vector<1x3x20xf32>
      %178 = vector.shape_cast %177 : vector<1x3x20xf32> to vector<3x20xf32>
      %c18 = arith.constant 18 : index
      %c0_142 = arith.constant 0 : index
      %c0_143 = arith.constant 0 : index
      %179 = vector.load %arg6[%c18, %c0_142, %c0_143] : memref<49x20x20xf32, #tpu.memory_space<vmem>>, vector<1x20x20xf32>
      %180 = vector.shape_cast %179 : vector<1x20x20xf32> to vector<20x20xf32>
      %cst_144 = arith.constant dense<0.000000e+00> : vector<3x20xf32>
      %181 = tpu.matmul %178, %180, %cst_144 {dimension_numbers = #tpu.dot_dimension_numbers<[1], [0], [0], [1], [0, 0, 1, 1], [], []>} : vector<3x20xf32>, vector<20x20xf32>, vector<3x20xf32> -> vector<3x20xf32>
      %182 = arith.addf %174, %181 : vector<3x20xf32>
      %c2_i32_145 = arith.constant 2 : i32
      %183 = arith.addi %arg14, %c2_i32_145 : i32
      %184 = arith.index_cast %183 : i32 to index
      %c5_146 = arith.constant 5 : index
      %c0_147 = arith.constant 0 : index
      %185 = vector.load %arg12[%184, %c5_146, %c0_147] : memref<9x9x20xf32, #tpu.memory_space<vmem>>, vector<1x3x20xf32>
      %186 = vector.shape_cast %185 : vector<1x3x20xf32> to vector<3x20xf32>
      %c19 = arith.constant 19 : index
      %c0_148 = arith.constant 0 : index
      %c0_149 = arith.constant 0 : index
      %187 = vector.load %arg6[%c19, %c0_148, %c0_149] : memref<49x20x20xf32, #tpu.memory_space<vmem>>, vector<1x20x20xf32>
      %188 = vector.shape_cast %187 : vector<1x20x20xf32> to vector<20x20xf32>
      %cst_150 = arith.constant dense<0.000000e+00> : vector<3x20xf32>
      %189 = tpu.matmul %186, %188, %cst_150 {dimension_numbers = #tpu.dot_dimension_numbers<[1], [0], [0], [1], [0, 0, 1, 1], [], []>} : vector<3x20xf32>, vector<20x20xf32>, vector<3x20xf32> -> vector<3x20xf32>
      %190 = arith.addf %182, %189 : vector<3x20xf32>
      %c2_i32_151 = arith.constant 2 : i32
      %191 = arith.addi %arg14, %c2_i32_151 : i32
      %192 = arith.index_cast %191 : i32 to index
      %c6_152 = arith.constant 6 : index
      %c0_153 = arith.constant 0 : index
      %193 = vector.load %arg12[%192, %c6_152, %c0_153] : memref<9x9x20xf32, #tpu.memory_space<vmem>>, vector<1x3x20xf32>
      %194 = vector.shape_cast %193 : vector<1x3x20xf32> to vector<3x20xf32>
      %c20 = arith.constant 20 : index
      %c0_154 = arith.constant 0 : index
      %c0_155 = arith.constant 0 : index
      %195 = vector.load %arg6[%c20, %c0_154, %c0_155] : memref<49x20x20xf32, #tpu.memory_space<vmem>>, vector<1x20x20xf32>
      %196 = vector.shape_cast %195 : vector<1x20x20xf32> to vector<20x20xf32>
      %cst_156 = arith.constant dense<0.000000e+00> : vector<3x20xf32>
      %197 = tpu.matmul %194, %196, %cst_156 {dimension_numbers = #tpu.dot_dimension_numbers<[1], [0], [0], [1], [0, 0, 1, 1], [], []>} : vector<3x20xf32>, vector<20x20xf32>, vector<3x20xf32> -> vector<3x20xf32>
      %198 = arith.addf %190, %197 : vector<3x20xf32>
      %c3_i32_157 = arith.constant 3 : i32
      %199 = arith.addi %arg14, %c3_i32_157 : i32
      %200 = arith.index_cast %199 : i32 to index
      %c0_158 = arith.constant 0 : index
      %c0_159 = arith.constant 0 : index
      %201 = vector.load %arg12[%200, %c0_158, %c0_159] : memref<9x9x20xf32, #tpu.memory_space<vmem>>, vector<1x3x20xf32>
      %202 = vector.shape_cast %201 : vector<1x3x20xf32> to vector<3x20xf32>
      %c21 = arith.constant 21 : index
      %c0_160 = arith.constant 0 : index
      %c0_161 = arith.constant 0 : index
      %203 = vector.load %arg6[%c21, %c0_160, %c0_161] : memref<49x20x20xf32, #tpu.memory_space<vmem>>, vector<1x20x20xf32>
      %204 = vector.shape_cast %203 : vector<1x20x20xf32> to vector<20x20xf32>
      %cst_162 = arith.constant dense<0.000000e+00> : vector<3x20xf32>
      %205 = tpu.matmul %202, %204, %cst_162 {dimension_numbers = #tpu.dot_dimension_numbers<[1], [0], [0], [1], [0, 0, 1, 1], [], []>} : vector<3x20xf32>, vector<20x20xf32>, vector<3x20xf32> -> vector<3x20xf32>
      %206 = arith.addf %198, %205 : vector<3x20xf32>
      %c3_i32_163 = arith.constant 3 : i32
      %207 = arith.addi %arg14, %c3_i32_163 : i32
      %208 = arith.index_cast %207 : i32 to index
      %c1_164 = arith.constant 1 : index
      %c0_165 = arith.constant 0 : index
      %209 = vector.load %arg12[%208, %c1_164, %c0_165] : memref<9x9x20xf32, #tpu.memory_space<vmem>>, vector<1x3x20xf32>
      %210 = vector.shape_cast %209 : vector<1x3x20xf32> to vector<3x20xf32>
      %c22 = arith.constant 22 : index
      %c0_166 = arith.constant 0 : index
      %c0_167 = arith.constant 0 : index
      %211 = vector.load %arg6[%c22, %c0_166, %c0_167] : memref<49x20x20xf32, #tpu.memory_space<vmem>>, vector<1x20x20xf32>
      %212 = vector.shape_cast %211 : vector<1x20x20xf32> to vector<20x20xf32>
      %cst_168 = arith.constant dense<0.000000e+00> : vector<3x20xf32>
      %213 = tpu.matmul %210, %212, %cst_168 {dimension_numbers = #tpu.dot_dimension_numbers<[1], [0], [0], [1], [0, 0, 1, 1], [], []>} : vector<3x20xf32>, vector<20x20xf32>, vector<3x20xf32> -> vector<3x20xf32>
      %214 = arith.addf %206, %213 : vector<3x20xf32>
      %c3_i32_169 = arith.constant 3 : i32
      %215 = arith.addi %arg14, %c3_i32_169 : i32
      %216 = arith.index_cast %215 : i32 to index
      %c2_170 = arith.constant 2 : index
      %c0_171 = arith.constant 0 : index
      %217 = vector.load %arg12[%216, %c2_170, %c0_171] : memref<9x9x20xf32, #tpu.memory_space<vmem>>, vector<1x3x20xf32>
      %218 = vector.shape_cast %217 : vector<1x3x20xf32> to vector<3x20xf32>
      %c23 = arith.constant 23 : index
      %c0_172 = arith.constant 0 : index
      %c0_173 = arith.constant 0 : index
      %219 = vector.load %arg6[%c23, %c0_172, %c0_173] : memref<49x20x20xf32, #tpu.memory_space<vmem>>, vector<1x20x20xf32>
      %220 = vector.shape_cast %219 : vector<1x20x20xf32> to vector<20x20xf32>
      %cst_174 = arith.constant dense<0.000000e+00> : vector<3x20xf32>
      %221 = tpu.matmul %218, %220, %cst_174 {dimension_numbers = #tpu.dot_dimension_numbers<[1], [0], [0], [1], [0, 0, 1, 1], [], []>} : vector<3x20xf32>, vector<20x20xf32>, vector<3x20xf32> -> vector<3x20xf32>
      %222 = arith.addf %214, %221 : vector<3x20xf32>
      %c3_i32_175 = arith.constant 3 : i32
      %223 = arith.addi %arg14, %c3_i32_175 : i32
      %224 = arith.index_cast %223 : i32 to index
      %c3_176 = arith.constant 3 : index
      %c0_177 = arith.constant 0 : index
      %225 = vector.load %arg12[%224, %c3_176, %c0_177] : memref<9x9x20xf32, #tpu.memory_space<vmem>>, vector<1x3x20xf32>
      %226 = vector.shape_cast %225 : vector<1x3x20xf32> to vector<3x20xf32>
      %c24 = arith.constant 24 : index
      %c0_178 = arith.constant 0 : index
      %c0_179 = arith.constant 0 : index
      %227 = vector.load %arg6[%c24, %c0_178, %c0_179] : memref<49x20x20xf32, #tpu.memory_space<vmem>>, vector<1x20x20xf32>
      %228 = vector.shape_cast %227 : vector<1x20x20xf32> to vector<20x20xf32>
      %cst_180 = arith.constant dense<0.000000e+00> : vector<3x20xf32>
      %229 = tpu.matmul %226, %228, %cst_180 {dimension_numbers = #tpu.dot_dimension_numbers<[1], [0], [0], [1], [0, 0, 1, 1], [], []>} : vector<3x20xf32>, vector<20x20xf32>, vector<3x20xf32> -> vector<3x20xf32>
      %230 = arith.addf %222, %229 : vector<3x20xf32>
      %c3_i32_181 = arith.constant 3 : i32
      %231 = arith.addi %arg14, %c3_i32_181 : i32
      %232 = arith.index_cast %231 : i32 to index
      %c4_182 = arith.constant 4 : index
      %c0_183 = arith.constant 0 : index
      %233 = vector.load %arg12[%232, %c4_182, %c0_183] : memref<9x9x20xf32, #tpu.memory_space<vmem>>, vector<1x3x20xf32>
      %234 = vector.shape_cast %233 : vector<1x3x20xf32> to vector<3x20xf32>
      %c25 = arith.constant 25 : index
      %c0_184 = arith.constant 0 : index
      %c0_185 = arith.constant 0 : index
      %235 = vector.load %arg6[%c25, %c0_184, %c0_185] : memref<49x20x20xf32, #tpu.memory_space<vmem>>, vector<1x20x20xf32>
      %236 = vector.shape_cast %235 : vector<1x20x20xf32> to vector<20x20xf32>
      %cst_186 = arith.constant dense<0.000000e+00> : vector<3x20xf32>
      %237 = tpu.matmul %234, %236, %cst_186 {dimension_numbers = #tpu.dot_dimension_numbers<[1], [0], [0], [1], [0, 0, 1, 1], [], []>} : vector<3x20xf32>, vector<20x20xf32>, vector<3x20xf32> -> vector<3x20xf32>
      %238 = arith.addf %230, %237 : vector<3x20xf32>
      %c3_i32_187 = arith.constant 3 : i32
      %239 = arith.addi %arg14, %c3_i32_187 : i32
      %240 = arith.index_cast %239 : i32 to index
      %c5_188 = arith.constant 5 : index
      %c0_189 = arith.constant 0 : index
      %241 = vector.load %arg12[%240, %c5_188, %c0_189] : memref<9x9x20xf32, #tpu.memory_space<vmem>>, vector<1x3x20xf32>
      %242 = vector.shape_cast %241 : vector<1x3x20xf32> to vector<3x20xf32>
      %c26 = arith.constant 26 : index
      %c0_190 = arith.constant 0 : index
      %c0_191 = arith.constant 0 : index
      %243 = vector.load %arg6[%c26, %c0_190, %c0_191] : memref<49x20x20xf32, #tpu.memory_space<vmem>>, vector<1x20x20xf32>
      %244 = vector.shape_cast %243 : vector<1x20x20xf32> to vector<20x20xf32>
      %cst_192 = arith.constant dense<0.000000e+00> : vector<3x20xf32>
      %245 = tpu.matmul %242, %244, %cst_192 {dimension_numbers = #tpu.dot_dimension_numbers<[1], [0], [0], [1], [0, 0, 1, 1], [], []>} : vector<3x20xf32>, vector<20x20xf32>, vector<3x20xf32> -> vector<3x20xf32>
      %246 = arith.addf %238, %245 : vector<3x20xf32>
      %c3_i32_193 = arith.constant 3 : i32
      %247 = arith.addi %arg14, %c3_i32_193 : i32
      %248 = arith.index_cast %247 : i32 to index
      %c6_194 = arith.constant 6 : index
      %c0_195 = arith.constant 0 : index
      %249 = vector.load %arg12[%248, %c6_194, %c0_195] : memref<9x9x20xf32, #tpu.memory_space<vmem>>, vector<1x3x20xf32>
      %250 = vector.shape_cast %249 : vector<1x3x20xf32> to vector<3x20xf32>
      %c27 = arith.constant 27 : index
      %c0_196 = arith.constant 0 : index
      %c0_197 = arith.constant 0 : index
      %251 = vector.load %arg6[%c27, %c0_196, %c0_197] : memref<49x20x20xf32, #tpu.memory_space<vmem>>, vector<1x20x20xf32>
      %252 = vector.shape_cast %251 : vector<1x20x20xf32> to vector<20x20xf32>
      %cst_198 = arith.constant dense<0.000000e+00> : vector<3x20xf32>
      %253 = tpu.matmul %250, %252, %cst_198 {dimension_numbers = #tpu.dot_dimension_numbers<[1], [0], [0], [1], [0, 0, 1, 1], [], []>} : vector<3x20xf32>, vector<20x20xf32>, vector<3x20xf32> -> vector<3x20xf32>
      %254 = arith.addf %246, %253 : vector<3x20xf32>
      %c4_i32 = arith.constant 4 : i32
      %255 = arith.addi %arg14, %c4_i32 : i32
      %256 = arith.index_cast %255 : i32 to index
      %c0_199 = arith.constant 0 : index
      %c0_200 = arith.constant 0 : index
      %257 = vector.load %arg12[%256, %c0_199, %c0_200] : memref<9x9x20xf32, #tpu.memory_space<vmem>>, vector<1x3x20xf32>
      %258 = vector.shape_cast %257 : vector<1x3x20xf32> to vector<3x20xf32>
      %c28 = arith.constant 28 : index
      %c0_201 = arith.constant 0 : index
      %c0_202 = arith.constant 0 : index
      %259 = vector.load %arg6[%c28, %c0_201, %c0_202] : memref<49x20x20xf32, #tpu.memory_space<vmem>>, vector<1x20x20xf32>
      %260 = vector.shape_cast %259 : vector<1x20x20xf32> to vector<20x20xf32>
      %cst_203 = arith.constant dense<0.000000e+00> : vector<3x20xf32>
      %261 = tpu.matmul %258, %260, %cst_203 {dimension_numbers = #tpu.dot_dimension_numbers<[1], [0], [0], [1], [0, 0, 1, 1], [], []>} : vector<3x20xf32>, vector<20x20xf32>, vector<3x20xf32> -> vector<3x20xf32>
      %262 = arith.addf %254, %261 : vector<3x20xf32>
      %c4_i32_204 = arith.constant 4 : i32
      %263 = arith.addi %arg14, %c4_i32_204 : i32
      %264 = arith.index_cast %263 : i32 to index
      %c1_205 = arith.constant 1 : index
      %c0_206 = arith.constant 0 : index
      %265 = vector.load %arg12[%264, %c1_205, %c0_206] : memref<9x9x20xf32, #tpu.memory_space<vmem>>, vector<1x3x20xf32>
      %266 = vector.shape_cast %265 : vector<1x3x20xf32> to vector<3x20xf32>
      %c29 = arith.constant 29 : index
      %c0_207 = arith.constant 0 : index
      %c0_208 = arith.constant 0 : index
      %267 = vector.load %arg6[%c29, %c0_207, %c0_208] : memref<49x20x20xf32, #tpu.memory_space<vmem>>, vector<1x20x20xf32>
      %268 = vector.shape_cast %267 : vector<1x20x20xf32> to vector<20x20xf32>
      %cst_209 = arith.constant dense<0.000000e+00> : vector<3x20xf32>
      %269 = tpu.matmul %266, %268, %cst_209 {dimension_numbers = #tpu.dot_dimension_numbers<[1], [0], [0], [1], [0, 0, 1, 1], [], []>} : vector<3x20xf32>, vector<20x20xf32>, vector<3x20xf32> -> vector<3x20xf32>
      %270 = arith.addf %262, %269 : vector<3x20xf32>
      %c4_i32_210 = arith.constant 4 : i32
      %271 = arith.addi %arg14, %c4_i32_210 : i32
      %272 = arith.index_cast %271 : i32 to index
      %c2_211 = arith.constant 2 : index
      %c0_212 = arith.constant 0 : index
      %273 = vector.load %arg12[%272, %c2_211, %c0_212] : memref<9x9x20xf32, #tpu.memory_space<vmem>>, vector<1x3x20xf32>
      %274 = vector.shape_cast %273 : vector<1x3x20xf32> to vector<3x20xf32>
      %c30 = arith.constant 30 : index
      %c0_213 = arith.constant 0 : index
      %c0_214 = arith.constant 0 : index
      %275 = vector.load %arg6[%c30, %c0_213, %c0_214] : memref<49x20x20xf32, #tpu.memory_space<vmem>>, vector<1x20x20xf32>
      %276 = vector.shape_cast %275 : vector<1x20x20xf32> to vector<20x20xf32>
      %cst_215 = arith.constant dense<0.000000e+00> : vector<3x20xf32>
      %277 = tpu.matmul %274, %276, %cst_215 {dimension_numbers = #tpu.dot_dimension_numbers<[1], [0], [0], [1], [0, 0, 1, 1], [], []>} : vector<3x20xf32>, vector<20x20xf32>, vector<3x20xf32> -> vector<3x20xf32>
      %278 = arith.addf %270, %277 : vector<3x20xf32>
      %c4_i32_216 = arith.constant 4 : i32
      %279 = arith.addi %arg14, %c4_i32_216 : i32
      %280 = arith.index_cast %279 : i32 to index
      %c3_217 = arith.constant 3 : index
      %c0_218 = arith.constant 0 : index
      %281 = vector.load %arg12[%280, %c3_217, %c0_218] : memref<9x9x20xf32, #tpu.memory_space<vmem>>, vector<1x3x20xf32>
      %282 = vector.shape_cast %281 : vector<1x3x20xf32> to vector<3x20xf32>
      %c31 = arith.constant 31 : index
      %c0_219 = arith.constant 0 : index
      %c0_220 = arith.constant 0 : index
      %283 = vector.load %arg6[%c31, %c0_219, %c0_220] : memref<49x20x20xf32, #tpu.memory_space<vmem>>, vector<1x20x20xf32>
      %284 = vector.shape_cast %283 : vector<1x20x20xf32> to vector<20x20xf32>
      %cst_221 = arith.constant dense<0.000000e+00> : vector<3x20xf32>
      %285 = tpu.matmul %282, %284, %cst_221 {dimension_numbers = #tpu.dot_dimension_numbers<[1], [0], [0], [1], [0, 0, 1, 1], [], []>} : vector<3x20xf32>, vector<20x20xf32>, vector<3x20xf32> -> vector<3x20xf32>
      %286 = arith.addf %278, %285 : vector<3x20xf32>
      %c4_i32_222 = arith.constant 4 : i32
      %287 = arith.addi %arg14, %c4_i32_222 : i32
      %288 = arith.index_cast %287 : i32 to index
      %c4_223 = arith.constant 4 : index
      %c0_224 = arith.constant 0 : index
      %289 = vector.load %arg12[%288, %c4_223, %c0_224] : memref<9x9x20xf32, #tpu.memory_space<vmem>>, vector<1x3x20xf32>
      %290 = vector.shape_cast %289 : vector<1x3x20xf32> to vector<3x20xf32>
      %c32 = arith.constant 32 : index
      %c0_225 = arith.constant 0 : index
      %c0_226 = arith.constant 0 : index
      %291 = vector.load %arg6[%c32, %c0_225, %c0_226] : memref<49x20x20xf32, #tpu.memory_space<vmem>>, vector<1x20x20xf32>
      %292 = vector.shape_cast %291 : vector<1x20x20xf32> to vector<20x20xf32>
      %cst_227 = arith.constant dense<0.000000e+00> : vector<3x20xf32>
      %293 = tpu.matmul %290, %292, %cst_227 {dimension_numbers = #tpu.dot_dimension_numbers<[1], [0], [0], [1], [0, 0, 1, 1], [], []>} : vector<3x20xf32>, vector<20x20xf32>, vector<3x20xf32> -> vector<3x20xf32>
      %294 = arith.addf %286, %293 : vector<3x20xf32>
      %c4_i32_228 = arith.constant 4 : i32
      %295 = arith.addi %arg14, %c4_i32_228 : i32
      %296 = arith.index_cast %295 : i32 to index
      %c5_229 = arith.constant 5 : index
      %c0_230 = arith.constant 0 : index
      %297 = vector.load %arg12[%296, %c5_229, %c0_230] : memref<9x9x20xf32, #tpu.memory_space<vmem>>, vector<1x3x20xf32>
      %298 = vector.shape_cast %297 : vector<1x3x20xf32> to vector<3x20xf32>
      %c33 = arith.constant 33 : index
      %c0_231 = arith.constant 0 : index
      %c0_232 = arith.constant 0 : index
      %299 = vector.load %arg6[%c33, %c0_231, %c0_232] : memref<49x20x20xf32, #tpu.memory_space<vmem>>, vector<1x20x20xf32>
      %300 = vector.shape_cast %299 : vector<1x20x20xf32> to vector<20x20xf32>
      %cst_233 = arith.constant dense<0.000000e+00> : vector<3x20xf32>
      %301 = tpu.matmul %298, %300, %cst_233 {dimension_numbers = #tpu.dot_dimension_numbers<[1], [0], [0], [1], [0, 0, 1, 1], [], []>} : vector<3x20xf32>, vector<20x20xf32>, vector<3x20xf32> -> vector<3x20xf32>
      %302 = arith.addf %294, %301 : vector<3x20xf32>
      %c4_i32_234 = arith.constant 4 : i32
      %303 = arith.addi %arg14, %c4_i32_234 : i32
      %304 = arith.index_cast %303 : i32 to index
      %c6_235 = arith.constant 6 : index
      %c0_236 = arith.constant 0 : index
      %305 = vector.load %arg12[%304, %c6_235, %c0_236] : memref<9x9x20xf32, #tpu.memory_space<vmem>>, vector<1x3x20xf32>
      %306 = vector.shape_cast %305 : vector<1x3x20xf32> to vector<3x20xf32>
      %c34 = arith.constant 34 : index
      %c0_237 = arith.constant 0 : index
      %c0_238 = arith.constant 0 : index
      %307 = vector.load %arg6[%c34, %c0_237, %c0_238] : memref<49x20x20xf32, #tpu.memory_space<vmem>>, vector<1x20x20xf32>
      %308 = vector.shape_cast %307 : vector<1x20x20xf32> to vector<20x20xf32>
      %cst_239 = arith.constant dense<0.000000e+00> : vector<3x20xf32>
      %309 = tpu.matmul %306, %308, %cst_239 {dimension_numbers = #tpu.dot_dimension_numbers<[1], [0], [0], [1], [0, 0, 1, 1], [], []>} : vector<3x20xf32>, vector<20x20xf32>, vector<3x20xf32> -> vector<3x20xf32>
      %310 = arith.addf %302, %309 : vector<3x20xf32>
      %c5_i32 = arith.constant 5 : i32
      %311 = arith.addi %arg14, %c5_i32 : i32
      %312 = arith.index_cast %311 : i32 to index
      %c0_240 = arith.constant 0 : index
      %c0_241 = arith.constant 0 : index
      %313 = vector.load %arg12[%312, %c0_240, %c0_241] : memref<9x9x20xf32, #tpu.memory_space<vmem>>, vector<1x3x20xf32>
      %314 = vector.shape_cast %313 : vector<1x3x20xf32> to vector<3x20xf32>
      %c35 = arith.constant 35 : index
      %c0_242 = arith.constant 0 : index
      %c0_243 = arith.constant 0 : index
      %315 = vector.load %arg6[%c35, %c0_242, %c0_243] : memref<49x20x20xf32, #tpu.memory_space<vmem>>, vector<1x20x20xf32>
      %316 = vector.shape_cast %315 : vector<1x20x20xf32> to vector<20x20xf32>
      %cst_244 = arith.constant dense<0.000000e+00> : vector<3x20xf32>
      %317 = tpu.matmul %314, %316, %cst_244 {dimension_numbers = #tpu.dot_dimension_numbers<[1], [0], [0], [1], [0, 0, 1, 1], [], []>} : vector<3x20xf32>, vector<20x20xf32>, vector<3x20xf32> -> vector<3x20xf32>
      %318 = arith.addf %310, %317 : vector<3x20xf32>
      %c5_i32_245 = arith.constant 5 : i32
      %319 = arith.addi %arg14, %c5_i32_245 : i32
      %320 = arith.index_cast %319 : i32 to index
      %c1_246 = arith.constant 1 : index
      %c0_247 = arith.constant 0 : index
      %321 = vector.load %arg12[%320, %c1_246, %c0_247] : memref<9x9x20xf32, #tpu.memory_space<vmem>>, vector<1x3x20xf32>
      %322 = vector.shape_cast %321 : vector<1x3x20xf32> to vector<3x20xf32>
      %c36 = arith.constant 36 : index
      %c0_248 = arith.constant 0 : index
      %c0_249 = arith.constant 0 : index
      %323 = vector.load %arg6[%c36, %c0_248, %c0_249] : memref<49x20x20xf32, #tpu.memory_space<vmem>>, vector<1x20x20xf32>
      %324 = vector.shape_cast %323 : vector<1x20x20xf32> to vector<20x20xf32>
      %cst_250 = arith.constant dense<0.000000e+00> : vector<3x20xf32>
      %325 = tpu.matmul %322, %324, %cst_250 {dimension_numbers = #tpu.dot_dimension_numbers<[1], [0], [0], [1], [0, 0, 1, 1], [], []>} : vector<3x20xf32>, vector<20x20xf32>, vector<3x20xf32> -> vector<3x20xf32>
      %326 = arith.addf %318, %325 : vector<3x20xf32>
      %c5_i32_251 = arith.constant 5 : i32
      %327 = arith.addi %arg14, %c5_i32_251 : i32
      %328 = arith.index_cast %327 : i32 to index
      %c2_252 = arith.constant 2 : index
      %c0_253 = arith.constant 0 : index
      %329 = vector.load %arg12[%328, %c2_252, %c0_253] : memref<9x9x20xf32, #tpu.memory_space<vmem>>, vector<1x3x20xf32>
      %330 = vector.shape_cast %329 : vector<1x3x20xf32> to vector<3x20xf32>
      %c37 = arith.constant 37 : index
      %c0_254 = arith.constant 0 : index
      %c0_255 = arith.constant 0 : index
      %331 = vector.load %arg6[%c37, %c0_254, %c0_255] : memref<49x20x20xf32, #tpu.memory_space<vmem>>, vector<1x20x20xf32>
      %332 = vector.shape_cast %331 : vector<1x20x20xf32> to vector<20x20xf32>
      %cst_256 = arith.constant dense<0.000000e+00> : vector<3x20xf32>
      %333 = tpu.matmul %330, %332, %cst_256 {dimension_numbers = #tpu.dot_dimension_numbers<[1], [0], [0], [1], [0, 0, 1, 1], [], []>} : vector<3x20xf32>, vector<20x20xf32>, vector<3x20xf32> -> vector<3x20xf32>
      %334 = arith.addf %326, %333 : vector<3x20xf32>
      %c5_i32_257 = arith.constant 5 : i32
      %335 = arith.addi %arg14, %c5_i32_257 : i32
      %336 = arith.index_cast %335 : i32 to index
      %c3_258 = arith.constant 3 : index
      %c0_259 = arith.constant 0 : index
      %337 = vector.load %arg12[%336, %c3_258, %c0_259] : memref<9x9x20xf32, #tpu.memory_space<vmem>>, vector<1x3x20xf32>
      %338 = vector.shape_cast %337 : vector<1x3x20xf32> to vector<3x20xf32>
      %c38 = arith.constant 38 : index
      %c0_260 = arith.constant 0 : index
      %c0_261 = arith.constant 0 : index
      %339 = vector.load %arg6[%c38, %c0_260, %c0_261] : memref<49x20x20xf32, #tpu.memory_space<vmem>>, vector<1x20x20xf32>
      %340 = vector.shape_cast %339 : vector<1x20x20xf32> to vector<20x20xf32>
      %cst_262 = arith.constant dense<0.000000e+00> : vector<3x20xf32>
      %341 = tpu.matmul %338, %340, %cst_262 {dimension_numbers = #tpu.dot_dimension_numbers<[1], [0], [0], [1], [0, 0, 1, 1], [], []>} : vector<3x20xf32>, vector<20x20xf32>, vector<3x20xf32> -> vector<3x20xf32>
      %342 = arith.addf %334, %341 : vector<3x20xf32>
      %c5_i32_263 = arith.constant 5 : i32
      %343 = arith.addi %arg14, %c5_i32_263 : i32
      %344 = arith.index_cast %343 : i32 to index
      %c4_264 = arith.constant 4 : index
      %c0_265 = arith.constant 0 : index
      %345 = vector.load %arg12[%344, %c4_264, %c0_265] : memref<9x9x20xf32, #tpu.memory_space<vmem>>, vector<1x3x20xf32>
      %346 = vector.shape_cast %345 : vector<1x3x20xf32> to vector<3x20xf32>
      %c39 = arith.constant 39 : index
      %c0_266 = arith.constant 0 : index
      %c0_267 = arith.constant 0 : index
      %347 = vector.load %arg6[%c39, %c0_266, %c0_267] : memref<49x20x20xf32, #tpu.memory_space<vmem>>, vector<1x20x20xf32>
      %348 = vector.shape_cast %347 : vector<1x20x20xf32> to vector<20x20xf32>
      %cst_268 = arith.constant dense<0.000000e+00> : vector<3x20xf32>
      %349 = tpu.matmul %346, %348, %cst_268 {dimension_numbers = #tpu.dot_dimension_numbers<[1], [0], [0], [1], [0, 0, 1, 1], [], []>} : vector<3x20xf32>, vector<20x20xf32>, vector<3x20xf32> -> vector<3x20xf32>
      %350 = arith.addf %342, %349 : vector<3x20xf32>
      %c5_i32_269 = arith.constant 5 : i32
      %351 = arith.addi %arg14, %c5_i32_269 : i32
      %352 = arith.index_cast %351 : i32 to index
      %c5_270 = arith.constant 5 : index
      %c0_271 = arith.constant 0 : index
      %353 = vector.load %arg12[%352, %c5_270, %c0_271] : memref<9x9x20xf32, #tpu.memory_space<vmem>>, vector<1x3x20xf32>
      %354 = vector.shape_cast %353 : vector<1x3x20xf32> to vector<3x20xf32>
      %c40 = arith.constant 40 : index
      %c0_272 = arith.constant 0 : index
      %c0_273 = arith.constant 0 : index
      %355 = vector.load %arg6[%c40, %c0_272, %c0_273] : memref<49x20x20xf32, #tpu.memory_space<vmem>>, vector<1x20x20xf32>
      %356 = vector.shape_cast %355 : vector<1x20x20xf32> to vector<20x20xf32>
      %cst_274 = arith.constant dense<0.000000e+00> : vector<3x20xf32>
      %357 = tpu.matmul %354, %356, %cst_274 {dimension_numbers = #tpu.dot_dimension_numbers<[1], [0], [0], [1], [0, 0, 1, 1], [], []>} : vector<3x20xf32>, vector<20x20xf32>, vector<3x20xf32> -> vector<3x20xf32>
      %358 = arith.addf %350, %357 : vector<3x20xf32>
      %c5_i32_275 = arith.constant 5 : i32
      %359 = arith.addi %arg14, %c5_i32_275 : i32
      %360 = arith.index_cast %359 : i32 to index
      %c6_276 = arith.constant 6 : index
      %c0_277 = arith.constant 0 : index
      %361 = vector.load %arg12[%360, %c6_276, %c0_277] : memref<9x9x20xf32, #tpu.memory_space<vmem>>, vector<1x3x20xf32>
      %362 = vector.shape_cast %361 : vector<1x3x20xf32> to vector<3x20xf32>
      %c41 = arith.constant 41 : index
      %c0_278 = arith.constant 0 : index
      %c0_279 = arith.constant 0 : index
      %363 = vector.load %arg6[%c41, %c0_278, %c0_279] : memref<49x20x20xf32, #tpu.memory_space<vmem>>, vector<1x20x20xf32>
      %364 = vector.shape_cast %363 : vector<1x20x20xf32> to vector<20x20xf32>
      %cst_280 = arith.constant dense<0.000000e+00> : vector<3x20xf32>
      %365 = tpu.matmul %362, %364, %cst_280 {dimension_numbers = #tpu.dot_dimension_numbers<[1], [0], [0], [1], [0, 0, 1, 1], [], []>} : vector<3x20xf32>, vector<20x20xf32>, vector<3x20xf32> -> vector<3x20xf32>
      %366 = arith.addf %358, %365 : vector<3x20xf32>
      %c6_i32 = arith.constant 6 : i32
      %367 = arith.addi %arg14, %c6_i32 : i32
      %368 = arith.index_cast %367 : i32 to index
      %c0_281 = arith.constant 0 : index
      %c0_282 = arith.constant 0 : index
      %369 = vector.load %arg12[%368, %c0_281, %c0_282] : memref<9x9x20xf32, #tpu.memory_space<vmem>>, vector<1x3x20xf32>
      %370 = vector.shape_cast %369 : vector<1x3x20xf32> to vector<3x20xf32>
      %c42 = arith.constant 42 : index
      %c0_283 = arith.constant 0 : index
      %c0_284 = arith.constant 0 : index
      %371 = vector.load %arg6[%c42, %c0_283, %c0_284] : memref<49x20x20xf32, #tpu.memory_space<vmem>>, vector<1x20x20xf32>
      %372 = vector.shape_cast %371 : vector<1x20x20xf32> to vector<20x20xf32>
      %cst_285 = arith.constant dense<0.000000e+00> : vector<3x20xf32>
      %373 = tpu.matmul %370, %372, %cst_285 {dimension_numbers = #tpu.dot_dimension_numbers<[1], [0], [0], [1], [0, 0, 1, 1], [], []>} : vector<3x20xf32>, vector<20x20xf32>, vector<3x20xf32> -> vector<3x20xf32>
      %374 = arith.addf %366, %373 : vector<3x20xf32>
      %c6_i32_286 = arith.constant 6 : i32
      %375 = arith.addi %arg14, %c6_i32_286 : i32
      %376 = arith.index_cast %375 : i32 to index
      %c1_287 = arith.constant 1 : index
      %c0_288 = arith.constant 0 : index
      %377 = vector.load %arg12[%376, %c1_287, %c0_288] : memref<9x9x20xf32, #tpu.memory_space<vmem>>, vector<1x3x20xf32>
      %378 = vector.shape_cast %377 : vector<1x3x20xf32> to vector<3x20xf32>
      %c43 = arith.constant 43 : index
      %c0_289 = arith.constant 0 : index
      %c0_290 = arith.constant 0 : index
      %379 = vector.load %arg6[%c43, %c0_289, %c0_290] : memref<49x20x20xf32, #tpu.memory_space<vmem>>, vector<1x20x20xf32>
      %380 = vector.shape_cast %379 : vector<1x20x20xf32> to vector<20x20xf32>
      %cst_291 = arith.constant dense<0.000000e+00> : vector<3x20xf32>
      %381 = tpu.matmul %378, %380, %cst_291 {dimension_numbers = #tpu.dot_dimension_numbers<[1], [0], [0], [1], [0, 0, 1, 1], [], []>} : vector<3x20xf32>, vector<20x20xf32>, vector<3x20xf32> -> vector<3x20xf32>
      %382 = arith.addf %374, %381 : vector<3x20xf32>
      %c6_i32_292 = arith.constant 6 : i32
      %383 = arith.addi %arg14, %c6_i32_292 : i32
      %384 = arith.index_cast %383 : i32 to index
      %c2_293 = arith.constant 2 : index
      %c0_294 = arith.constant 0 : index
      %385 = vector.load %arg12[%384, %c2_293, %c0_294] : memref<9x9x20xf32, #tpu.memory_space<vmem>>, vector<1x3x20xf32>
      %386 = vector.shape_cast %385 : vector<1x3x20xf32> to vector<3x20xf32>
      %c44 = arith.constant 44 : index
      %c0_295 = arith.constant 0 : index
      %c0_296 = arith.constant 0 : index
      %387 = vector.load %arg6[%c44, %c0_295, %c0_296] : memref<49x20x20xf32, #tpu.memory_space<vmem>>, vector<1x20x20xf32>
      %388 = vector.shape_cast %387 : vector<1x20x20xf32> to vector<20x20xf32>
      %cst_297 = arith.constant dense<0.000000e+00> : vector<3x20xf32>
      %389 = tpu.matmul %386, %388, %cst_297 {dimension_numbers = #tpu.dot_dimension_numbers<[1], [0], [0], [1], [0, 0, 1, 1], [], []>} : vector<3x20xf32>, vector<20x20xf32>, vector<3x20xf32> -> vector<3x20xf32>
      %390 = arith.addf %382, %389 : vector<3x20xf32>
      %c6_i32_298 = arith.constant 6 : i32
      %391 = arith.addi %arg14, %c6_i32_298 : i32
      %392 = arith.index_cast %391 : i32 to index
      %c3_299 = arith.constant 3 : index
      %c0_300 = arith.constant 0 : index
      %393 = vector.load %arg12[%392, %c3_299, %c0_300] : memref<9x9x20xf32, #tpu.memory_space<vmem>>, vector<1x3x20xf32>
      %394 = vector.shape_cast %393 : vector<1x3x20xf32> to vector<3x20xf32>
      %c45 = arith.constant 45 : index
      %c0_301 = arith.constant 0 : index
      %c0_302 = arith.constant 0 : index
      %395 = vector.load %arg6[%c45, %c0_301, %c0_302] : memref<49x20x20xf32, #tpu.memory_space<vmem>>, vector<1x20x20xf32>
      %396 = vector.shape_cast %395 : vector<1x20x20xf32> to vector<20x20xf32>
      %cst_303 = arith.constant dense<0.000000e+00> : vector<3x20xf32>
      %397 = tpu.matmul %394, %396, %cst_303 {dimension_numbers = #tpu.dot_dimension_numbers<[1], [0], [0], [1], [0, 0, 1, 1], [], []>} : vector<3x20xf32>, vector<20x20xf32>, vector<3x20xf32> -> vector<3x20xf32>
      %398 = arith.addf %390, %397 : vector<3x20xf32>
      %c6_i32_304 = arith.constant 6 : i32
      %399 = arith.addi %arg14, %c6_i32_304 : i32
      %400 = arith.index_cast %399 : i32 to index
      %c4_305 = arith.constant 4 : index
      %c0_306 = arith.constant 0 : index
      %401 = vector.load %arg12[%400, %c4_305, %c0_306] : memref<9x9x20xf32, #tpu.memory_space<vmem>>, vector<1x3x20xf32>
      %402 = vector.shape_cast %401 : vector<1x3x20xf32> to vector<3x20xf32>
      %c46 = arith.constant 46 : index
      %c0_307 = arith.constant 0 : index
      %c0_308 = arith.constant 0 : index
      %403 = vector.load %arg6[%c46, %c0_307, %c0_308] : memref<49x20x20xf32, #tpu.memory_space<vmem>>, vector<1x20x20xf32>
      %404 = vector.shape_cast %403 : vector<1x20x20xf32> to vector<20x20xf32>
      %cst_309 = arith.constant dense<0.000000e+00> : vector<3x20xf32>
      %405 = tpu.matmul %402, %404, %cst_309 {dimension_numbers = #tpu.dot_dimension_numbers<[1], [0], [0], [1], [0, 0, 1, 1], [], []>} : vector<3x20xf32>, vector<20x20xf32>, vector<3x20xf32> -> vector<3x20xf32>
      %406 = arith.addf %398, %405 : vector<3x20xf32>
      %c6_i32_310 = arith.constant 6 : i32
      %407 = arith.addi %arg14, %c6_i32_310 : i32
      %408 = arith.index_cast %407 : i32 to index
      %c5_311 = arith.constant 5 : index
      %c0_312 = arith.constant 0 : index
      %409 = vector.load %arg12[%408, %c5_311, %c0_312] : memref<9x9x20xf32, #tpu.memory_space<vmem>>, vector<1x3x20xf32>
      %410 = vector.shape_cast %409 : vector<1x3x20xf32> to vector<3x20xf32>
      %c47 = arith.constant 47 : index
      %c0_313 = arith.constant 0 : index
      %c0_314 = arith.constant 0 : index
      %411 = vector.load %arg6[%c47, %c0_313, %c0_314] : memref<49x20x20xf32, #tpu.memory_space<vmem>>, vector<1x20x20xf32>
      %412 = vector.shape_cast %411 : vector<1x20x20xf32> to vector<20x20xf32>
      %cst_315 = arith.constant dense<0.000000e+00> : vector<3x20xf32>
      %413 = tpu.matmul %410, %412, %cst_315 {dimension_numbers = #tpu.dot_dimension_numbers<[1], [0], [0], [1], [0, 0, 1, 1], [], []>} : vector<3x20xf32>, vector<20x20xf32>, vector<3x20xf32> -> vector<3x20xf32>
      %414 = arith.addf %406, %413 : vector<3x20xf32>
      %c6_i32_316 = arith.constant 6 : i32
      %415 = arith.addi %arg14, %c6_i32_316 : i32
      %416 = arith.index_cast %415 : i32 to index
      %c6_317 = arith.constant 6 : index
      %c0_318 = arith.constant 0 : index
      %417 = vector.load %arg12[%416, %c6_317, %c0_318] : memref<9x9x20xf32, #tpu.memory_space<vmem>>, vector<1x3x20xf32>
      %418 = vector.shape_cast %417 : vector<1x3x20xf32> to vector<3x20xf32>
      %c48 = arith.constant 48 : index
      %c0_319 = arith.constant 0 : index
      %c0_320 = arith.constant 0 : index
      %419 = vector.load %arg6[%c48, %c0_319, %c0_320] : memref<49x20x20xf32, #tpu.memory_space<vmem>>, vector<1x20x20xf32>
      %420 = vector.shape_cast %419 : vector<1x20x20xf32> to vector<20x20xf32>
      %cst_321 = arith.constant dense<0.000000e+00> : vector<3x20xf32>
      %421 = tpu.matmul %418, %420, %cst_321 {dimension_numbers = #tpu.dot_dimension_numbers<[1], [0], [0], [1], [0, 0, 1, 1], [], []>} : vector<3x20xf32>, vector<20x20xf32>, vector<3x20xf32> -> vector<3x20xf32>
      %422 = arith.addf %414, %421 : vector<3x20xf32>
      %423 = arith.index_cast %arg14 : i32 to index
      %c0_322 = arith.constant 0 : index
      %c0_323 = arith.constant 0 : index
      %424 = vector.load %arg13[%423, %c0_322, %c0_323] : memref<3x3x20xf32, #tpu.memory_space<vmem>>, vector<1x3x20xf32>
      %425 = vector.shape_cast %424 : vector<1x3x20xf32> to vector<3x20xf32>
      %426 = vector.shape_cast %422 : vector<3x20xf32> to vector<1x3x20xf32>
      tpu.vector_store %arg13[%423, %c0_322, %c0_323], %426 {strides = array<i32>} : memref<3x3x20xf32, #tpu.memory_space<vmem>>, vector<1x3x20xf32>,
    }
    %c3_i32_12 = arith.constant 3 : i32
    %c0_i32_13 = arith.constant 0 : i32
    %c2_i32 = arith.constant 2 : i32
    %5 = arith.muli %c2_i32, %c0_i32_13 : i32
    %6 = arith.index_cast %5 : i32 to index
    %c0 = arith.constant 0 : index
    %c0_14 = arith.constant 0 : index
    %7 = tpu.strided_load %arg13[%6, %c0, %c0_14] {strides = array<i32: 1, 2, 1>} : memref<3x3x20xf32, #tpu.memory_space<vmem>>, vector<1x1x20xf32>
    %8 = vector.shape_cast %7 : vector<1x1x20xf32> to vector<1x20xf32>
    %9 = arith.index_cast %5 : i32 to index
    %c1 = arith.constant 1 : index
    %c0_15 = arith.constant 0 : index
    %10 = tpu.strided_load %arg13[%9, %c1, %c0_15] {strides = array<i32: 1, 2, 1>} : memref<3x3x20xf32, #tpu.memory_space<vmem>>, vector<1x1x20xf32>
    %11 = vector.shape_cast %10 : vector<1x1x20xf32> to vector<1x20xf32>
    %c1_i32_16 = arith.constant 1 : i32
    %12 = arith.addi %5, %c1_i32_16 : i32
    %13 = arith.index_cast %12 : i32 to index
    %c0_17 = arith.constant 0 : index
    %c0_18 = arith.constant 0 : index
    %14 = tpu.strided_load %arg13[%13, %c0_17, %c0_18] {strides = array<i32: 1, 2, 1>} : memref<3x3x20xf32, #tpu.memory_space<vmem>>, vector<1x1x20xf32>
    %15 = vector.shape_cast %14 : vector<1x1x20xf32> to vector<1x20xf32>
    %c1_i32_19 = arith.constant 1 : i32
    %16 = arith.addi %5, %c1_i32_19 : i32
    %17 = arith.index_cast %16 : i32 to index
    %c1_20 = arith.constant 1 : index
    %c0_21 = arith.constant 0 : index
    %18 = tpu.strided_load %arg13[%17, %c1_20, %c0_21] {strides = array<i32: 1, 2, 1>} : memref<3x3x20xf32, #tpu.memory_space<vmem>>, vector<1x1x20xf32>
    %19 = vector.shape_cast %18 : vector<1x1x20xf32> to vector<1x20xf32>
    %20 = arith.maximumf %8, %11 : vector<1x20xf32>
    %21 = arith.maximumf %15, %19 : vector<1x20xf32>
    %22 = arith.maximumf %20, %21 : vector<1x20xf32>
    %c0_22 = arith.constant 0 : index
    %c0_23 = arith.constant 0 : index
    %23 = vector.load %arg7[%c0_22, %c0_23] : memref<1x20xf32, #tpu.memory_space<vmem>>, vector<1x20xf32>
    %24 = arith.addf %22, %23 : vector<1x20xf32>
    %cst = arith.constant 0.000000e+00 : f32
    %25 = vector.broadcast %cst : f32 to vector<1x20xf32>
    %26 = arith.maximumf %24, %25 : vector<1x20xf32>
    %c0_24 = arith.constant 0 : index
    %c0_25 = arith.constant 0 : index
    %c0_26 = arith.constant 0 : index
    %27 = vector.load %arg8[%c0_24, %c0_25, %c0_26] : memref<1x1x20xf32, #tpu.memory_space<vmem>>, vector<1x1x20xf32>
    %28 = vector.shape_cast %27 : vector<1x1x20xf32> to vector<1x20xf32>
    %29 = vector.shape_cast %26 : vector<1x20xf32> to vector<1x1x20xf32>
    tpu.vector_store %arg8[%c0_24, %c0_25, %c0_26], %29 {strides = array<i32>} : memref<1x1x20xf32, #tpu.memory_space<vmem>>, vector<1x1x20xf32>,
    %c1_i32_27 = arith.constant 1 : i32
    return
  }
  func.func @transform_0(%arg0: i32) -> (i32, i32, i32, i32) {
    %c0_i32 = arith.constant 0 : i32
    %c0_i32_0 = arith.constant 0 : i32
    %c0_i32_1 = arith.constant 0 : i32
    %c0_i32_2 = arith.constant 0 : i32
    return %arg0, %c0_i32, %c0_i32_0, %c0_i32_1 : i32, i32, i32, i32
  }
  func.func @transform_1(%arg0: i32) -> (i32, i32, i32) {
    %c0_i32 = arith.constant 0 : i32
    %c0_i32_0 = arith.constant 0 : i32
    %c0_i32_1 = arith.constant 0 : i32
    %c0_i32_2 = arith.constant 0 : i32
    return %c0_i32, %c0_i32_0, %c0_i32_1 : i32, i32, i32
  }
  func.func @transform_2(%arg0: i32) -> (i32, i32) {
    %c0_i32 = arith.constant 0 : i32
    %c0_i32_0 = arith.constant 0 : i32
    %c0_i32_1 = arith.constant 0 : i32
    return %c0_i32, %c0_i32_0 : i32, i32
  }
  func.func @transform_3(%arg0: i32) -> (i32, i32, i32) {
    %c0_i32 = arith.constant 0 : i32
    %c0_i32_0 = arith.constant 0 : i32
    %c0_i32_1 = arith.constant 0 : i32
    %c0_i32_2 = arith.constant 0 : i32
    return %c0_i32, %c0_i32_0, %c0_i32_1 : i32, i32, i32
  }
  func.func @transform_4(%arg0: i32) -> (i32, i32) {
    %c0_i32 = arith.constant 0 : i32
    %c0_i32_0 = arith.constant 0 : i32
    %c0_i32_1 = arith.constant 0 : i32
    return %c0_i32, %c0_i32_0 : i32, i32
  }
  func.func @transform_5(%arg0: i32) -> (i32, i32, i32) {
    %c0_i32 = arith.constant 0 : i32
    %c0_i32_0 = arith.constant 0 : i32
    %c0_i32_1 = arith.constant 0 : i32
    %c0_i32_2 = arith.constant 0 : i32
    return %c0_i32, %c0_i32_0, %c0_i32_1 : i32, i32, i32
  }
  func.func @transform_6(%arg0: i32) -> (i32, i32) {
    %c0_i32 = arith.constant 0 : i32
    %c0_i32_0 = arith.constant 0 : i32
    %c0_i32_1 = arith.constant 0 : i32
    return %c0_i32, %c0_i32_0 : i32, i32
  }
  func.func @transform_7(%arg0: i32) -> (i32, i32, i32) {
    %c0_i32 = arith.constant 0 : i32
    %c0_i32_0 = arith.constant 0 : i32
    %c0_i32_1 = arith.constant 0 : i32
    return %arg0, %c0_i32, %c0_i32_0 : i32, i32, i32
  }
}

module attributes {stable_mosaic.version = 11 : i64} {
  func.func @_fc_stack_kernel(%arg0: i32, %arg1: memref<2x20xf32, #tpu.memory_space<vmem>>, %arg2: memref<20x100xf32, #tpu.memory_space<vmem>>, %arg3: memref<1x100xf32, #tpu.memory_space<vmem>>, %arg4: memref<100x10xf32, #tpu.memory_space<vmem>>, %arg5: memref<1x10xf32, #tpu.memory_space<vmem>>, %arg6: memref<10x1xf32, #tpu.memory_space<vmem>>, %arg7: memref<1x1xf32, #tpu.memory_space<vmem>>, %arg8: memref<2x1xf32, #tpu.memory_space<vmem>>) attributes {dimension_semantics = [#tpu.dimension_semantics<arbitrary>], iteration_bounds = array<i64: 1>, scalar_prefetch = 0 : i64, scratch_operands = 0 : i64, tpu.core_type = #tpu.core_type<tc>, window_params = [{pipeline_mode = #tpu.pipeline_mode<synchronous>, transform_indices = @transform_0, window_bounds = array<i64: 2, 20>}, {pipeline_mode = #tpu.pipeline_mode<synchronous>, transform_indices = @transform_1, window_bounds = array<i64: 20, 100>}, {pipeline_mode = #tpu.pipeline_mode<synchronous>, transform_indices = @transform_2, window_bounds = array<i64: 1, 100>}, {pipeline_mode = #tpu.pipeline_mode<synchronous>, transform_indices = @transform_3, window_bounds = array<i64: 100, 10>}, {pipeline_mode = #tpu.pipeline_mode<synchronous>, transform_indices = @transform_4, window_bounds = array<i64: 1, 10>}, {pipeline_mode = #tpu.pipeline_mode<synchronous>, transform_indices = @transform_5, window_bounds = array<i64: 10, 1>}, {pipeline_mode = #tpu.pipeline_mode<synchronous>, transform_indices = @transform_6, window_bounds = array<i64: 1, 1>}, {pipeline_mode = #tpu.pipeline_mode<synchronous>, transform_indices = @transform_7, window_bounds = array<i64: 2, 1>}]} {
    %c0 = arith.constant 0 : index
    %c0_0 = arith.constant 0 : index
    %0 = vector.load %arg1[%c0, %c0_0] : memref<2x20xf32, #tpu.memory_space<vmem>>, vector<2x20xf32>
    %c0_1 = arith.constant 0 : index
    %c0_2 = arith.constant 0 : index
    %1 = vector.load %arg2[%c0_1, %c0_2] : memref<20x100xf32, #tpu.memory_space<vmem>>, vector<20x100xf32>
    %cst = arith.constant dense<0.000000e+00> : vector<2x100xf32>
    %2 = tpu.matmul %0, %1, %cst {dimension_numbers = #tpu.dot_dimension_numbers<[1], [0], [0], [1], [0, 0, 1, 1], [], []>} : vector<2x20xf32>, vector<20x100xf32>, vector<2x100xf32> -> vector<2x100xf32>
    %c0_3 = arith.constant 0 : index
    %c0_4 = arith.constant 0 : index
    %3 = vector.load %arg3[%c0_3, %c0_4] : memref<1x100xf32, #tpu.memory_space<vmem>>, vector<1x100xf32>
    %4 = vector.broadcast %3 : vector<1x100xf32> to vector<2x100xf32>
    %5 = arith.addf %2, %4 : vector<2x100xf32>
    %cst_5 = arith.constant 0.000000e+00 : f32
    %6 = vector.broadcast %cst_5 : f32 to vector<2x100xf32>
    %7 = arith.maximumf %5, %6 : vector<2x100xf32>
    %c0_6 = arith.constant 0 : index
    %c0_7 = arith.constant 0 : index
    %8 = vector.load %arg4[%c0_6, %c0_7] : memref<100x10xf32, #tpu.memory_space<vmem>>, vector<100x10xf32>
    %cst_8 = arith.constant dense<0.000000e+00> : vector<2x10xf32>
    %9 = tpu.matmul %7, %8, %cst_8 {dimension_numbers = #tpu.dot_dimension_numbers<[1], [0], [0], [1], [0, 0, 1, 1], [], []>} : vector<2x100xf32>, vector<100x10xf32>, vector<2x10xf32> -> vector<2x10xf32>
    %c0_9 = arith.constant 0 : index
    %c0_10 = arith.constant 0 : index
    %10 = vector.load %arg5[%c0_9, %c0_10] : memref<1x10xf32, #tpu.memory_space<vmem>>, vector<1x10xf32>
    %11 = vector.broadcast %10 : vector<1x10xf32> to vector<2x10xf32>
    %12 = arith.addf %9, %11 : vector<2x10xf32>
    %cst_11 = arith.constant 0.000000e+00 : f32
    %13 = vector.broadcast %cst_11 : f32 to vector<2x10xf32>
    %14 = arith.maximumf %12, %13 : vector<2x10xf32>
    %c0_12 = arith.constant 0 : index
    %c0_13 = arith.constant 0 : index
    %15 = vector.load %arg6[%c0_12, %c0_13] : memref<10x1xf32, #tpu.memory_space<vmem>>, vector<10x1xf32>
    %cst_14 = arith.constant dense<0.000000e+00> : vector<2x1xf32>
    %16 = tpu.matmul %14, %15, %cst_14 {dimension_numbers = #tpu.dot_dimension_numbers<[1], [0], [0], [1], [0, 0, 1, 1], [], []>} : vector<2x10xf32>, vector<10x1xf32>, vector<2x1xf32> -> vector<2x1xf32>
    %c0_15 = arith.constant 0 : index
    %c0_16 = arith.constant 0 : index
    %17 = vector.load %arg7[%c0_15, %c0_16] : memref<1x1xf32, #tpu.memory_space<vmem>>, vector<1x1xf32>
    %18 = vector.broadcast %17 : vector<1x1xf32> to vector<2x1xf32>
    %19 = arith.addf %16, %18 : vector<2x1xf32>
    %c0_17 = arith.constant 0 : index
    %c0_18 = arith.constant 0 : index
    %20 = vector.load %arg8[%c0_17, %c0_18] : memref<2x1xf32, #tpu.memory_space<vmem>>, vector<2x1xf32>
    tpu.vector_store %arg8[%c0_17, %c0_18], %19 {strides = array<i32>} : memref<2x1xf32, #tpu.memory_space<vmem>>, vector<2x1xf32>,
    return
  }
  func.func @transform_0(%arg0: i32) -> (i32, i32) {
    %c0_i32 = arith.constant 0 : i32
    %c0_i32_0 = arith.constant 0 : i32
    %c0_i32_1 = arith.constant 0 : i32
    return %c0_i32, %c0_i32_0 : i32, i32
  }
  func.func @transform_1(%arg0: i32) -> (i32, i32) {
    %c0_i32 = arith.constant 0 : i32
    %c0_i32_0 = arith.constant 0 : i32
    %c0_i32_1 = arith.constant 0 : i32
    return %c0_i32, %c0_i32_0 : i32, i32
  }
  func.func @transform_2(%arg0: i32) -> (i32, i32) {
    %c0_i32 = arith.constant 0 : i32
    %c0_i32_0 = arith.constant 0 : i32
    %c0_i32_1 = arith.constant 0 : i32
    return %c0_i32, %c0_i32_0 : i32, i32
  }
  func.func @transform_3(%arg0: i32) -> (i32, i32) {
    %c0_i32 = arith.constant 0 : i32
    %c0_i32_0 = arith.constant 0 : i32
    %c0_i32_1 = arith.constant 0 : i32
    return %c0_i32, %c0_i32_0 : i32, i32
  }
  func.func @transform_4(%arg0: i32) -> (i32, i32) {
    %c0_i32 = arith.constant 0 : i32
    %c0_i32_0 = arith.constant 0 : i32
    %c0_i32_1 = arith.constant 0 : i32
    return %c0_i32, %c0_i32_0 : i32, i32
  }
  func.func @transform_5(%arg0: i32) -> (i32, i32) {
    %c0_i32 = arith.constant 0 : i32
    %c0_i32_0 = arith.constant 0 : i32
    %c0_i32_1 = arith.constant 0 : i32
    return %c0_i32, %c0_i32_0 : i32, i32
  }
  func.func @transform_6(%arg0: i32) -> (i32, i32) {
    %c0_i32 = arith.constant 0 : i32
    %c0_i32_0 = arith.constant 0 : i32
    %c0_i32_1 = arith.constant 0 : i32
    return %c0_i32, %c0_i32_0 : i32, i32
  }
  func.func @transform_7(%arg0: i32) -> (i32, i32) {
    %c0_i32 = arith.constant 0 : i32
    %c0_i32_0 = arith.constant 0 : i32
    %c0_i32_1 = arith.constant 0 : i32
    return %c0_i32, %c0_i32_0 : i32, i32
  }
}

</mosaic_0001>

<bundles_post_ra>
// kernel: ridgeface_forward.3
= control target key start
LH: loop header
LB: loop body
LE: loop exit
PB: predicated region body
PF: predicated region fallthrough
CT: control target
= control target key end

     0   :  { %v413_v0 = vmov 0.0|0.0   ;;  %vm414_vm0 = vmmov 0   ;;  %v415_v3 = vmov 0.0   ;;  %vm43_vm1 = vcmask 1043456   ;;  %s531_s1 = inlined_call_operand.vmem [shape: f32[20,100], index: 1, kind: input, shape index: {}]   ;;  %s532_s3 = inlined_call_operand.vmem [shape: f32[100,10], index: 3, kind: input, shape index: {}]   ;;  %s533_s0 = inlined_call_operand.vmem [shape: f32[2,20], index: 0, kind: input, shape index: {}]   ;;  %s534_s2 = inlined_call_operand.vmem [shape: f32[1,100], index: 2, kind: input, shape index: {}]   ;;  %s535_s5 = inlined_call_operand.vmem [shape: f32[10,1], index: 5, kind: input, shape index: {}]   ;;  %s536_s6 = inlined_call_operand.<no memory space> [shape: f32[1,1], index: 6, kind: input, shape index: {}]   ;;  %s537_s4 = inlined_call_operand.vmem [shape: f32[1,10], index: 4, kind: input, shape index: {}]   ;;  %s538_s7 = inlined_call_operand.vmem [shape: f32[2,1], index: 7, kind: output, shape index: {}]  }
   0x1   :  { %384 = vmatprep.subr.bf16.mxu0 %v413_v0  ;;  %v29_v1 = vld [vmem:[%s531_s1] sm:$0xff]  ;;  %v30_v2 = vld [vmem:[%s531_s1 + $0x8] sm:$0xff]  ;;  %345 = vmatprep.mubr.msk.f32.mxu0 %vm414_vm0, %v415_v3  ;;  %v120_v8 = vld [vmem:[%s532_s3 + $0x10] sm:$0xff]  ;;  %vm39_vm2 = vcmask 162816   ;;  %vm138_vm3 = vcmask 818176   ;;  %vm229_vm4 = vcmask 1041408   ;;  %v12_v34 = vstv %s536_s6 }
   0x2   :  { %v385_v4 = vpack.c.bf16 %v30_v2, %v29_v1  ;;  %387 = vmatprep.subr.bf16.mxu1 %v413_v0  ;;  %v118_v5 = vld [vmem:[%s532_s3] sm:$0xff]  ;;  %v119_v6 = vld [vmem:[%s532_s3 + $0x8] sm:$0xff]  ;;  %374 = vmatprep.mubr.msk.f32.mxu1 %vm414_vm0, %v415_v3  ;;  %v121_v9 = vld [vmem:[%s532_s3 + $0x18] sm:$0xff]  ;;  %vm416_vm5 = vmmov 1   ;;  %13 = vst [vmem:[#allocation2] sm:$0x1] %v12_v34 }
   0x3   :  { %v388_v7 = vpack.c.bf16 %v119_v6, %v118_v5  ;;  %v31_v10 = vld [vmem:[%s531_s1 + $0x10] sm:$0xf]  ;;  %v391_v11 = vpack.c.bf16 %v121_v9, %v120_v8  ;;  %v28_v12 = vld [vmem:[%s533_s0] sm:$0x3]  ;;  %v123_v14 = vld [vmem:[%s532_s3 + $0x28] sm:$0xff]  ;;  %vm225_vm7 = vcmask 80896  }
   0x4   :  { %386 = vmatpush3.bf16.msra.mxu0 %v385_v4  ;;  %v122_v13 = vld [vmem:[%s532_s3 + $0x20] sm:$0xff]  ;;  %v124_v16 = vld [vmem:[%s532_s3 + $0x30] sm:$0xff]  ;;  %v125_v17 = vld [vmem:[%s532_s3 + $0x38] sm:$0xff]  ;;  %vm303_vm8 = vcmask 1024  }
   0x5   :  { %343 = vmatprep.subr.mxu0 %v415_v3  ;;  %389 = vmatpush3.bf16.msra.mxu1 %v388_v7  ;;  %v394_v15 = vpack.c.bf16 %v123_v14, %v122_v13  ;;  %v397_v18 = vpack.c.bf16 %v125_v17, %v124_v16  ;;  %v126_v19 = vld [vmem:[%s532_s3 + $0x40] sm:$0xff]  ;;  %v127_v20 = vld [vmem:[%s532_s3 + $0x48] sm:$0xff]  ;;  %v128_v22 = vld [vmem:[%s532_s3 + $0x50] sm:$0xff] }
   0x6   :  { %390 = vmatprep.subr.bf16.mxu1 %v413_v0  ;;  %v400_v21 = vpack.c.bf16 %v127_v20, %v126_v19  ;;  %v129_v23 = vld [vmem:[%s532_s3 + $0x58] sm:$0xff]  ;;  %v130_v25 = vld [vmem:[%s532_s3 + $0x60] sm:$0xf]  ;;  %v217_v32 = vld [vmem:[%s535_s5 + $0x8] sm:$0x3] }
   0x7   :  { %v403_v24 = vpack.c.bf16 %v129_v23, %v128_v22  ;;  %v309_v26 = vld [vmem:[%s534_s2] ss:$0 sm:$0xff]  ;;  %vm407_vm6 = vmpackc.low %vm229_vm4, %vm416_vm5 }
   0x8   :  { %344 = vmatpush3.msk.msra.mxu0 %vm43_vm1, %v31_v10  ;;  %v216_v31 = vld [vmem:[%s535_s5] sm:$0xff] }
   0x9   :  { %346 = vmatmul.mubr.msk.f32.vlgmr.msra.gmra.mrb[0].mxu0 %vm39_vm2, %v28_v12  ;;  %392 = vmatpush3.bf16.msra.mxu1 %v391_v11  ;;  %v406_v33 = vpack.c.bf16 %v217_v32, %v216_v31  ;;  %v312_v35 = vld [vmem:[%s537_s4] ss:$0 sm:$0xff] }
   0xa   :  { %393 = vmatprep.subr.bf16.mxu1 %v413_v0  ;;  %405 = vmatprep.subr.bf16.mxu0 %v413_v0  ;;  %v315_v40 = vld [vmem:[#allocation2] ss:$0 sm:$0xff] }
   0xb   :  { %381 = vmatprep.mubr.msk.f32.mxu0 %vm414_vm0, %v415_v3  ;;  %408 = vmatpush3.bf16.msk.msra.mxu0 %vm407_vm6, %v406_v33 }
   0xd   :  { %395 = vmatpush3.bf16.msra.mxu1 %v394_v15 }
   0xe   :  { %396 = vmatprep.subr.bf16.mxu1 %v413_v0 }
  0x11   :  { %398 = vmatpush3.bf16.msra.mxu1 %v397_v18 }
  0x12   :  { %399 = vmatprep.subr.bf16.mxu1 %v413_v0 }
  0x15   :  { %401 = vmatpush3.bf16.msra.mxu1 %v400_v21 }
  0x16   :  { %402 = vmatprep.subr.bf16.mxu1 %v413_v0 }
  0x19   :  { %404 = vmatpush3.bf16.msra.mxu1 %v403_v24 }
  0x1a   :  { %372 = vmatprep.subr.mxu1 %v415_v3 }
  0x1d   :  { %373 = vmatpush3.msk.msra.mxu1 %vm43_vm1, %v130_v25 }
  0xdc   :  { %v113_v27 = vpop.f32.mrb[0].mxu0 }
  0xdd   :  { %v114_v28 = vadd.f32 %v309_v26, %v113_v27  ;;  %v347_v29 = vpop.f32.mrb[1].mxu0 }
  0xdf   :  { %v117_v30 = vmax.f32 %v114_v28, 0.0 }
  0xe1   :  { %375 = vmatmul.mubr.msk.f32.vlgmr.msra.gmra.mrb[0].mxu1 %vm138_vm3, %v117_v30 }
 0x1b4   :  { %v211_v36 = vpop.f32.mrb[0].mxu1 }
 0x1b5   :  { %v212_v37 = vadd.f32 %v312_v35, %v211_v36  ;;  %v376_v38 = vpop.f32.mrb[1].mxu1 }
 0x1b7   :  { %v215_v39 = vmax.f32 %v212_v37, 0.0 }
 0x1b9   :  { %382 = vmatmul.mubr.msk.f32.vlgmr.msra.gmra.mrb[2].mxu0 %vm225_vm7, %v215_v39 }
 0x28c   :  { %v299_v41 = vpop.f32.mrb[2].mxu0 }
 0x28d   :  { %v300_v42 = vadd.f32 %v315_v40, %v299_v41  ;;  %v383_v43 = vpop.f32.mrb[3].mxu0 }
 0x28f   :  { %304 = vst.msk [vmem:[%s538_s7] sm:$0x3] %vm303_vm8, %v300_v42 }

// kernel: ridgeface_forward.2
= control target key start
LH: loop header
LB: loop body
LE: loop exit
PB: predicated region body
PF: predicated region fallthrough
CT: control target
= control target key end

     0   :  { %s9983_s24 = smov 0   ;;  %s11523_s0 = inlined_call_operand.vmem [shape: f32[2,48,48,1], index: 0, kind: input, shape index: {}]   ;;  %s11524_s1 = inlined_call_operand.vmem [shape: f32[9,1,12], index: 1, kind: input, shape index: {}]   ;;  %s11525_s2 = inlined_call_operand.vmem [shape: f32[1,12], index: 2, kind: input, shape index: {}]   ;;  %s11526_s3 = inlined_call_operand.vmem [shape: f32[25,12,20], index: 3, kind: input, shape index: {}]   ;;  %s11527_s4 = inlined_call_operand.vmem [shape: f32[1,20], index: 4, kind: input, shape index: {}]   ;;  %s11528_s5 = inlined_call_operand.vmem [shape: f32[49,20,20], index: 5, kind: input, shape index: {}]   ;;  %s11529_s6 = inlined_call_operand.vmem [shape: f32[1,20], index: 6, kind: input, shape index: {}]   ;;  %s11530_s7 = inlined_call_operand.vmem [shape: f32[2,1,20], index: 7, kind: output, shape index: {}]  }
   0x1 LB: > { %s7666_s25 = sadd.s32 4294967295, %s9913_s24   ;;  %p7670_p0 = scmp.ge.s32.totalorder %s9913_s24, 1  ;;  %s9913_s24 = sphi %s9983_s24, %s17_s24  }
   0x2   : > { %p237_p1 = scmp.lt.s32.totalorder %s9913_s24, 3 }
   0x4   : > { %p238_p2 = pnand %p7670_p0, %p237_p1 }
   0x5   : > { %p267_p3 = scmp.lt.s32.totalorder (!%p238_p2), %s7666_s25, 1  ;;  %s10003_s10 = smov (!%p238_p2), 0  }
   0x6   : > { %241 = sbr.rel (%p238_p2) target bundleno = 1102 (0x44e), region = 48 }
   0xd   : > { %s11534_s25 = smov (!%p267_p3, %s7666_s25), 1 }
   0xe   : > { %s9828_s26 = smul.u32 2304, %s11534_s25  ;;  %s274_s29 = scalar_lea.vmem %s11530_s7, %s11534_s25 }
  0x10   : > { %s10001_s9 = scalar_lea.vmem %s11523_s0, %s9828_s26 }
  0x11 LB: >> { %v9935_v0 = vmov 0   ;;  %s281_s11 = smul.u32 48, %s9917_s10  ;;  %v7672_v61 = vld [vmem:[%s11524_s1] ss:$0 sm:$0xff]  ;;  %v7674_v62 = vld [vmem:[%s11524_s1 + $0x1] ss:$0 sm:$0xff]  ;;  %s9917_s10 = sphi %s10003_s10, %s280_s10  }
  0x12   : >> { %9886 = vset.pattern.permute.xlu1 %v9935_v0  ;;  %9885 = vset.pattern.permute.xlu0 %v9935_v0  ;;  %vm793_vm0 = vcmask 97280   ;;  %vm799_vm1 = vcmask 95232   ;;  %s280_s10 = sadd.s32 1, %s9917_s10  }
  0x13   : >> { %s10012_s12 = scalar_lea.vmem %s10001_s9, %s281_s11  ;;  %s792_s14 = scalar_lea.vmem [#allocation2], %s281_s11 }
  0x14   : >> { %v285_v1 = vld [vmem:[%s10012_s12 + $0x10] sm:$0xff]  ;;  %v283_v2 = vld [vmem:[%s10012_s12] sm:$0xff]  ;;  %v286_v3 = vld [vmem:[%s10012_s12 + $0x18] sm:$0xff]  ;;  %p277_p4 = scmp.ge.s32.totalorder %s280_s10, 46  }
  0x15   : >> { %302 = vperm.xlu1 %9886, %v285_v1   ;;  %292 = vperm.xlu0 %9885, %v283_v2   ;;  %v284_v4 = vld [vmem:[%s10012_s12 + $0x8] sm:$0xff]  ;;  %v287_v6 = vld [vmem:[%s10012_s12 + $0x20] sm:$0xff]  ;;  %v340_v10 = vld [vmem:[%s10012_s12 + $0x11] sm:$0xff]  ;;  %s10129_s11 = smov (%p277_p4), 0  }
  0x16   : >> { %v288_v5 = vld [vmem:[%s10012_s12 + $0x28] sm:$0x3f]  ;;  %v341_v9 = vld [vmem:[%s10012_s12 + $0x19] sm:$0xff]  ;;  %v7677_v20 = vld [vmem:[%s10012_s12 + $0x30] sm:$0xff] }
  0x17   : >> { %v339_v7 = vld [vmem:[%s10012_s12 + $0x9] sm:$0xff]  ;;  %v338_v8 = vld [vmem:[%s10012_s12 + $0x1] sm:$0xff]  ;;  %v396_v16 = vld [vmem:[%s10012_s12 + $0x12] sm:$0xff] }
  0x18   : >> { %v343_v11 = vld [vmem:[%s10012_s12 + $0x29] sm:$0x3f]  ;;  %v342_v12 = vld [vmem:[%s10012_s12 + $0x21] sm:$0xff]  ;;  %v7678_v19 = vld [vmem:[%s10012_s12 + $0x38] sm:$0xff] }
  0x19   : >> { %307 = vperm.xlu1 %9886, %v286_v3   ;;  %297 = vperm.xlu0 %9885, %v284_v4   ;;  %v395_v13 = vld [vmem:[%s10012_s12 + $0xa] sm:$0xff]  ;;  %v394_v14 = vld [vmem:[%s10012_s12 + $0x2] sm:$0xff]  ;;  %v397_v15 = vld [vmem:[%s10012_s12 + $0x1a] sm:$0xff] }
  0x1a   : >> { %v399_v17 = vld [vmem:[%s10012_s12 + $0x2a] sm:$0x3f]  ;;  %v398_v18 = vld [vmem:[%s10012_s12 + $0x22] sm:$0xff]  ;;  %v7682_v23 = vld [vmem:[%s10012_s12 + $0x58] sm:$0x3f] }
  0x1b   : >> { %v7680_v21 = vld [vmem:[%s10012_s12 + $0x48] sm:$0xff]  ;;  %v7679_v22 = vld [vmem:[%s10012_s12 + $0x40] sm:$0xff]  ;;  %v7681_v24 = vld [vmem:[%s10012_s12 + $0x50] sm:$0xff] }
  0x1c   : >> { %v7686_v25 = vld [vmem:[%s10012_s12 + $0x39] sm:$0xff]  ;;  %v7685_v26 = vld [vmem:[%s10012_s12 + $0x31] sm:$0xff]  ;;  %v7688_v27 = vld [vmem:[%s10012_s12 + $0x49] sm:$0xff] }
  0x1d   : >> { %317 = vperm.xlu1 %9886, %v288_v5   ;;  %312 = vperm.xlu0 %9885, %v287_v6   ;;  %v7687_v28 = vld [vmem:[%s10012_s12 + $0x41] sm:$0xff]  ;;  %v7690_v29 = vld [vmem:[%s10012_s12 + $0x59] sm:$0x3f]  ;;  %v7689_v30 = vld [vmem:[%s10012_s12 + $0x51] sm:$0xff] }
  0x1e   : >> { %v7694_v31 = vld [vmem:[%s10012_s12 + $0x3a] sm:$0xff]  ;;  %v7693_v32 = vld [vmem:[%s10012_s12 + $0x32] sm:$0xff]  ;;  %v7696_v33 = vld [vmem:[%s10012_s12 + $0x4a] sm:$0xff] }
  0x1f   : >> { %v7695_v34 = vld [vmem:[%s10012_s12 + $0x42] sm:$0xff]  ;;  %v7698_v35 = vld [vmem:[%s10012_s12 + $0x5a] sm:$0x3f]  ;;  %v7697_v36 = vld [vmem:[%s10012_s12 + $0x52] sm:$0xff] }
  0x20   : >> { %v7702_v37 = vld [vmem:[%s10012_s12 + $0x68] sm:$0xff]  ;;  %v7701_v38 = vld [vmem:[%s10012_s12 + $0x60] sm:$0xff]  ;;  %v7704_v39 = vld [vmem:[%s10012_s12 + $0x78] sm:$0xff] }
  0x21   : >> { %353 = vperm.xlu1 %9886, %v339_v7   ;;  %348 = vperm.xlu0 %9885, %v338_v8   ;;  %v7703_v40 = vld [vmem:[%s10012_s12 + $0x70] sm:$0xff]  ;;  %v7706_v41 = vld [vmem:[%s10012_s12 + $0x88] sm:$0x3f]  ;;  %v7705_v42 = vld [vmem:[%s10012_s12 + $0x80] sm:$0xff] }
  0x22   : >> { %v7710_v43 = vld [vmem:[%s10012_s12 + $0x69] sm:$0xff]  ;;  %v7709_v44 = vld [vmem:[%s10012_s12 + $0x61] sm:$0xff]  ;;  %v7712_v45 = vld [vmem:[%s10012_s12 + $0x79] sm:$0xff] }
  0x23   : >> { %v7711_v46 = vld [vmem:[%s10012_s12 + $0x71] sm:$0xff]  ;;  %v7714_v47 = vld [vmem:[%s10012_s12 + $0x89] sm:$0x3f]  ;;  %v7713_v48 = vld [vmem:[%s10012_s12 + $0x81] sm:$0xff] }
  0x24   : >> { %v7718_v49 = vld [vmem:[%s10012_s12 + $0x6a] sm:$0xff]  ;;  %v7717_v50 = vld [vmem:[%s10012_s12 + $0x62] sm:$0xff]  ;;  %v7720_v51 = vld [vmem:[%s10012_s12 + $0x7a] sm:$0xff] }
  0x25   : >> { %363 = vperm.xlu1 %9886, %v341_v9   ;;  %358 = vperm.xlu0 %9885, %v340_v10   ;;  %v7719_v52 = vld [vmem:[%s10012_s12 + $0x72] sm:$0xff]  ;;  %v7722_v53 = vld [vmem:[%s10012_s12 + $0x8a] sm:$0x3f]  ;;  %v7721_v54 = vld [vmem:[%s10012_s12 + $0x82] sm:$0xff] }
  0x29   : >> { %373 = vperm.xlu1 %9886, %v343_v11   ;;  %368 = vperm.xlu0 %9885, %v342_v12  }
  0x2d   : >> { %409 = vperm.xlu1 %9886, %v395_v13   ;;  %404 = vperm.xlu0 %9885, %v394_v14  }
  0x31   : >> { %419 = vperm.xlu1 %9886, %v397_v15   ;;  %414 = vperm.xlu0 %9885, %v396_v16  }
  0x35   : >> { %429 = vperm.xlu1 %9886, %v399_v17   ;;  %424 = vperm.xlu0 %9885, %v398_v18  }
  0x39   : >> { %468 = vperm.xlu1 %9886, %v7678_v19   ;;  %463 = vperm.xlu0 %9885, %v7677_v20  }
  0x3d   : >> { %478 = vperm.xlu1 %9886, %v7680_v21   ;;  %473 = vperm.xlu0 %9885, %v7679_v22  }
  0x41   : >> { %488 = vperm.xlu1 %9886, %v7682_v23   ;;  %483 = vperm.xlu0 %9885, %v7681_v24  }
  0x45   : >> { %524 = vperm.xlu1 %9886, %v7686_v25   ;;  %519 = vperm.xlu0 %9885, %v7685_v26  }
  0x49   : >> { %534 = vperm.xlu1 %9886, %v7688_v27   ;;  %529 = vperm.xlu0 %9885, %v7687_v28  }
  0x4d   : >> { %544 = vperm.xlu1 %9886, %v7690_v29   ;;  %539 = vperm.xlu0 %9885, %v7689_v30  }
  0x51   : >> { %580 = vperm.xlu1 %9886, %v7694_v31   ;;  %575 = vperm.xlu0 %9885, %v7693_v32  }
  0x55   : >> { %590 = vperm.xlu1 %9886, %v7696_v33   ;;  %585 = vperm.xlu0 %9885, %v7695_v34  }
  0x59   : >> { %600 = vperm.xlu1 %9886, %v7698_v35   ;;  %595 = vperm.xlu0 %9885, %v7697_v36  }
  0x5d   : >> { %639 = vperm.xlu1 %9886, %v7702_v37   ;;  %634 = vperm.xlu0 %9885, %v7701_v38  }
  0x61   : >> { %649 = vperm.xlu1 %9886, %v7704_v39   ;;  %644 = vperm.xlu0 %9885, %v7703_v40  }
  0x65   : >> { %659 = vperm.xlu1 %9886, %v7706_v41   ;;  %654 = vperm.xlu0 %9885, %v7705_v42  }
  0x69   : >> { %695 = vperm.xlu1 %9886, %v7710_v43   ;;  %690 = vperm.xlu0 %9885, %v7709_v44  }
  0x6d   : >> { %705 = vperm.xlu1 %9886, %v7712_v45   ;;  %700 = vperm.xlu0 %9885, %v7711_v46  }
  0x71   : >> { %715 = vperm.xlu1 %9886, %v7714_v47   ;;  %710 = vperm.xlu0 %9885, %v7713_v48  }
  0x75   : >> { %751 = vperm.xlu1 %9886, %v7718_v49   ;;  %746 = vperm.xlu0 %9885, %v7717_v50  }
  0x79   : >> { %761 = vperm.xlu1 %9886, %v7720_v51   ;;  %756 = vperm.xlu0 %9885, %v7719_v52   ;;  %v7676_v51 = vld [vmem:[%s11524_s1 + $0x2] ss:$0 sm:$0xff]  ;;  %v7684_v52 = vld [vmem:[%s11524_s1 + $0x3] ss:$0 sm:$0xff] }
  0x7d   : >> { %771 = vperm.xlu1 %9886, %v7722_v53   ;;  %766 = vperm.xlu0 %9885, %v7721_v54  }
  0x94   : >> { %v303_v55 = vpop.permute.xlu1 %302  ;;  %v293_v56 = vpop.permute.xlu0 %292 }
  0x95   : >> { %v326_v1 = vmul.f32 %v7672_v61, %v293_v56  ;;  %v328_v9 = vmul.f32 %v7672_v61, %v303_v55 }
  0x98   : >> { %v308_v57 = vpop.permute.xlu1 %307  ;;  %v298_v58 = vpop.permute.xlu0 %297 }
  0x99   : >> { %v327_v2 = vmul.f32 %v7672_v61, %v298_v58  ;;  %v329_v10 = vmul.f32 %v7672_v61, %v308_v57 }
  0x9c   : >> { %v318_v59 = vpop.permute.xlu1 %317  ;;  %v313_v60 = vpop.permute.xlu0 %312 }
  0x9d   : >> { %v331_v17 = vmul.f32 %v7672_v61, %v318_v59  ;;  %v330_v18 = vmul.f32 %v7672_v61, %v313_v60  ;;  %v7692_v61 = vld [vmem:[%s11524_s1 + $0x4] ss:$0 sm:$0xff] }
  0xa0   : >> { %v354_v63 = vpop.permute.xlu1 %353  ;;  %v349_v0 = vpop.permute.xlu0 %348 }
  0xa1   : >> { %v383_v3 = vmul.f32 %v7674_v62, %v354_v63  ;;  %v382_v4 = vmul.f32 %v7674_v62, %v349_v0 }
  0xa3   : >> { %v389_v5 = vadd.f32 %v383_v3, %v327_v2  ;;  %v388_v6 = vadd.f32 %v382_v4, %v326_v1 }
  0xa4   : >> { %v364_v7 = vpop.permute.xlu1 %363  ;;  %v359_v8 = vpop.permute.xlu0 %358 }
  0xa5   : >> { %v385_v11 = vmul.f32 %v7674_v62, %v364_v7  ;;  %v384_v12 = vmul.f32 %v7674_v62, %v359_v8 }
  0xa7   : >> { %v391_v13 = vadd.f32 %v385_v11, %v329_v10  ;;  %v390_v14 = vadd.f32 %v384_v12, %v328_v9  ;;  %v7700_v10 = vld [vmem:[%s11524_s1 + $0x5] ss:$0 sm:$0xff] }
  0xa8   : >> { %v374_v15 = vpop.permute.xlu1 %373  ;;  %v369_v16 = vpop.permute.xlu0 %368 }
  0xa9   : >> { %v387_v19 = vmul.f32 %v7674_v62, %v374_v15  ;;  %v386_v20 = vmul.f32 %v7674_v62, %v369_v16 }
  0xab   : >> { %v10074_v21 = vadd.f32 %v387_v19, %v331_v17  ;;  %v10076_v22 = vadd.f32 %v386_v20, %v330_v18 }
  0xac   : >> { %v410_v23 = vpop.permute.xlu1 %409  ;;  %v405_v24 = vpop.permute.xlu0 %404 }
  0xad   : >> { %v439_v55 = vmul.f32 %v7676_v51, %v410_v23  ;;  %v438_v56 = vmul.f32 %v7676_v51, %v405_v24 }
  0xaf   : >> { %v445_v0 = vadd.f32 %v439_v55, %v389_v5  ;;  %v444_v1 = vadd.f32 %v438_v56, %v388_v6  ;;  %v7708_v5 = vld [vmem:[%s11524_s1 + $0x6] ss:$0 sm:$0xff] }
  0xb0   : >> { %v420_v25 = vpop.permute.xlu1 %419  ;;  %v415_v26 = vpop.permute.xlu0 %414 }
  0xb1   : >> { %v441_v57 = vmul.f32 %v7676_v51, %v420_v25  ;;  %v440_v58 = vmul.f32 %v7676_v51, %v415_v26 }
  0xb3   : >> { %v447_v11 = vadd.f32 %v441_v57, %v391_v13  ;;  %v446_v12 = vadd.f32 %v440_v58, %v390_v14 }
  0xb4   : >> { %v430_v27 = vpop.permute.xlu1 %429  ;;  %v425_v28 = vpop.permute.xlu0 %424 }
  0xb5   : >> { %v443_v2 = vmul.f32 %v7676_v51, %v430_v27  ;;  %v442_v3 = vmul.f32 %v7676_v51, %v425_v28 }
  0xb7   : >> { %v449_v24 = vadd.f32 %v443_v2, %v10074_v21  ;;  %v448_v25 = vadd.f32 %v442_v3, %v10076_v22 }
  0xb8   : >> { %v469_v29 = vpop.permute.xlu1 %468  ;;  %v464_v30 = vpop.permute.xlu0 %463 }
  0xb9   : >> { %v498_v59 = vmul.f32 %v7684_v52, %v469_v29  ;;  %v497_v60 = vmul.f32 %v7684_v52, %v464_v30  ;;  %v7716_v30 = vld [vmem:[%s11524_s1 + $0x7] ss:$0 sm:$0xff] }
  0xbb   : >> { %v504_v15 = vadd.f32 %v498_v59, %v445_v0  ;;  %v503_v16 = vadd.f32 %v497_v60, %v444_v1 }
  0xbc   : >> { %v479_v31 = vpop.permute.xlu1 %478  ;;  %v474_v32 = vpop.permute.xlu0 %473 }
  0xbd   : >> { %v500_v4 = vmul.f32 %v7684_v52, %v479_v31  ;;  %v499_v7 = vmul.f32 %v7684_v52, %v474_v32 }
  0xbf   : >> { %v506_v13 = vadd.f32 %v500_v4, %v447_v11  ;;  %v505_v14 = vadd.f32 %v499_v7, %v446_v12 }
  0xc0   : >> { %v489_v33 = vpop.permute.xlu1 %488  ;;  %v484_v34 = vpop.permute.xlu0 %483 }
  0xc1   : >> { %v502_v17 = vmul.f32 %v7684_v52, %v489_v33  ;;  %v501_v18 = vmul.f32 %v7684_v52, %v484_v34 }
  0xc4   : >> { %v525_v35 = vpop.permute.xlu1 %524  ;;  %v520_v36 = vpop.permute.xlu0 %519 }
  0xc5   : >> { %v554_v8 = vmul.f32 %v7692_v61, %v525_v35  ;;  %v553_v9 = vmul.f32 %v7692_v61, %v520_v36  ;;  %v508_v35 = vadd.f32 %v502_v17, %v449_v24  ;;  %v507_v36 = vadd.f32 %v501_v18, %v448_v25 }
  0xc7   : >> { %v560_v28 = vadd.f32 %v554_v8, %v504_v15  ;;  %v559_v29 = vadd.f32 %v553_v9, %v503_v16 }
  0xc8   : >> { %v535_v37 = vpop.permute.xlu1 %534  ;;  %v530_v38 = vpop.permute.xlu0 %529 }
  0xc9   : >> { %v556_v19 = vmul.f32 %v7692_v61, %v535_v37  ;;  %v555_v20 = vmul.f32 %v7692_v61, %v530_v38 }
  0xcb   : >> { %v562_v21 = vadd.f32 %v556_v19, %v506_v13  ;;  %v561_v37 = vadd.f32 %v555_v20, %v505_v14 }
  0xcc   : >> { %v10078_v39 = vpop.permute.xlu1 %544  ;;  %v10080_v40 = vpop.permute.xlu0 %539 }
  0xcd   : >> { %v558_v55 = vmul.f32 %v7692_v61, %v10078_v39  ;;  %v557_v56 = vmul.f32 %v7692_v61, %v10080_v40 }
  0xcf   : >> { %v564_v61 = vadd.f32 %v558_v55, %v508_v35  ;;  %v563_v3 = vadd.f32 %v557_v56, %v507_v36 }
  0xd0   : >> { %v581_v41 = vpop.permute.xlu1 %580  ;;  %v576_v42 = vpop.permute.xlu0 %575 }
  0xd1   : >> { %v610_v26 = vmul.f32 %v7700_v10, %v581_v41  ;;  %v609_v27 = vmul.f32 %v7700_v10, %v576_v42 }
  0xd3   : >> { %v616_v41 = vadd.f32 %v610_v26, %v560_v28  ;;  %v615_v42 = vadd.f32 %v609_v27, %v559_v29 }
  0xd4   : >> { %v591_v43 = vpop.permute.xlu1 %590  ;;  %v586_v44 = vpop.permute.xlu0 %585 }
  0xd5   : >> { %v612_v31 = vmul.f32 %v7700_v10, %v591_v43  ;;  %v611_v32 = vmul.f32 %v7700_v10, %v586_v44  ;;  %v7724_v43 = vld [vmem:[%s11524_s1 + $0x8] ss:$0 sm:$0xff] }
  0xd7   : >> { %v618_v44 = vadd.f32 %v612_v31, %v562_v21 }
  0xd8   : >> { %v10082_v45 = vpop.permute.xlu1 %600  ;;  %v10084_v46 = vpop.permute.xlu0 %595 }
  0xd9   : >> { %v614_v60 = vmul.f32 %v7700_v10, %v10082_v45  ;;  %v613_v0 = vmul.f32 %v7700_v10, %v10084_v46 }
  0xdb   : >> { %v620_v46 = vadd.f32 %v614_v60, %v564_v61  ;;  %v619_v10 = vadd.f32 %v613_v0, %v563_v3 }
  0xdc   : >> { %v640_v47 = vpop.permute.xlu1 %639  ;;  %v635_v48 = vpop.permute.xlu0 %634 }
  0xdd   : >> { %v669_v33 = vmul.f32 %v7708_v5, %v640_v47  ;;  %v668_v34 = vmul.f32 %v7708_v5, %v635_v48  ;;  %v617_v47 = vadd.f32 %v611_v32, %v561_v37 }
  0xdf   : >> { %v675_v48 = vadd.f32 %v669_v33, %v616_v41  ;;  %v674_v59 = vadd.f32 %v668_v34, %v615_v42 }
  0xe0   : >> { %v650_v49 = vpop.permute.xlu1 %649  ;;  %v645_v50 = vpop.permute.xlu0 %644 }
  0xe1   : >> { %v671_v57 = vmul.f32 %v7708_v5, %v650_v49  ;;  %v670_v58 = vmul.f32 %v7708_v5, %v645_v50 }
  0xe3   : >> { %v677_v4 = vadd.f32 %v671_v57, %v618_v44  ;;  %v676_v7 = vadd.f32 %v670_v58, %v617_v47 }
  0xe4   : >> { %v10092_v53 = vpop.permute.xlu1 %659  ;;  %v10094_v54 = vpop.permute.xlu0 %654 }
  0xe5   : >> { %v673_v8 = vmul.f32 %v7708_v5, %v10092_v53  ;;  %v672_v9 = vmul.f32 %v7708_v5, %v10094_v54 }
  0xe7   : >> { %v678_v54 = vadd.f32 %v672_v9, %v619_v10 }
  0xe8   : >> { %v696_v62 = vpop.permute.xlu1 %695  ;;  %v691_v63 = vpop.permute.xlu0 %690 }
  0xe9   : >> { %v725_v51 = vmul.f32 %v7716_v30, %v696_v62  ;;  %v724_v52 = vmul.f32 %v7716_v30, %v691_v63 }
  0xeb   : >> { %v731_v2 = vadd.f32 %v725_v51, %v675_v48  ;;  %v730_v40 = vadd.f32 %v724_v52, %v674_v59 }
  0xec   : >> { %v706_v6 = vpop.permute.xlu1 %705  ;;  %v701_v23 = vpop.permute.xlu0 %700 }
  0xed   : >> { %v727_v62 = vmul.f32 %v7716_v30, %v706_v6  ;;  %v726_v63 = vmul.f32 %v7716_v30, %v701_v23  ;;  %v679_v6 = vadd.f32 %v673_v8, %v620_v46 }
  0xef   : >> { %v733_v12 = vadd.f32 %v727_v62, %v677_v4  ;;  %v732_v15 = vadd.f32 %v726_v63, %v676_v7 }
  0xf0   : >> { %v716_v22 = vpop.permute.xlu1 %715  ;;  %v711_v38 = vpop.permute.xlu0 %710 }
  0xf1   : >> { %v729_v18 = vmul.f32 %v7716_v30, %v716_v22  ;;  %v728_v19 = vmul.f32 %v7716_v30, %v711_v38 }
  0xf3   : >> { %v735_v26 = vadd.f32 %v729_v18, %v679_v6  ;;  %v734_v27 = vadd.f32 %v728_v19, %v678_v54 }
  0xf4   : >> { %v752_v1 = vpop.permute.xlu1 %751  ;;  %v747_v39 = vpop.permute.xlu0 %746 }
  0xf5   : >> { %v781_v49 = vmul.f32 %v7724_v43, %v752_v1  ;;  %v780_v50 = vmul.f32 %v7724_v43, %v747_v39 }
  0xf7   : >> { %v787_v45 = vadd.f32 %v781_v49, %v731_v2  ;;  %v786_v11 = vadd.f32 %v780_v50, %v730_v40 }
  0xf8   : >> { %v762_v16 = vpop.permute.xlu1 %761  ;;  %v757_v17 = vpop.permute.xlu0 %756 }
  0xf9   : >> { %795 = vst.msk [vmem:[%s792_s14 + $0x8] sm:$0xff] %vm793_vm0, %v787_v45  ;;  %794 = vst.msk [vmem:[%s792_s14] sm:$0xff] %vm793_vm0, %v786_v11  ;;  %v783_v20 = vmul.f32 %v7724_v43, %v762_v16  ;;  %v782_v53 = vmul.f32 %v7724_v43, %v757_v17 }
  0xfb   : >> { %v789_v5 = vadd.f32 %v783_v20, %v733_v12  ;;  %v788_v23 = vadd.f32 %v782_v53, %v732_v15 }
  0xfc   : >> { %v772_v24 = vpop.permute.xlu1 %771  ;;  %v767_v25 = vpop.permute.xlu0 %766  ;;  %279 = sbr.rel (!%p277_p4) target bundleno = 17 (0x11), region = 236 }
  0xfd   : >> { %797 = vst.msk [vmem:[%s792_s14 + $0x18] sm:$0xff] %vm793_vm0, %v789_v5  ;;  %796 = vst.msk [vmem:[%s792_s14 + $0x10] sm:$0xff] %vm793_vm0, %v788_v23  ;;  %v785_v13 = vmul.f32 %v7724_v43, %v772_v24  ;;  %v784_v14 = vmul.f32 %v7724_v43, %v767_v25 }
  0xff   : >> { %v791_v28 = vadd.f32 %v785_v13, %v735_v26  ;;  %v790_v29 = vadd.f32 %v784_v14, %v734_v27 }
 0x101   : >> { %800 = vst.msk [vmem:[%s792_s14 + $0x28] sm:$0x3f] %vm799_vm1, %v791_v28 }
 0x102   : >> { %798 = vst.msk [vmem:[%s792_s14 + $0x20] sm:$0xff] %vm793_vm0, %v790_v29 }
 0x103 LB: >> { %s7726_s15 = smul.u32 96, %s9921_s11  ;;  %v7740_v35 = vld [vmem:[%s11525_s2] ss:$0 sm:$0xff]  ;;  %vm862_vm2 = vcmask 96256   ;;  %s9921_s11 = sphi %s10129_s11, %s806_s11  }
 0x104   : >> { %s857_s9 = smul.u32 24, %s9921_s11  ;;  %s806_s11 = sadd.s32 1, %s9921_s11  }
 0x105   : >> { %s809_s16 = scalar_lea.vmem [#allocation2], %s7726_s15  ;;  %p803_p5 = scmp.ge.s32.totalorder %s806_s11, 23  }
 0x106   : >> { %s858_s10 = scalar_lea.vmem [#allocation3], %s857_s9  ;;  %s10144_s19 = smov (%p803_p5), 0  }
 0x109   : >> { %v810_v30 = vld [vmem:[%s809_s16] ss:$2 sm:$0xff]  ;;  %v7729_v31 = vld [vmem:[%s809_s16 + $0x1] ss:$2 sm:$0xff]  ;;  %v7734_v32 = vld [vmem:[%s809_s16 + $0x30] ss:$2 sm:$0xff] }
 0x10a   : >> { %v7737_v33 = vld [vmem:[%s809_s16 + $0x31] ss:$2 sm:$0xff]  ;;  %v835_v34 = vmax.f32 %v810_v30, %v7729_v31  ;;  %v7727_v36 = vld [vmem:[%s809_s16 + $0x10] ss:$2 sm:$0xff]  ;;  %v7735_v22 = vld [vmem:[%s809_s16 + $0x40] ss:$2 sm:$0xff] }
 0x10b   : >> { %v838_v21 = vmax.f32 %v7734_v32, %v7737_v33  ;;  %v7730_v37 = vld [vmem:[%s809_s16 + $0x11] ss:$2 sm:$0xff]  ;;  %v7738_v38 = vld [vmem:[%s809_s16 + $0x41] ss:$2 sm:$0xff] }
 0x10c   : >> { %v836_v41 = vmax.f32 %v7727_v36, %v7730_v37  ;;  %v839_v42 = vmax.f32 %v7735_v22, %v7738_v38  ;;  %v7728_v51 = vld [vmem:[%s809_s16 + $0x20] ss:$2 sm:$0x7f]  ;;  %v7731_v52 = vld [vmem:[%s809_s16 + $0x21] ss:$2 sm:$0x7f] }
 0x10d   : >> { %v841_v55 = vmax.f32 %v835_v34, %v838_v21  ;;  %v7736_v56 = vld [vmem:[%s809_s16 + $0x50] ss:$2 sm:$0x7f]  ;;  %v7739_v57 = vld [vmem:[%s809_s16 + $0x51] ss:$2 sm:$0x7f]  ;;  %v837_v58 = vmax.f32 %v7728_v51, %v7731_v52 }
 0x10e   : >> { %v842_v43 = vmax.f32 %v836_v41, %v839_v42  ;;  %v840_v44 = vmax.f32 %v7736_v56, %v7739_v57 }
 0x10f   : >> { %v851_v47 = vadd.f32 %v7740_v35, %v841_v55 }
 0x110   : >> { %v852_v48 = vadd.f32 %v7740_v35, %v842_v43  ;;  %v843_v59 = vmax.f32 %v837_v58, %v840_v44  ;;  %805 = sbr.rel (!%p803_p5) target bundleno = 259 (0x103), region = 247 }
 0x111   : >> { %v854_v60 = vmax.f32 %v851_v47, 0.0 }
 0x112   : >> { %v855_v0 = vmax.f32 %v852_v48, 0.0  ;;  %v853_v62 = vadd.f32 %v7740_v35, %v843_v59 }
 0x113   : >> { %860 = vst.msk [vmem:[%s858_s10] sm:$0xff] %vm793_vm0, %v854_v60 }
 0x114   : >> { %861 = vst.msk [vmem:[%s858_s10 + $0x8] sm:$0xff] %vm793_vm0, %v855_v0  ;;  %v856_v63 = vmax.f32 %v853_v62, 0.0 }
 0x116   : >> { %863 = vst.msk [vmem:[%s858_s10 + $0x10] sm:$0x7f] %vm862_vm2, %v856_v63 }
 0x117 LB: >> { %v7741_v1 = vld [vmem:[%s11526_s3 + $0x10] sm:$0xff]  ;;  %v7742_v39 = vld [vmem:[%s11526_s3 + $0x18] sm:$0xf]  ;;  %vm893_vm3 = vcmask 1043456   ;;  %v9936_v2 = vmov 0.0|0.0   ;;  %vm9937_vm4 = vmmov 1   ;;  %s9925_s19 = sphi %s10144_s19, %s869_s19  }
 0x118   : >> { %9343 = vmatprep.subr.bf16.mxu1 %v9936_v2  ;;  %9391 = vmatprep.subr.bf16.mxu0 %v9936_v2  ;;  %v9344_v40 = vpack.c.bf16 %v7742_v39, %v7741_v1  ;;  %vm10158_vm5 = vmpackc.low %vm893_vm3, %vm9937_vm4  ;;  %v7835_v50 = vld [vmem:[%s11526_s3 + $0xc0] sm:$0xff]  ;;  %v7836_v61 = vld [vmem:[%s11526_s3 + $0xc8] sm:$0xf]  ;;  %vm9938_vm6 = vmmov 0   ;;  %v9939_v4 = vmov 0.0   ;;  %s870_s8 = smul.u32 24, %s9925_s19 }
 0x119   : >> { %v10168_v3 = vpack.c.bf16 %v7836_v61, %v7835_v50  ;;  %8581 = vmatprep.mubr.msk.f32.mxu1 %vm9938_vm6, %v9939_v4  ;;  %8737 = vmatprep.mubr.msk.f32.mxu0 %vm9938_vm6, %v9939_v4  ;;  %v875_v7 = vld [vmem:[%s11526_s3] sm:$0xff]  ;;  %v876_v8 = vld [vmem:[%s11526_s3 + $0x8] sm:$0xf]  ;;  %v7844_v9 = vld [vmem:[%s11526_s3 + $0xd0] sm:$0xff]  ;;  %vm3405_vm7 = vcmask 162816   ;;  %vm3408_vm8 = vcmask 157696  }
 0x11a   : >> { %9346 = vmatpush3.bf16.msk.msra.mxu1 %vm10158_vm5, %v9344_v40  ;;  %v9348_v45 = vpack.c.bf16 %v876_v8, %v875_v7  ;;  %v7845_v11 = vld [vmem:[%s11526_s3 + $0xd8] sm:$0xf]  ;;  %s10195_s9 = scalar_lea.vmem [#allocation3], %s870_s8  ;;  %v7853_v16 = vld [vmem:[%s11526_s3 + $0xe0] sm:$0xff]  ;;  %v7854_v17 = vld [vmem:[%s11526_s3 + $0xe8] sm:$0xf] }
 0x11b   : >> { %9394 = vmatpush3.bf16.msk.msra.mxu0 %vm10158_vm5, %v10168_v3  ;;  %9347 = vmatprep.subr.bf16.mxu1 %v9936_v2  ;;  %v9396_v46 = vpack.c.bf16 %v7845_v11, %v7844_v9  ;;  %v9400_v20 = vpack.c.bf16 %v7854_v17, %v7853_v16  ;;  %v7751_v53 = vld [vmem:[%s11526_s3 + $0x20] sm:$0xff]  ;;  %v7752_v6 = vld [vmem:[%s11526_s3 + $0x28] sm:$0xf]  ;;  %v7862_v26 = vld [vmem:[%s11526_s3 + $0xf0] sm:$0xff]  ;;  %s3404_s18 = scalar_lea.vmem [#allocation4], %s870_s8  ;;  %s869_s19 = sadd.s32 1, %s9925_s19  }
 0x11c   : >> { %9395 = vmatprep.subr.bf16.mxu0 %v9936_v2  ;;  %v9352_v5 = vpack.c.bf16 %v7752_v6, %v7751_v53  ;;  %v7863_v27 = vld [vmem:[%s11526_s3 + $0xf8] sm:$0xf]  ;;  %v7757_v29 = vld [vmem:[%s11526_s3 + $0x30] sm:$0xff]  ;;  %v7871_v36 = vld [vmem:[%s11526_s3 + $0x100] sm:$0xff]  ;;  %p866_p6 = scmp.ge.s32.totalorder %s869_s19, 19  }
 0x11d   : >> { %v877_v10 = vld [vmem:[%s10195_s9 + $0x1] sm:$0xff]  ;;  %v7832_v12 = vld [vmem:[%s10195_s9 + $0x32] sm:$0xff]  ;;  %v878_v15 = vld [vmem:[%s10195_s9 + $0x9] sm:$0xff]  ;;  %v9404_v28 = vpack.c.bf16 %v7863_v27, %v7862_v26  ;;  %s10699_s8 = smov (%p866_p6), 0  }
 0x11e   : >> { %8582 = vmatmul.mubr.msk.f32.vlgmr.msra.gmra.mrb[0].mxu1 %vm793_vm0, %v877_v10  ;;  %8738 = vmatmul.mubr.msk.f32.vlgmr.msra.gmra.mrb[0].mxu0 %vm793_vm0, %v7832_v12  ;;  %v879_v18 = vld [vmem:[%s10195_s9 + $0x11] sm:$0x7]  ;;  %v872_v54 = vld [vmem:[%s10195_s9] sm:$0xff]  ;;  %v873_v24 = vld [vmem:[%s10195_s9 + $0x8] sm:$0xff] }
 0x11f   : >> { %9350 = vmatpush3.bf16.msk.msra.mxu1 %vm10158_vm5, %v9348_v45  ;;  %9398 = vmatpush3.bf16.msk.msra.mxu0 %vm10158_vm5, %v9396_v46  ;;  %v7841_v19 = vld [vmem:[%s10195_s9 + $0x33] sm:$0xff]  ;;  %v7842_v23 = vld [vmem:[%s10195_s9 + $0x3b] sm:$0xff]  ;;  %v7843_v25 = vld [vmem:[%s10195_s9 + $0x43] sm:$0x7] }
 0x120   : >> { %8584 = vmatprep.mubr.msk.f32.mxu1 %vm9938_vm6, %v9939_v4  ;;  %8750 = vmatprep.mubr.msk.f32.mxu0 %vm9938_vm6, %v9939_v4  ;;  %v874_v13 = vld [vmem:[%s10195_s9 + $0x10] sm:$0x7]  ;;  %v7850_v14 = vld [vmem:[%s10195_s9 + $0x34] sm:$0xff]  ;;  %v1069_v31 = vld [vmem:[%s10195_s9 + $0x2] sm:$0xff] }
 0x121   : >> { %9399 = vmatprep.subr.bf16.mxu0 %v9936_v2  ;;  %9351 = vmatprep.subr.bf16.mxu1 %v9936_v2  ;;  %v7758_v30 = vld [vmem:[%s11526_s3 + $0x38] sm:$0xf]  ;;  %v7851_v33 = vld [vmem:[%s10195_s9 + $0x3c] sm:$0xff]  ;;  %v1070_v34 = vld [vmem:[%s10195_s9 + $0xa] sm:$0xff] }
 0x122   : >> { %8585 = vmatmul.mubr.msk.f32.gmra.mrb[2].mxu1 %vm793_vm0, %v878_v15  ;;  %v9356_v32 = vpack.c.bf16 %v7758_v30, %v7757_v29  ;;  %v7852_v35 = vld [vmem:[%s10195_s9 + $0x44] sm:$0x7]  ;;  %v7872_v21 = vld [vmem:[%s11526_s3 + $0x108] sm:$0xf]  ;;  %v1071_v37 = vld [vmem:[%s10195_s9 + $0x12] sm:$0x7] }
 0x123   : >> { %8587 = vmatprep.mubr.msk.f32.mxu1 %vm9938_vm6, %v9939_v4  ;;  %v7859_v22 = vld [vmem:[%s10195_s9 + $0x48] sm:$0xff]  ;;  %v9408_v38 = vpack.c.bf16 %v7872_v21, %v7871_v36  ;;  %v7763_v41 = vld [vmem:[%s11526_s3 + $0x40] sm:$0xff]  ;;  %v7860_v55 = vld [vmem:[%s10195_s9 + $0x50] sm:$0xff] }
 0x124   : >> { %v7764_v42 = vld [vmem:[%s11526_s3 + $0x48] sm:$0xf]  ;;  %v7861_v57 = vld [vmem:[%s10195_s9 + $0x58] sm:$0x7]  ;;  %v7880_v58 = vld [vmem:[%s11526_s3 + $0x110] sm:$0xff] }
 0x125   : >> { %v1170_v51 = vld [vmem:[%s10195_s9 + $0x3] sm:$0xff]  ;;  %v9360_v52 = vpack.c.bf16 %v7764_v42, %v7763_v41  ;;  %v1171_v56 = vld [vmem:[%s10195_s9 + $0xb] sm:$0xff]  ;;  %v7881_v43 = vld [vmem:[%s11526_s3 + $0x118] sm:$0xf] }
 0x126   : >> { %8588 = vmatmul.mubr.msk.f32.gmra.mrb[4].mxu1 %vm793_vm0, %v879_v18  ;;  %8751 = vmatmul.mubr.msk.f32.vlgmr.msra.gmra.mrb[0].mxu0 %vm793_vm0, %v7841_v19  ;;  %v1172_v44 = vld [vmem:[%s10195_s9 + $0x13] sm:$0x7]  ;;  %v7868_v47 = vld [vmem:[%s10195_s9 + $0x49] sm:$0xff]  ;;  %v9412_v48 = vpack.c.bf16 %v7881_v43, %v7880_v58  ;;  %v7773_v60 = vld [vmem:[%s11526_s3 + $0x58] sm:$0xf] }
 0x127   : >> { %8594 = vmatprep.mubr.msk.f32.mxu1 %vm9938_vm6, %v9939_v4  ;;  %9402 = vmatpush3.bf16.msk.msra.mxu0 %vm10158_vm5, %v9400_v20  ;;  %v7772_v59 = vld [vmem:[%s11526_s3 + $0x50] sm:$0xff]  ;;  %v1271_v0 = vld [vmem:[%s10195_s9 + $0x4] sm:$0xff]  ;;  %v7870_v39 = vld [vmem:[%s10195_s9 + $0x59] sm:$0x7] }
 0x128   : >> { %8753 = vmatprep.mubr.msk.f32.mxu0 %vm9938_vm6, %v9939_v4  ;;  %9403 = vmatprep.subr.bf16.mxu0 %v9936_v2  ;;  %v9364_v62 = vpack.c.bf16 %v7773_v60, %v7772_v59  ;;  %v7869_v63 = vld [vmem:[%s10195_s9 + $0x51] sm:$0xff]  ;;  %v7889_v40 = vld [vmem:[%s11526_s3 + $0x120] sm:$0xff]  ;;  %v7890_v50 = vld [vmem:[%s11526_s3 + $0x128] sm:$0xf] }
 0x129   : >> { %v1272_v1 = vld [vmem:[%s10195_s9 + $0xc] sm:$0xff]  ;;  %v1273_v61 = vld [vmem:[%s10195_s9 + $0x14] sm:$0x7]  ;;  %v9416_v8 = vpack.c.bf16 %v7890_v50, %v7889_v40  ;;  %v7781_v9 = vld [vmem:[%s11526_s3 + $0x60] sm:$0xff] }
 0x12a   : >> { %8595 = vmatmul.mubr.msk.f32.vlgmr.msra.gmra.mrb[0].mxu1 %vm793_vm0, %v872_v54  ;;  %8754 = vmatmul.mubr.msk.f32.gmra.mrb[2].mxu0 %vm793_vm0, %v7842_v23  ;;  %v7877_v7 = vld [vmem:[%s10195_s9 + $0x4a] sm:$0xff]  ;;  %v7769_v11 = vld [vmem:[%s10195_s9 + $0x18] sm:$0xff]  ;;  %v7770_v12 = vld [vmem:[%s10195_s9 + $0x20] sm:$0xff] }
 0x12b   : >> { %9354 = vmatpush3.bf16.msk.msra.mxu1 %vm10158_vm5, %v9352_v5  ;;  %8597 = vmatprep.mubr.msk.f32.mxu1 %vm9938_vm6, %v9939_v4  ;;  %v7782_v45 = vld [vmem:[%s11526_s3 + $0x68] sm:$0xf]  ;;  %v7878_v10 = vld [vmem:[%s10195_s9 + $0x52] sm:$0xff]  ;;  %v7879_v15 = vld [vmem:[%s10195_s9 + $0x5a] sm:$0x7] }
 0x12c   : >> { %8756 = vmatprep.mubr.msk.f32.mxu0 %vm9938_vm6, %v9939_v4  ;;  %9355 = vmatprep.subr.bf16.mxu1 %v9936_v2  ;;  %v9368_v46 = vpack.c.bf16 %v7782_v45, %v7781_v9  ;;  %v7898_v16 = vld [vmem:[%s11526_s3 + $0x130] sm:$0xff]  ;;  %v7899_v17 = vld [vmem:[%s11526_s3 + $0x138] sm:$0xf]  ;;  %v7771_v18 = vld [vmem:[%s10195_s9 + $0x28] sm:$0x7] }
 0x12d   : >> { %v7886_v19 = vld [vmem:[%s10195_s9 + $0x4b] sm:$0xff]  ;;  %v9420_v20 = vpack.c.bf16 %v7899_v17, %v7898_v16  ;;  %v7791_v6 = vld [vmem:[%s11526_s3 + $0x78] sm:$0xf]  ;;  %v7907_v26 = vld [vmem:[%s11526_s3 + $0x140] sm:$0xff] }
 0x12e   : >> { %8598 = vmatmul.mubr.msk.f32.gmra.mrb[2].mxu1 %vm793_vm0, %v873_v24  ;;  %8757 = vmatmul.mubr.msk.f32.gmra.mrb[4].mxu0 %vm793_vm0, %v7843_v25  ;;  %v7790_v53 = vld [vmem:[%s11526_s3 + $0x70] sm:$0xff]  ;;  %v7778_v54 = vld [vmem:[%s10195_s9 + $0x19] sm:$0xff]  ;;  %v7779_v24 = vld [vmem:[%s10195_s9 + $0x21] sm:$0xff] }
 0x12f   : >> { %8600 = vmatprep.mubr.msk.f32.mxu1 %vm9938_vm6, %v9939_v4  ;;  %8763 = vmatprep.mubr.msk.f32.mxu0 %vm9938_vm6, %v9939_v4  ;;  %v9372_v5 = vpack.c.bf16 %v7791_v6, %v7790_v53  ;;  %v7887_v23 = vld [vmem:[%s10195_s9 + $0x53] sm:$0xff]  ;;  %v7888_v25 = vld [vmem:[%s10195_s9 + $0x5b] sm:$0x7]  ;;  %v7908_v27 = vld [vmem:[%s11526_s3 + $0x148] sm:$0xf] }
 0x130   : >> { %v7799_v29 = vld [vmem:[%s11526_s3 + $0x80] sm:$0xff]  ;;  %v7800_v30 = vld [vmem:[%s11526_s3 + $0x88] sm:$0xf]  ;;  %v7916_v36 = vld [vmem:[%s11526_s3 + $0x150] sm:$0xff] }
 0x131   : >> { %v7917_v21 = vld [vmem:[%s11526_s3 + $0x158] sm:$0xf]  ;;  %v7808_v41 = vld [vmem:[%s11526_s3 + $0x90] sm:$0xff]  ;;  %v7925_v58 = vld [vmem:[%s11526_s3 + $0x160] sm:$0xff] }
 0x132   : >> { %8601 = vmatmul.mubr.msk.f32.gmra.mrb[4].mxu1 %vm793_vm0, %v874_v13  ;;  %8764 = vmatmul.mubr.msk.f32.vlgmr.msra.gmra.mrb[0].mxu0 %vm793_vm0, %v7850_v14  ;;  %v7780_v13 = vld [vmem:[%s10195_s9 + $0x29] sm:$0x7]  ;;  %v7895_v14 = vld [vmem:[%s10195_s9 + $0x4c] sm:$0xff]  ;;  %v7809_v42 = vld [vmem:[%s11526_s3 + $0x98] sm:$0xf] }
 0x133   : >> { %8607 = vmatprep.mubr.msk.f32.mxu1 %vm9938_vm6, %v9939_v4  ;;  %9406 = vmatpush3.bf16.msk.msra.mxu0 %vm10158_vm5, %v9404_v28  ;;  %v9424_v28 = vpack.c.bf16 %v7908_v27, %v7907_v26  ;;  %v7926_v43 = vld [vmem:[%s11526_s3 + $0x168] sm:$0xf]  ;;  %v7817_v59 = vld [vmem:[%s11526_s3 + $0xa0] sm:$0xff]  ;;  %v7934_v40 = vld [vmem:[%s11526_s3 + $0x170] sm:$0xff] }
 0x134   : >> { %8766 = vmatprep.mubr.msk.f32.mxu0 %vm9938_vm6, %v9939_v4  ;;  %9407 = vmatprep.subr.bf16.mxu0 %v9936_v2  ;;  %v7818_v60 = vld [vmem:[%s11526_s3 + $0xa8] sm:$0xf]  ;;  %v7935_v50 = vld [vmem:[%s11526_s3 + $0x178] sm:$0xf]  ;;  %v7826_v9 = vld [vmem:[%s11526_s3 + $0xb0] sm:$0xff] }
 0x135   : >> { %v7827_v45 = vld [vmem:[%s11526_s3 + $0xb8] sm:$0xf]  ;;  %v7943_v16 = vld [vmem:[%s11526_s3 + $0x180] sm:$0xff]  ;;  %v7944_v17 = vld [vmem:[%s11526_s3 + $0x188] sm:$0xf] }
 0x136   : >> { %8608 = vmatmul.mubr.msk.f32.vlgmr.msra.gmra.mrb[0].mxu1 %vm793_vm0, %v1069_v31  ;;  %8767 = vmatmul.mubr.msk.f32.gmra.mrb[2].mxu0 %vm793_vm0, %v7851_v33  ;;  %v7787_v31 = vld [vmem:[%s10195_s9 + $0x1a] sm:$0xff]  ;;  %v7932_v53 = vld [vmem:[%s10195_s9 + $0x6b] sm:$0xff] }
 0x137   : >> { %9358 = vmatpush3.bf16.msk.msra.mxu1 %vm10158_vm5, %v9356_v32  ;;  %8610 = vmatprep.mubr.msk.f32.mxu1 %vm9938_vm6, %v9939_v4  ;;  %v9376_v32 = vpack.c.bf16 %v7800_v30, %v7799_v29  ;;  %v7896_v33 = vld [vmem:[%s10195_s9 + $0x54] sm:$0xff]  ;;  %v7825_v49 = vld [vmem:[%s10195_s9 + $0x41] sm:$0x7] }
 0x138   : >> { %8769 = vmatprep.mubr.msk.f32.mxu0 %vm9938_vm6, %v9939_v4  ;;  %9359 = vmatprep.subr.bf16.mxu1 %v9936_v2  ;;  %v7824_v6 = vld [vmem:[%s10195_s9 + $0x39] sm:$0xff] }
 0x13a   : >> { %8611 = vmatmul.mubr.msk.f32.gmra.mrb[2].mxu1 %vm793_vm0, %v1070_v34  ;;  %8770 = vmatmul.mubr.msk.f32.gmra.mrb[4].mxu0 %vm793_vm0, %v7852_v35  ;;  %v7788_v34 = vld [vmem:[%s10195_s9 + $0x22] sm:$0xff]  ;;  %v7897_v35 = vld [vmem:[%s10195_s9 + $0x5c] sm:$0x7] }
 0x13b   : >> { %8613 = vmatprep.mubr.msk.f32.mxu1 %vm9938_vm6, %v9939_v4  ;;  %8776 = vmatprep.mubr.msk.f32.mxu0 %vm9938_vm6, %v9939_v4 }
 0x13e   : >> { %8614 = vmatmul.mubr.msk.f32.gmra.mrb[4].mxu1 %vm793_vm0, %v1071_v37  ;;  %8777 = vmatmul.mubr.msk.f32.vlgmr.msra.gmra.mrb[0].mxu0 %vm793_vm0, %v7859_v22  ;;  %v7789_v37 = vld [vmem:[%s10195_s9 + $0x2a] sm:$0x7]  ;;  %v7904_v22 = vld [vmem:[%s10195_s9 + $0x60] sm:$0xff] }
 0x13f   : >> { %8620 = vmatprep.mubr.msk.f32.mxu1 %vm9938_vm6, %v9939_v4  ;;  %9410 = vmatpush3.bf16.msk.msra.mxu0 %vm10158_vm5, %v9408_v38  ;;  %v9428_v38 = vpack.c.bf16 %v7917_v21, %v7916_v36 }
 0x140   : >> { %8779 = vmatprep.mubr.msk.f32.mxu0 %vm9938_vm6, %v9939_v4  ;;  %9411 = vmatprep.subr.bf16.mxu0 %v9936_v2 }
 0x142   : >> { %8621 = vmatmul.mubr.msk.f32.vlgmr.msra.gmra.mrb[0].mxu1 %vm793_vm0, %v1170_v51  ;;  %8780 = vmatmul.mubr.msk.f32.gmra.mrb[2].mxu0 %vm793_vm0, %v7860_v55  ;;  %v7796_v51 = vld [vmem:[%s10195_s9 + $0x1b] sm:$0xff]  ;;  %v7905_v55 = vld [vmem:[%s10195_s9 + $0x68] sm:$0xff] }
 0x143   : >> { %9362 = vmatpush3.bf16.msk.msra.mxu1 %vm10158_vm5, %v9360_v52  ;;  %8623 = vmatprep.mubr.msk.f32.mxu1 %vm9938_vm6, %v9939_v4  ;;  %v9380_v52 = vpack.c.bf16 %v7809_v42, %v7808_v41 }
 0x144   : >> { %8782 = vmatprep.mubr.msk.f32.mxu0 %vm9938_vm6, %v9939_v4  ;;  %9363 = vmatprep.subr.bf16.mxu1 %v9936_v2 }
 0x146   : >> { %8624 = vmatmul.mubr.msk.f32.gmra.mrb[2].mxu1 %vm793_vm0, %v1171_v56  ;;  %8783 = vmatmul.mubr.msk.f32.gmra.mrb[4].mxu0 %vm793_vm0, %v7861_v57  ;;  %v7797_v56 = vld [vmem:[%s10195_s9 + $0x23] sm:$0xff]  ;;  %v7906_v57 = vld [vmem:[%s10195_s9 + $0x70] sm:$0x7] }
 0x147   : >> { %8626 = vmatprep.mubr.msk.f32.mxu1 %vm9938_vm6, %v9939_v4  ;;  %8789 = vmatprep.mubr.msk.f32.mxu0 %vm9938_vm6, %v9939_v4 }
 0x14a   : >> { %8627 = vmatmul.mubr.msk.f32.gmra.mrb[4].mxu1 %vm793_vm0, %v1172_v44  ;;  %8790 = vmatmul.mubr.msk.f32.vlgmr.msra.gmra.mrb[0].mxu0 %vm793_vm0, %v7868_v47  ;;  %v7798_v44 = vld [vmem:[%s10195_s9 + $0x2b] sm:$0x7]  ;;  %v7913_v47 = vld [vmem:[%s10195_s9 + $0x61] sm:$0xff] }
 0x14b   : >> { %8633 = vmatprep.mubr.msk.f32.mxu1 %vm9938_vm6, %v9939_v4  ;;  %9414 = vmatpush3.bf16.msk.msra.mxu0 %vm10158_vm5, %v9412_v48  ;;  %v9432_v48 = vpack.c.bf16 %v7926_v43, %v7925_v58 }
 0x14c   : >> { %8792 = vmatprep.mubr.msk.f32.mxu0 %vm9938_vm6, %v9939_v4  ;;  %9415 = vmatprep.subr.bf16.mxu0 %v9936_v2 }
 0x14e   : >> { %8634 = vmatmul.mubr.msk.f32.vlgmr.msra.gmra.mrb[0].mxu1 %vm793_vm0, %v1271_v0  ;;  %8793 = vmatmul.mubr.msk.f32.gmra.mrb[2].mxu0 %vm793_vm0, %v7869_v63  ;;  %v7805_v0 = vld [vmem:[%s10195_s9 + $0x1c] sm:$0xff]  ;;  %v7914_v63 = vld [vmem:[%s10195_s9 + $0x69] sm:$0xff] }
 0x14f   : >> { %9366 = vmatpush3.bf16.msk.msra.mxu1 %vm10158_vm5, %v9364_v62  ;;  %8636 = vmatprep.mubr.msk.f32.mxu1 %vm9938_vm6, %v9939_v4  ;;  %v9384_v62 = vpack.c.bf16 %v7818_v60, %v7817_v59 }
 0x150   : >> { %8795 = vmatprep.mubr.msk.f32.mxu0 %vm9938_vm6, %v9939_v4  ;;  %9367 = vmatprep.subr.bf16.mxu1 %v9936_v2 }
 0x152   : >> { %8637 = vmatmul.mubr.msk.f32.gmra.mrb[2].mxu1 %vm793_vm0, %v1272_v1  ;;  %8796 = vmatmul.mubr.msk.f32.gmra.mrb[4].mxu0 %vm793_vm0, %v7870_v39  ;;  %v7806_v1 = vld [vmem:[%s10195_s9 + $0x24] sm:$0xff]  ;;  %v7915_v39 = vld [vmem:[%s10195_s9 + $0x71] sm:$0x7] }
 0x153   : >> { %8639 = vmatprep.mubr.msk.f32.mxu1 %vm9938_vm6, %v9939_v4  ;;  %8802 = vmatprep.mubr.msk.f32.mxu0 %vm9938_vm6, %v9939_v4 }
 0x156   : >> { %8640 = vmatmul.mubr.msk.f32.gmra.mrb[4].mxu1 %vm793_vm0, %v1273_v61  ;;  %8803 = vmatmul.mubr.msk.f32.vlgmr.msra.gmra.mrb[0].mxu0 %vm793_vm0, %v7877_v7  ;;  %v7807_v61 = vld [vmem:[%s10195_s9 + $0x2c] sm:$0x7]  ;;  %v7922_v7 = vld [vmem:[%s10195_s9 + $0x62] sm:$0xff] }
 0x157   : >> { %8646 = vmatprep.mubr.msk.f32.mxu1 %vm9938_vm6, %v9939_v4  ;;  %9418 = vmatpush3.bf16.msk.msra.mxu0 %vm10158_vm5, %v9416_v8  ;;  %v9436_v8 = vpack.c.bf16 %v7935_v50, %v7934_v40 }
 0x158   : >> { %8805 = vmatprep.mubr.msk.f32.mxu0 %vm9938_vm6, %v9939_v4  ;;  %9419 = vmatprep.subr.bf16.mxu0 %v9936_v2 }
 0x15a   : >> { %8647 = vmatmul.mubr.msk.f32.vlgmr.msra.gmra.mrb[0].mxu1 %vm793_vm0, %v7769_v11  ;;  %8806 = vmatmul.mubr.msk.f32.gmra.mrb[2].mxu0 %vm793_vm0, %v7878_v10  ;;  %v7814_v11 = vld [vmem:[%s10195_s9 + $0x30] sm:$0xff] }
 0x15b   : >> { %9370 = vmatpush3.bf16.msk.msra.mxu1 %vm10158_vm5, %v9368_v46  ;;  %8649 = vmatprep.mubr.msk.f32.mxu1 %vm9938_vm6, %v9939_v4  ;;  %v9388_v46 = vpack.c.bf16 %v7827_v45, %v7826_v9  ;;  %v7923_v10 = vld [vmem:[%s10195_s9 + $0x6a] sm:$0xff] }
 0x15c   : >> { %8808 = vmatprep.mubr.msk.f32.mxu0 %vm9938_vm6, %v9939_v4  ;;  %9371 = vmatprep.subr.bf16.mxu1 %v9936_v2 }
 0x15e   : >> { %8650 = vmatmul.mubr.msk.f32.gmra.mrb[2].mxu1 %vm793_vm0, %v7770_v12  ;;  %8809 = vmatmul.mubr.msk.f32.gmra.mrb[4].mxu0 %vm793_vm0, %v7879_v15  ;;  %v7815_v12 = vld [vmem:[%s10195_s9 + $0x38] sm:$0xff]  ;;  %v7924_v15 = vld [vmem:[%s10195_s9 + $0x72] sm:$0x7] }
 0x15f   : >> { %8652 = vmatprep.mubr.msk.f32.mxu1 %vm9938_vm6, %v9939_v4  ;;  %8815 = vmatprep.mubr.msk.f32.mxu0 %vm9938_vm6, %v9939_v4 }
 0x162   : >> { %8653 = vmatmul.mubr.msk.f32.gmra.mrb[4].mxu1 %vm793_vm0, %v7771_v18  ;;  %8816 = vmatmul.mubr.msk.f32.vlgmr.msra.gmra.mrb[0].mxu0 %vm793_vm0, %v7886_v19  ;;  %v7816_v18 = vld [vmem:[%s10195_s9 + $0x40] sm:$0x7]  ;;  %v7931_v19 = vld [vmem:[%s10195_s9 + $0x63] sm:$0xff] }
 0x163   : >> { %8659 = vmatprep.mubr.msk.f32.mxu1 %vm9938_vm6, %v9939_v4  ;;  %9422 = vmatpush3.bf16.msk.msra.mxu0 %vm10158_vm5, %v9420_v20  ;;  %v9440_v20 = vpack.c.bf16 %v7944_v17, %v7943_v16 }
 0x164   : >> { %8818 = vmatprep.mubr.msk.f32.mxu0 %vm9938_vm6, %v9939_v4  ;;  %9423 = vmatprep.subr.bf16.mxu0 %v9936_v2 }
 0x166   : >> { %8660 = vmatmul.mubr.msk.f32.vlgmr.msra.gmra.mrb[0].mxu1 %vm793_vm0, %v7778_v54  ;;  %8819 = vmatmul.mubr.msk.f32.gmra.mrb[2].mxu0 %vm793_vm0, %v7887_v23  ;;  %v7933_v54 = vld [vmem:[%s10195_s9 + $0x73] sm:$0x7] }
 0x167   : >> { %9374 = vmatpush3.bf16.msk.msra.mxu1 %vm10158_vm5, %v9372_v5  ;;  %8662 = vmatprep.mubr.msk.f32.mxu1 %vm9938_vm6, %v9939_v4  ;;  %v7833_v5 = vld [vmem:[%s10195_s9 + $0x3a] sm:$0xff]  ;;  %v7941_v23 = vld [vmem:[%s10195_s9 + $0x6c] sm:$0xff] }
 0x168   : >> { %8821 = vmatprep.mubr.msk.f32.mxu0 %vm9938_vm6, %v9939_v4  ;;  %9375 = vmatprep.subr.bf16.mxu1 %v9936_v2 }
 0x16a   : >> { %8663 = vmatmul.mubr.msk.f32.gmra.mrb[2].mxu1 %vm793_vm0, %v7779_v24  ;;  %8822 = vmatmul.mubr.msk.f32.gmra.mrb[4].mxu0 %vm793_vm0, %v7888_v25  ;;  %v7834_v24 = vld [vmem:[%s10195_s9 + $0x42] sm:$0x7]  ;;  %v7942_v25 = vld [vmem:[%s10195_s9 + $0x74] sm:$0x7] }
 0x16b   : >> { %8665 = vmatprep.mubr.msk.f32.mxu1 %vm9938_vm6, %v9939_v4  ;;  %8828 = vmatprep.mubr.msk.f32.mxu0 %vm9938_vm6, %v9939_v4 }
 0x16e   : >> { %8666 = vmatmul.mubr.msk.f32.gmra.mrb[4].mxu1 %vm793_vm0, %v7780_v13  ;;  %8829 = vmatmul.mubr.msk.f32.vlgmr.msra.gmra.mrb[0].mxu0 %vm793_vm0, %v7895_v14 }
 0x16f   : >> { %8672 = vmatprep.mubr.msk.f32.mxu1 %vm9938_vm6, %v9939_v4  ;;  %9426 = vmatpush3.bf16.msk.msra.mxu0 %vm10158_vm5, %v9424_v28 }
 0x170   : >> { %8831 = vmatprep.mubr.msk.f32.mxu0 %vm9938_vm6, %v9939_v4  ;;  %9427 = vmatprep.subr.bf16.mxu0 %v9936_v2 }
 0x172   : >> { %8673 = vmatmul.mubr.msk.f32.vlgmr.msra.gmra.mrb[0].mxu1 %vm793_vm0, %v7787_v31  ;;  %8832 = vmatmul.mubr.msk.f32.gmra.mrb[2].mxu0 %vm793_vm0, %v7896_v33 }
 0x173   : >> { %9378 = vmatpush3.bf16.msk.msra.mxu1 %vm10158_vm5, %v9376_v32  ;;  %8675 = vmatprep.mubr.msk.f32.mxu1 %vm9938_vm6, %v9939_v4 }
 0x174   : >> { %8834 = vmatprep.mubr.msk.f32.mxu0 %vm9938_vm6, %v9939_v4  ;;  %9379 = vmatprep.subr.bf16.mxu1 %v9936_v2 }
 0x176   : >> { %8676 = vmatmul.mubr.msk.f32.gmra.mrb[2].mxu1 %vm793_vm0, %v7788_v34  ;;  %8835 = vmatmul.mubr.msk.f32.gmra.mrb[4].mxu0 %vm793_vm0, %v7897_v35 }
 0x177   : >> { %8678 = vmatprep.mubr.msk.f32.mxu1 %vm9938_vm6, %v9939_v4  ;;  %8841 = vmatprep.mubr.msk.f32.mxu0 %vm9938_vm6, %v9939_v4 }
 0x17a   : >> { %8679 = vmatmul.mubr.msk.f32.gmra.mrb[4].mxu1 %vm793_vm0, %v7789_v37  ;;  %8842 = vmatmul.mubr.msk.f32.vlgmr.msra.gmra.mrb[0].mxu0 %vm793_vm0, %v7904_v22 }
 0x17b   : >> { %8685 = vmatprep.mubr.msk.f32.mxu1 %vm9938_vm6, %v9939_v4  ;;  %9430 = vmatpush3.bf16.msk.msra.mxu0 %vm10158_vm5, %v9428_v38 }
 0x17c   : >> { %8844 = vmatprep.mubr.msk.f32.mxu0 %vm9938_vm6, %v9939_v4  ;;  %9431 = vmatprep.subr.bf16.mxu0 %v9936_v2 }
 0x17e   : >> { %8686 = vmatmul.mubr.msk.f32.vlgmr.msra.gmra.mrb[0].mxu1 %vm793_vm0, %v7796_v51  ;;  %8845 = vmatmul.mubr.msk.f32.gmra.mrb[2].mxu0 %vm793_vm0, %v7905_v55 }
 0x17f   : >> { %9382 = vmatpush3.bf16.msk.msra.mxu1 %vm10158_vm5, %v9380_v52  ;;  %8688 = vmatprep.mubr.msk.f32.mxu1 %vm9938_vm6, %v9939_v4 }
 0x180   : >> { %8847 = vmatprep.mubr.msk.f32.mxu0 %vm9938_vm6, %v9939_v4  ;;  %9383 = vmatprep.subr.bf16.mxu1 %v9936_v2 }
 0x182   : >> { %8689 = vmatmul.mubr.msk.f32.gmra.mrb[2].mxu1 %vm793_vm0, %v7797_v56  ;;  %8848 = vmatmul.mubr.msk.f32.gmra.mrb[4].mxu0 %vm793_vm0, %v7906_v57 }
 0x183   : >> { %8691 = vmatprep.mubr.msk.f32.mxu1 %vm9938_vm6, %v9939_v4  ;;  %8854 = vmatprep.mubr.msk.f32.mxu0 %vm9938_vm6, %v9939_v4 }
 0x186   : >> { %8692 = vmatmul.mubr.msk.f32.gmra.mrb[4].mxu1 %vm793_vm0, %v7798_v44  ;;  %8855 = vmatmul.mubr.msk.f32.vlgmr.msra.gmra.mrb[0].mxu0 %vm793_vm0, %v7913_v47 }
 0x187   : >> { %8698 = vmatprep.mubr.msk.f32.mxu1 %vm9938_vm6, %v9939_v4  ;;  %9434 = vmatpush3.bf16.msk.msra.mxu0 %vm10158_vm5, %v9432_v48 }
 0x188   : >> { %8857 = vmatprep.mubr.msk.f32.mxu0 %vm9938_vm6, %v9939_v4  ;;  %9435 = vmatprep.subr.bf16.mxu0 %v9936_v2 }
 0x18a   : >> { %8699 = vmatmul.mubr.msk.f32.vlgmr.msra.gmra.mrb[0].mxu1 %vm793_vm0, %v7805_v0  ;;  %8858 = vmatmul.mubr.msk.f32.gmra.mrb[2].mxu0 %vm793_vm0, %v7914_v63 }
 0x18b   : >> { %9386 = vmatpush3.bf16.msk.msra.mxu1 %vm10158_vm5, %v9384_v62  ;;  %8701 = vmatprep.mubr.msk.f32.mxu1 %vm9938_vm6, %v9939_v4 }
 0x18c   : >> { %8860 = vmatprep.mubr.msk.f32.mxu0 %vm9938_vm6, %v9939_v4  ;;  %9387 = vmatprep.subr.bf16.mxu1 %v9936_v2 }
 0x18e   : >> { %8702 = vmatmul.mubr.msk.f32.gmra.mrb[2].mxu1 %vm793_vm0, %v7806_v1  ;;  %8861 = vmatmul.mubr.msk.f32.gmra.mrb[4].mxu0 %vm793_vm0, %v7915_v39 }
 0x18f   : >> { %8704 = vmatprep.mubr.msk.f32.mxu1 %vm9938_vm6, %v9939_v4  ;;  %8867 = vmatprep.mubr.msk.f32.mxu0 %vm9938_vm6, %v9939_v4 }
 0x192   : >> { %8705 = vmatmul.mubr.msk.f32.gmra.mrb[4].mxu1 %vm793_vm0, %v7807_v61  ;;  %8868 = vmatmul.mubr.msk.f32.vlgmr.msra.gmra.mrb[0].mxu0 %vm793_vm0, %v7922_v7 }
 0x193   : >> { %8711 = vmatprep.mubr.msk.f32.mxu1 %vm9938_vm6, %v9939_v4  ;;  %9438 = vmatpush3.bf16.msk.msra.mxu0 %vm10158_vm5, %v9436_v8 }
 0x194   : >> { %8870 = vmatprep.mubr.msk.f32.mxu0 %vm9938_vm6, %v9939_v4  ;;  %9439 = vmatprep.subr.bf16.mxu0 %v9936_v2 }
 0x196   : >> { %8712 = vmatmul.mubr.msk.f32.vlgmr.msra.gmra.mrb[0].mxu1 %vm793_vm0, %v7814_v11  ;;  %8871 = vmatmul.mubr.msk.f32.gmra.mrb[2].mxu0 %vm793_vm0, %v7923_v10 }
 0x197   : >> { %9390 = vmatpush3.bf16.msk.msra.mxu1 %vm10158_vm5, %v9388_v46  ;;  %8714 = vmatprep.mubr.msk.f32.mxu1 %vm9938_vm6, %v9939_v4 }
 0x198   : >> { %8873 = vmatprep.mubr.msk.f32.mxu0 %vm9938_vm6, %v9939_v4  ;;  %9590 = vmatprep.subr.bf16.mxu1 %v9936_v2  ;;  %v7823_v2 = vld [vmem:[%s10195_s9 + $0x31] sm:$0xff] }
 0x19a   : >> { %8715 = vmatmul.mubr.msk.f32.gmra.mrb[2].mxu1 %vm793_vm0, %v7815_v12  ;;  %8874 = vmatmul.mubr.msk.f32.gmra.mrb[4].mxu0 %vm793_vm0, %v7924_v15 }
 0x19b   : >> { %8717 = vmatprep.mubr.msk.f32.mxu1 %vm9938_vm6, %v9939_v4  ;;  %8880 = vmatprep.mubr.msk.f32.mxu0 %vm9938_vm6, %v9939_v4 }
 0x19e   : >> { %8718 = vmatmul.mubr.msk.f32.gmra.mrb[4].mxu1 %vm793_vm0, %v7816_v18  ;;  %8881 = vmatmul.mubr.msk.f32.vlgmr.msra.gmra.mrb[0].mxu0 %vm793_vm0, %v7931_v19 }
 0x19f   : >> { %8724 = vmatprep.mubr.msk.f32.mxu1 %vm9938_vm6, %v9939_v4  ;;  %9442 = vmatpush3.bf16.msk.msra.mxu0 %vm10158_vm5, %v9440_v20 }
 0x1a0   : >> { %8883 = vmatprep.mubr.msk.f32.mxu0 %vm9938_vm6, %v9939_v4 }
 0x1a2   : >> { %8725 = vmatmul.mubr.msk.f32.vlgmr.msra.gmra.mrb[0].mxu1 %vm793_vm0, %v7823_v2  ;;  %8884 = vmatmul.mubr.msk.f32.gmra.mrb[2].mxu0 %vm793_vm0, %v7932_v53 }
 0x1a3   : >> { %9591 = vmatpush3.bf16.msk.msra.mxu1 %vm10158_vm5, %v10168_v3  ;;  %8727 = vmatprep.mubr.msk.f32.mxu1 %vm9938_vm6, %v9939_v4  ;;  %v7940_v3 = vld [vmem:[%s10195_s9 + $0x64] sm:$0xff] }
 0x1a4   : >> { %8886 = vmatprep.mubr.msk.f32.mxu0 %vm9938_vm6, %v9939_v4 }
 0x1a6   : >> { %8728 = vmatmul.mubr.msk.f32.gmra.mrb[2].mxu1 %vm793_vm0, %v7824_v6  ;;  %8887 = vmatmul.mubr.msk.f32.gmra.mrb[4].mxu0 %vm793_vm0, %v7933_v54 }
 0x1a7   : >> { %8730 = vmatprep.mubr.msk.f32.mxu1 %vm9938_vm6, %v9939_v4  ;;  %8893 = vmatprep.mubr.msk.f32.mxu0 %vm9938_vm6, %v9939_v4 }
 0x1aa   : >> { %8731 = vmatmul.mubr.msk.f32.gmra.mrb[4].mxu1 %vm793_vm0, %v7825_v49  ;;  %8894 = vmatmul.mubr.msk.f32.vlgmr.msra.gmra.mrb[0].mxu0 %vm793_vm0, %v7940_v3 }
 0x1ab   : >> { %8740 = vmatprep.mubr.msk.f32.mxu1 %vm9938_vm6, %v9939_v4  ;;  %8896 = vmatprep.mubr.msk.f32.mxu0 %vm9938_vm6, %v9939_v4 }
 0x1ae   : >> { %8741 = vmatmul.mubr.msk.f32.vlgmr.msra.gmra.mrb[2].mxu1 %vm793_vm0, %v7833_v5  ;;  %8897 = vmatmul.mubr.msk.f32.gmra.mrb[2].mxu0 %vm793_vm0, %v7941_v23 }
 0x1af   : >> { %8743 = vmatprep.mubr.msk.f32.mxu1 %vm9938_vm6, %v9939_v4  ;;  %8899 = vmatprep.mubr.msk.f32.mxu0 %vm9938_vm6, %v9939_v4 }
 0x1b2   : >> { %8744 = vmatmul.mubr.msk.f32.gmra.mrb[4].mxu1 %vm793_vm0, %v7834_v24  ;;  %8900 = vmatmul.mubr.msk.f32.gmra.mrb[4].mxu0 %vm793_vm0, %v7942_v25 }
 0x275   : >> { %v2068_v26 = vpop.f32.mrb[0].mxu1 }
 0x276   : >> { %v8726_v27 = vpop.f32.mrb[1].mxu1 }
 0x27d   : >> { %v3387_v13 = vpop.f32.mrb[0].mxu0 }
 0x27e   : >> { %v9592_v14 = vadd.f32 %v3387_v13, %v2068_v26  ;;  %v8895_v28 = vpop.f32.mrb[1].mxu0 }
 0x280   : >> { %3406 = vst.msk [vmem:[%s3404_s18] sm:$0xff] %vm3405_vm7, %v9592_v14 }
 0x281   : >> { %v2174_v29 = vpop.f32.mrb[2].mxu1  ;;  %v3392_v30 = vpop.f32.mrb[2].mxu0 }
 0x282   : >> { %v8742_v31 = vpop.f32.mrb[3].mxu1  ;;  %v9593_v32 = vadd.f32 %v3392_v30, %v2174_v29  ;;  %v8898_v4 = vpop.f32.mrb[3].mxu0  ;;  %868 = sbr.rel (!%p866_p6) target bundleno = 279 (0x117), region = 258 }
 0x284   : >> { %3407 = vst.msk [vmem:[%s3404_s18 + $0x8] sm:$0xff] %vm3405_vm7, %v9593_v32 }
 0x285   : >> { %v2179_v33 = vpop.f32.mrb[4].mxu1  ;;  %v3397_v34 = vpop.f32.mrb[4].mxu0 }
 0x286   : >> { %v8745_v35 = vpop.f32.mrb[5].mxu1  ;;  %v9594_v36 = vadd.f32 %v3397_v34, %v2179_v33  ;;  %v8901_v21 = vpop.f32.mrb[5].mxu0 }
 0x288   : >> { %3409 = vst.msk [vmem:[%s3404_s18 + $0x10] sm:$0x7] %vm3408_vm8, %v9594_v36 }
 0x289 LB: >> { %s7950_s9 = smul.u32 48, %s9929_s8  ;;  %v7960_v44 = vld [vmem:[%s11527_s4] ss:$0 sm:$0xff]  ;;  %s7961_s21 = sshll.u32 %s9929_s8, 4  ;;  %vm3457_vm9 = vcmask 155648   ;;  %s9929_s8 = sphi %s10699_s8, %s3415_s8  }
 0x28a   : >> { %s3454_s22 = scalar_lea.vmem [#allocation5], %s7961_s21  ;;  %s3415_s8 = sadd.s32 1, %s9929_s8  }
 0x28b   : >> { %s3418_s10 = scalar_lea.vmem [#allocation4], %s7950_s9  ;;  %p3412_p7 = scmp.ge.s32.totalorder %s3415_s8, 9  }
 0x28c   : > { %s10714_s23 = smov (%p3412_p7), 0  }
 0x28f   : >> { %v3419_v37 = vld [vmem:[%s3418_s10] ss:$2 sm:$0xff]  ;;  %v7951_v22 = vld [vmem:[%s3418_s10 + $0x10] ss:$2 sm:$0x1] }
 0x290   : >> { %v7952_v38 = vld [vmem:[%s3418_s10 + $0x1] ss:$2 sm:$0xff]  ;;  %v7953_v41 = vld [vmem:[%s3418_s10 + $0x11] ss:$2 sm:$0x1] }
 0x291   : >> { %v7956_v42 = vld [vmem:[%s3418_s10 + $0x18] ss:$2 sm:$0xff]  ;;  %v7957_v51 = vld [vmem:[%s3418_s10 + $0x28] ss:$2 sm:$0x1]  ;;  %v3436_v52 = vmax.f32 %v3419_v37, %v7952_v38  ;;  %v3437_v55 = vmax.f32 %v7951_v22, %v7953_v41 }
 0x292   : >> { %v7958_v56 = vld [vmem:[%s3418_s10 + $0x19] ss:$2 sm:$0xff]  ;;  %v7959_v57 = vld [vmem:[%s3418_s10 + $0x29] ss:$2 sm:$0x1] }
 0x293   : >> { %v3438_v58 = vmax.f32 %v7956_v42, %v7958_v56  ;;  %v3439_v43 = vmax.f32 %v7957_v51, %v7959_v57 }
 0x295   : >> { %v3440_v47 = vmax.f32 %v3436_v52, %v3438_v58  ;;  %v3441_v48 = vmax.f32 %v3437_v55, %v3439_v43 }
 0x296   : > { %3414 = sbr.rel (!%p3412_p7) target bundleno = 649 (0x289), region = 269 }
 0x297   : >> { %v3449_v59 = vadd.f32 %v7960_v44, %v3440_v47  ;;  %v3450_v60 = vadd.f32 %v7960_v44, %v3441_v48 }
 0x299   : >> { %v3451_v0 = vmax.f32 %v3449_v59, 0.0  ;;  %v3452_v62 = vmax.f32 %v3450_v60, 0.0 }
 0x29b   : >> { %3456 = vst.msk [vmem:[%s3454_s22] sm:$0xff] %vm3405_vm7, %v3451_v0 }
 0x29c   : >> { %3458 = vst.msk [vmem:[%s3454_s22 + $0x8] sm:$0x1] %vm3457_vm9, %v3452_v62 }
 0x29d LB: >> { %v7963_v63 = vld [vmem:[%s11528_s5 + $0x18] sm:$0xff]  ;;  %v7964_v1 = vld [vmem:[%s11528_s5 + $0x20] sm:$0xff]  ;;  %v9940_v40 = vmov 0.0|0.0   ;;  %v8102_v61 = vld [vmem:[%s11528_s5 + $0x248] sm:$0xff]  ;;  %vm9941_vm10 = vmmov 0   ;;  %v9942_v8 = vmov 0.0   ;;  %s9933_s23 = sphi %s10714_s23, %s3464_s23  }
 0x29e   : >> { %v8101_v39 = vld [vmem:[%s11528_s5 + $0x240] sm:$0xff]  ;;  %9443 = vmatprep.subr.bf16.mxu1 %v9940_v40  ;;  %9515 = vmatprep.subr.bf16.mxu0 %v9940_v40  ;;  %v9444_v50 = vpack.c.bf16 %v7964_v1, %v7963_v63  ;;  %s7962_s15 = sshll.u32 %s9933_s23, 4  ;;  %v8107_v9 = vld [vmem:[%s11528_s5 + $0x258] sm:$0xff]  ;;  %v7965_v11 = vld [vmem:[%s11528_s5 + $0x28] sm:$0xf]  ;;  %s8253_s11 = sshll.u32 %s9933_s23, 2 }
 0x29f   : >> { %v9516_v7 = vpack.c.bf16 %v8102_v61, %v8101_v39  ;;  %8908 = vmatprep.mubr.msk.f32.mxu1 %vm9941_vm10, %v9942_v8  ;;  %9124 = vmatprep.mubr.msk.f32.mxu0 %vm9941_vm10, %v9942_v8  ;;  %v8108_v45 = vld [vmem:[%s11528_s5 + $0x260] sm:$0xff]  ;;  %v3469_v10 = vld [vmem:[%s11528_s5 + $0x8] sm:$0xff]  ;;  %v8103_v12 = vld [vmem:[%s11528_s5 + $0x250] sm:$0xf]  ;;  %s10758_s28 = scalar_lea.vmem [#allocation5], %s7962_s15  ;;  %s7503_s15 = scalar_lea.vmem [#allocation6], %s8253_s11 }
 0x2a0   : >> { %9445 = vmatpush3.bf16.msra.mxu1 %v9444_v50  ;;  %v3468_v46 = vld [vmem:[%s11528_s5] sm:$0xff]  ;;  %v9519_v17 = vpack.c.bf16 %v8108_v45, %v8107_v9  ;;  %v7970_v19 = vld [vmem:[%s11528_s5 + $0x30] sm:$0xff]  ;;  %v7971_v20 = vld [vmem:[%s11528_s5 + $0x38] sm:$0xff]  ;;  %s3464_s23 = sadd.s32 1, %s9933_s23  }
 0x2a1   : >> { %9517 = vmatpush3.bf16.msra.mxu0 %v9516_v7  ;;  %8906 = vmatprep.subr.mxu1 %v9942_v8  ;;  %v9447_v18 = vpack.c.bf16 %v3469_v10, %v3468_v46  ;;  %v8109_v2 = vld [vmem:[%s11528_s5 + $0x268] sm:$0xf]  ;;  %v8113_v53 = vld [vmem:[%s11528_s5 + $0x270] sm:$0xff]  ;;  %v8114_v6 = vld [vmem:[%s11528_s5 + $0x278] sm:$0xff]  ;;  %v9450_v3 = vpack.c.bf16 %v7971_v20, %v7970_v19  ;;  %p3461_p8 = scmp.ge.s32.totalorder %s3464_s23, 3  }
 0x2a2   : >> { %9122 = vmatprep.subr.mxu0 %v9942_v8  ;;  %v3470_v54 = vld [vmem:[%s11528_s5 + $0x10] sm:$0xf]  ;;  %v9522_v23 = vpack.c.bf16 %v8114_v6, %v8113_v53  ;;  %v7972_v24 = vld [vmem:[%s11528_s5 + $0x40] sm:$0xf]  ;;  %v7975_v25 = vld [vmem:[%s11528_s5 + $0x48] sm:$0xff] }
 0x2a3   : >> { %v3471_v15 = vld [vmem:[%s10758_s28 + $0x1] sm:$0x7]  ;;  %v8100_v16 = vld [vmem:[%s10758_s28 + $0x33] sm:$0x7]  ;;  %v8119_v13 = vld [vmem:[%s11528_s5 + $0x288] sm:$0xff] }
 0x2a4   : >> { %8907 = vmatpush3.msk.msra.mxu1 %vm893_vm3, %v7965_v11  ;;  %v3467_v49 = vld [vmem:[%s10758_s28] sm:$0x7]  ;;  %v8106_v5 = vld [vmem:[%s10758_s28 + $0x34] sm:$0x7]  ;;  %v7977_v32 = vld [vmem:[%s11528_s5 + $0x58] sm:$0xf] }
 0x2a5   : >> { %9123 = vmatpush3.msk.msra.mxu0 %vm893_vm3, %v8103_v12  ;;  %8909 = vmatmul.mubr.msk.f32.vlgmr.msra.gmra.mrb[0].mxu1 %vm3405_vm7, %v3471_v15  ;;  %v7976_v26 = vld [vmem:[%s11528_s5 + $0x50] sm:$0xff]  ;;  %v8115_v27 = vld [vmem:[%s11528_s5 + $0x280] sm:$0xf]  ;;  %v7981_v33 = vld [vmem:[%s11528_s5 + $0x68] sm:$0xff] }
 0x2a6   : >> { %9125 = vmatmul.mubr.msk.f32.vlgmr.msra.gmra.mrb[0].mxu0 %vm3405_vm7, %v8100_v16  ;;  %9518 = vmatprep.subr.bf16.mxu0 %v9940_v40  ;;  %v8120_v14 = vld [vmem:[%s11528_s5 + $0x290] sm:$0xff]  ;;  %v3630_v28 = vld [vmem:[%s10758_s28 + $0x2] sm:$0x7]  ;;  %v9453_v29 = vpack.c.bf16 %v7976_v26, %v7975_v25  ;;  %v8121_v34 = vld [vmem:[%s11528_s5 + $0x298] sm:$0xf] }
 0x2a7   : >> { %9520 = vmatpush3.bf16.msra.mxu0 %v9519_v17  ;;  %9446 = vmatprep.subr.bf16.mxu1 %v9940_v40  ;;  %v8112_v30 = vld [vmem:[%s10758_s28 + $0x35] sm:$0x7]  ;;  %v9525_v31 = vpack.c.bf16 %v8120_v14, %v8119_v13  ;;  %v7980_v4 = vld [vmem:[%s11528_s5 + $0x60] sm:$0xff]  ;;  %v8127_v36 = vld [vmem:[%s11528_s5 + $0x2a8] sm:$0xff] }
 0x2a8   : >> { %9448 = vmatpush3.bf16.msra.mxu1 %v9447_v18  ;;  %9131 = vmatprep.subr.mxu0 %v9942_v8  ;;  %v8126_v35 = vld [vmem:[%s11528_s5 + $0x2a0] sm:$0xff]  ;;  %v9456_v37 = vpack.c.bf16 %v7981_v33, %v7980_v4  ;;  %v8118_v22 = vld [vmem:[%s10758_s28 + $0x36] sm:$0x7]  ;;  %v7982_v41 = vld [vmem:[%s11528_s5 + $0x70] sm:$0xf] }
 0x2a9   : >> { %8915 = vmatprep.subr.mxu1 %v9942_v8  ;;  %8917 = vmatprep.mubr.msk.f32.mxu1 %vm9941_vm10, %v9942_v8  ;;  %v3712_v21 = vld [vmem:[%s10758_s28 + $0x3] sm:$0x7]  ;;  %v9528_v38 = vpack.c.bf16 %v8127_v36, %v8126_v35  ;;  %v7985_v42 = vld [vmem:[%s11528_s5 + $0x78] sm:$0xff]  ;;  %v8128_v52 = vld [vmem:[%s11528_s5 + $0x2b0] sm:$0xf] }
 0x2aa   : >> { %9133 = vmatprep.mubr.msk.f32.mxu0 %vm9941_vm10, %v9942_v8  ;;  %v7986_v51 = vld [vmem:[%s11528_s5 + $0x80] sm:$0xff]  ;;  %v8132_v55 = vld [vmem:[%s11528_s5 + $0x2b8] sm:$0xff]  ;;  %v7987_v47 = vld [vmem:[%s11528_s5 + $0x88] sm:$0xf] }
 0x2ab   : >> { %9132 = vmatpush3.msk.msra.mxu0 %vm893_vm3, %v8109_v2  ;;  %v8133_v56 = vld [vmem:[%s11528_s5 + $0x2c0] sm:$0xff]  ;;  %v9459_v58 = vpack.c.bf16 %v7986_v51, %v7985_v42  ;;  %v7990_v48 = vld [vmem:[%s11528_s5 + $0x90] sm:$0xff]  ;;  %v7991_v59 = vld [vmem:[%s11528_s5 + $0x98] sm:$0xff] }
 0x2ac   : >> { %8916 = vmatpush3.msk.msra.mxu1 %vm893_vm3, %v3470_v54  ;;  %9521 = vmatprep.subr.bf16.mxu0 %v9940_v40  ;;  %v3794_v57 = vld [vmem:[%s10758_s28 + $0x4] sm:$0x7]  ;;  %v8125_v43 = vld [vmem:[%s10758_s28 + $0x40] sm:$0x7]  ;;  %v9531_v44 = vpack.c.bf16 %v8133_v56, %v8132_v55  ;;  %v8134_v60 = vld [vmem:[%s11528_s5 + $0x2c8] sm:$0xf]  ;;  %v9462_v1 = vpack.c.bf16 %v7991_v59, %v7990_v48 }
 0x2ad   : >> { %8918 = vmatmul.mubr.msk.f32.vlgmr.msra.gmra.mrb[0].mxu1 %vm3405_vm7, %v3467_v49  ;;  %9449 = vmatprep.subr.bf16.mxu1 %v9940_v40  ;;  %v8138_v0 = vld [vmem:[%s11528_s5 + $0x2d0] sm:$0xff]  ;;  %v8139_v62 = vld [vmem:[%s11528_s5 + $0x2d8] sm:$0xff]  ;;  %v3876_v63 = vld [vmem:[%s10758_s28 + $0x5] sm:$0x7] }
 0x2ae   : >> { %9134 = vmatmul.mubr.msk.f32.vlgmr.msra.gmra.mrb[0].mxu0 %vm3405_vm7, %v8106_v5  ;;  %9451 = vmatpush3.bf16.msra.mxu1 %v9450_v3  ;;  %v8131_v39 = vld [vmem:[%s10758_s28 + $0x41] sm:$0x7]  ;;  %v9534_v50 = vpack.c.bf16 %v8139_v62, %v8138_v0  ;;  %v7997_v7 = vld [vmem:[%s11528_s5 + $0xa8] sm:$0xff]  ;;  %v7998_v9 = vld [vmem:[%s11528_s5 + $0xb0] sm:$0xff] }
 0x2af   : >> { %9523 = vmatpush3.bf16.msra.mxu0 %v9522_v23  ;;  %8924 = vmatprep.subr.mxu1 %v9942_v8  ;;  %v7992_v61 = vld [vmem:[%s11528_s5 + $0xa0] sm:$0xf]  ;;  %v8144_v11 = vld [vmem:[%s11528_s5 + $0x2e8] sm:$0xff]  ;;  %v8145_v46 = vld [vmem:[%s11528_s5 + $0x2f0] sm:$0xff]  ;;  %v9465_v12 = vpack.c.bf16 %v7998_v9, %v7997_v7 }
 0x2b0   : >> { %9140 = vmatprep.subr.mxu0 %v9942_v8  ;;  %8926 = vmatprep.mubr.msk.f32.mxu1 %vm9941_vm10, %v9942_v8  ;;  %v8140_v45 = vld [vmem:[%s11528_s5 + $0x2e0] sm:$0xf]  ;;  %v3958_v10 = vld [vmem:[%s10758_s28 + $0x6] sm:$0x7]  ;;  %v9537_v16 = vpack.c.bf16 %v8145_v46, %v8144_v11  ;;  %v7999_v17 = vld [vmem:[%s11528_s5 + $0xb8] sm:$0xf] }
 0x2b1   : >> { %9142 = vmatprep.mubr.msk.f32.mxu0 %vm9941_vm10, %v9942_v8  ;;  %v8137_v15 = vld [vmem:[%s10758_s28 + $0x42] sm:$0x7]  ;;  %v8004_v19 = vld [vmem:[%s11528_s5 + $0xc8] sm:$0xff]  ;;  %v8146_v20 = vld [vmem:[%s11528_s5 + $0x2f8] sm:$0xf] }
 0x2b2   : >> { %8925 = vmatpush3.msk.msra.mxu1 %vm893_vm3, %v7972_v24  ;;  %v8003_v18 = vld [vmem:[%s11528_s5 + $0xc0] sm:$0xff]  ;;  %v8151_v53 = vld [vmem:[%s11528_s5 + $0x308] sm:$0xff]  ;;  %v7996_v6 = vld [vmem:[%s10758_s28 + $0x10] sm:$0x7] }
 0x2b3   : >> { %9141 = vmatpush3.msk.msra.mxu0 %vm893_vm3, %v8115_v27  ;;  %9452 = vmatprep.subr.bf16.mxu1 %v9940_v40  ;;  %v8150_v2 = vld [vmem:[%s11528_s5 + $0x300] sm:$0xff]  ;;  %v9468_v54 = vpack.c.bf16 %v8004_v19, %v8003_v18  ;;  %v8005_v5 = vld [vmem:[%s11528_s5 + $0xd0] sm:$0xf]  ;;  %v8009_v23 = vld [vmem:[%s11528_s5 + $0xd8] sm:$0xff] }
 0x2b4   : >> { %9524 = vmatprep.subr.bf16.mxu0 %v9940_v40  ;;  %v8143_v49 = vld [vmem:[%s10758_s28 + $0x43] sm:$0x7]  ;;  %v9540_v3 = vpack.c.bf16 %v8151_v53, %v8150_v2  ;;  %v8152_v25 = vld [vmem:[%s11528_s5 + $0x310] sm:$0xf]  ;;  %v8156_v26 = vld [vmem:[%s11528_s5 + $0x318] sm:$0xff] }
 0x2b5   : >> { %8927 = vmatmul.mubr.msk.f32.vlgmr.msra.gmra.mrb[0].mxu1 %vm3405_vm7, %v3630_v28  ;;  %v8010_v24 = vld [vmem:[%s11528_s5 + $0xe0] sm:$0xff]  ;;  %v8002_v13 = vld [vmem:[%s10758_s28 + $0x11] sm:$0x7]  ;;  %v8158_v4 = vld [vmem:[%s11528_s5 + $0x328] sm:$0xf] }
 0x2b6   : >> { %9143 = vmatmul.mubr.msk.f32.vlgmr.msra.gmra.mrb[0].mxu0 %vm3405_vm7, %v8112_v30  ;;  %9454 = vmatpush3.bf16.msra.mxu1 %v9453_v29  ;;  %v8157_v27 = vld [vmem:[%s11528_s5 + $0x320] sm:$0xff]  ;;  %v9471_v14 = vpack.c.bf16 %v8010_v24, %v8009_v23  ;;  %v8011_v30 = vld [vmem:[%s11528_s5 + $0xe8] sm:$0xf]  ;;  %v8162_v33 = vld [vmem:[%s11528_s5 + $0x330] sm:$0xff] }
 0x2b7   : >> { %9526 = vmatpush3.bf16.msra.mxu0 %v9525_v31  ;;  %8933 = vmatprep.subr.mxu1 %v9942_v8  ;;  %v8149_v28 = vld [vmem:[%s10758_s28 + $0x44] sm:$0x7]  ;;  %v9543_v29 = vpack.c.bf16 %v8157_v27, %v8156_v26  ;;  %v8015_v31 = vld [vmem:[%s11528_s5 + $0xf0] sm:$0xff]  ;;  %v8164_v42 = vld [vmem:[%s11528_s5 + $0x340] sm:$0xf] }
 0x2b8   : >> { %9149 = vmatprep.subr.mxu0 %v9942_v8  ;;  %8935 = vmatprep.mubr.msk.f32.mxu1 %vm9941_vm10, %v9942_v8  ;;  %v8008_v35 = vld [vmem:[%s10758_s28 + $0x12] sm:$0x7]  ;;  %v8169_v51 = vld [vmem:[%s11528_s5 + $0x348] sm:$0xff]  ;;  %v8171_v48 = vld [vmem:[%s11528_s5 + $0x358] sm:$0xf] }
 0x2b9   : >> { %9151 = vmatprep.mubr.msk.f32.mxu0 %vm9941_vm10, %v9942_v8  ;;  %v8014_v55 = vld [vmem:[%s10758_s28 + $0x13] sm:$0x7]  ;;  %v8175_v59 = vld [vmem:[%s11528_s5 + $0x360] sm:$0xff]  ;;  %v8181_v9 = vld [vmem:[%s11528_s5 + $0x378] sm:$0xff] }
 0x2ba   : >> { %8934 = vmatpush3.msk.msra.mxu1 %vm893_vm3, %v7977_v32  ;;  %v8016_v32 = vld [vmem:[%s11528_s5 + $0xf8] sm:$0xff]  ;;  %v8020_v0 = vld [vmem:[%s10758_s28 + $0x14] sm:$0x7]  ;;  %v8177_v7 = vld [vmem:[%s11528_s5 + $0x370] sm:$0xf] }
 0x2bb   : >> { %9150 = vmatpush3.msk.msra.mxu0 %vm893_vm3, %v8121_v34  ;;  %9455 = vmatprep.subr.bf16.mxu1 %v9940_v40  ;;  %v8163_v34 = vld [vmem:[%s11528_s5 + $0x338] sm:$0xff]  ;;  %v9474_v36 = vpack.c.bf16 %v8016_v32, %v8015_v31  ;;  %v8026_v11 = vld [vmem:[%s10758_s28 + $0x15] sm:$0x7]  ;;  %v8183_v18 = vld [vmem:[%s11528_s5 + $0x388] sm:$0xf] }
 0x2bc   : >> { %9527 = vmatprep.subr.bf16.mxu0 %v9940_v40  ;;  %v8187_v19 = vld [vmem:[%s11528_s5 + $0x390] sm:$0xff]  ;;  %v8189_v23 = vld [vmem:[%s11528_s5 + $0x3a0] sm:$0xf]  ;;  %v8193_v24 = vld [vmem:[%s11528_s5 + $0x3a8] sm:$0xff] }
 0x2bd   : >> { %8936 = vmatmul.mubr.msk.f32.vlgmr.msra.gmra.mrb[0].mxu1 %vm3405_vm7, %v3712_v21  ;;  %v8155_v21 = vld [vmem:[%s10758_s28 + $0x45] sm:$0x7]  ;;  %v8032_v2 = vld [vmem:[%s10758_s28 + $0x16] sm:$0x7]  ;;  %v8039_v26 = vld [vmem:[%s10758_s28 + $0x20] sm:$0x7] }
 0x2be   : >> { %9152 = vmatmul.mubr.msk.f32.vlgmr.msra.gmra.mrb[0].mxu0 %vm3405_vm7, %v8118_v22  ;;  %9457 = vmatpush3.bf16.msra.mxu1 %v9456_v37  ;;  %v9546_v37 = vpack.c.bf16 %v8163_v34, %v8162_v33  ;;  %v8017_v22 = vld [vmem:[%s11528_s5 + $0x100] sm:$0xf]  ;;  %v8195_v31 = vld [vmem:[%s11528_s5 + $0x3b8] sm:$0xf] }
 0x2bf   : >> { %9529 = vmatpush3.bf16.msra.mxu0 %v9528_v38  ;;  %8942 = vmatprep.subr.mxu1 %v9942_v8  ;;  %v8021_v38 = vld [vmem:[%s11528_s5 + $0x108] sm:$0xff]  ;;  %v8199_v32 = vld [vmem:[%s11528_s5 + $0x3c0] sm:$0xff] }
 0x2c0   : >> { %9158 = vmatprep.subr.mxu0 %v9942_v8  ;;  %8944 = vmatprep.mubr.msk.f32.mxu1 %vm9941_vm10, %v9942_v8  ;;  %v8045_v33 = vld [vmem:[%s10758_s28 + $0x21] sm:$0x7] }
 0x2c1   : >> { %9160 = vmatprep.mubr.msk.f32.mxu0 %vm9941_vm10, %v9942_v8 }
 0x2c2   : >> { %8943 = vmatpush3.msk.msra.mxu1 %vm893_vm3, %v7982_v41  ;;  %v8022_v41 = vld [vmem:[%s11528_s5 + $0x110] sm:$0xff] }
 0x2c3   : >> { %9159 = vmatpush3.msk.msra.mxu0 %vm893_vm3, %v8128_v52  ;;  %9458 = vmatprep.subr.bf16.mxu1 %v9940_v40  ;;  %v8170_v52 = vld [vmem:[%s11528_s5 + $0x350] sm:$0xff]  ;;  %v9477_v56 = vpack.c.bf16 %v8022_v41, %v8021_v38  ;;  %v8205_v41 = vld [vmem:[%s11528_s5 + $0x3d8] sm:$0xff] }
 0x2c4   : >> { %9530 = vmatprep.subr.bf16.mxu0 %v9940_v40  ;;  %v8201_v38 = vld [vmem:[%s11528_s5 + $0x3d0] sm:$0xf] }
 0x2c5   : >> { %8945 = vmatmul.mubr.msk.f32.vlgmr.msra.gmra.mrb[0].mxu1 %vm3405_vm7, %v3794_v57  ;;  %v8161_v57 = vld [vmem:[%s10758_s28 + $0x46] sm:$0x7] }
 0x2c6   : >> { %9161 = vmatmul.mubr.msk.f32.vlgmr.msra.gmra.mrb[0].mxu0 %vm3405_vm7, %v8125_v43  ;;  %9460 = vmatpush3.bf16.msra.mxu1 %v9459_v58  ;;  %v9549_v58 = vpack.c.bf16 %v8170_v52, %v8169_v51  ;;  %v8023_v43 = vld [vmem:[%s11528_s5 + $0x118] sm:$0xf]  ;;  %v8051_v51 = vld [vmem:[%s10758_s28 + $0x22] sm:$0x7] }
 0x2c7   : >> { %9532 = vmatpush3.bf16.msra.mxu0 %v9531_v44  ;;  %8951 = vmatprep.subr.mxu1 %v9942_v8  ;;  %v8027_v44 = vld [vmem:[%s11528_s5 + $0x120] sm:$0xff] }
 0x2c8   : >> { %9167 = vmatprep.subr.mxu0 %v9942_v8  ;;  %8953 = vmatprep.mubr.msk.f32.mxu1 %vm9941_vm10, %v9942_v8 }
 0x2c9   : >> { %9169 = vmatprep.mubr.msk.f32.mxu0 %vm9941_vm10, %v9942_v8 }
 0x2ca   : >> { %8952 = vmatpush3.msk.msra.mxu1 %vm893_vm3, %v7987_v47  ;;  %v8028_v47 = vld [vmem:[%s11528_s5 + $0x128] sm:$0xff] }
 0x2cb   : >> { %9168 = vmatpush3.msk.msra.mxu0 %vm893_vm3, %v8134_v60  ;;  %9461 = vmatprep.subr.bf16.mxu1 %v9940_v40  ;;  %v8176_v60 = vld [vmem:[%s11528_s5 + $0x368] sm:$0xff]  ;;  %v9480_v62 = vpack.c.bf16 %v8028_v47, %v8027_v44  ;;  %v8212_v47 = vld [vmem:[%s11528_s5 + $0x3f0] sm:$0xff] }
 0x2cc   : >> { %9533 = vmatprep.subr.bf16.mxu0 %v9940_v40  ;;  %v8207_v44 = vld [vmem:[%s11528_s5 + $0x3e8] sm:$0xf] }
 0x2cd   : >> { %8954 = vmatmul.mubr.msk.f32.vlgmr.msra.gmra.mrb[0].mxu1 %vm3405_vm7, %v3876_v63  ;;  %v8168_v63 = vld [vmem:[%s10758_s28 + $0x50] sm:$0x7] }
 0x2ce   : >> { %9170 = vmatmul.mubr.msk.f32.vlgmr.msra.gmra.mrb[0].mxu0 %vm3405_vm7, %v8131_v39  ;;  %9463 = vmatpush3.bf16.msra.mxu1 %v9462_v1  ;;  %v9552_v1 = vpack.c.bf16 %v8176_v60, %v8175_v59  ;;  %v8029_v39 = vld [vmem:[%s11528_s5 + $0x130] sm:$0xf]  ;;  %v8057_v59 = vld [vmem:[%s10758_s28 + $0x23] sm:$0x7] }
 0x2cf   : >> { %9535 = vmatpush3.bf16.msra.mxu0 %v9534_v50  ;;  %8960 = vmatprep.subr.mxu1 %v9942_v8  ;;  %v8033_v50 = vld [vmem:[%s11528_s5 + $0x138] sm:$0xff] }
 0x2d0   : >> { %9176 = vmatprep.subr.mxu0 %v9942_v8  ;;  %8962 = vmatprep.mubr.msk.f32.mxu1 %vm9941_vm10, %v9942_v8 }
 0x2d1   : >> { %9178 = vmatprep.mubr.msk.f32.mxu0 %vm9941_vm10, %v9942_v8 }
 0x2d2   : >> { %8961 = vmatpush3.msk.msra.mxu1 %vm893_vm3, %v7992_v61  ;;  %v8034_v61 = vld [vmem:[%s11528_s5 + $0x140] sm:$0xff] }
 0x2d3   : >> { %9177 = vmatpush3.msk.msra.mxu0 %vm893_vm3, %v8140_v45  ;;  %9464 = vmatprep.subr.bf16.mxu1 %v9940_v40  ;;  %v8182_v45 = vld [vmem:[%s11528_s5 + $0x380] sm:$0xff]  ;;  %v9483_v46 = vpack.c.bf16 %v8034_v61, %v8033_v50  ;;  %v8218_v61 = vld [vmem:[%s11528_s5 + $0x408] sm:$0xff] }
 0x2d4   : >> { %9536 = vmatprep.subr.bf16.mxu0 %v9940_v40  ;;  %v8214_v50 = vld [vmem:[%s11528_s5 + $0x400] sm:$0xf] }
 0x2d5   : >> { %8963 = vmatmul.mubr.msk.f32.vlgmr.msra.gmra.mrb[0].mxu1 %vm3405_vm7, %v3958_v10  ;;  %v8174_v10 = vld [vmem:[%s10758_s28 + $0x51] sm:$0x7] }
 0x2d6   : >> { %9179 = vmatmul.mubr.msk.f32.vlgmr.msra.gmra.mrb[0].mxu0 %vm3405_vm7, %v8137_v15  ;;  %9466 = vmatpush3.bf16.msra.mxu1 %v9465_v12  ;;  %v9555_v12 = vpack.c.bf16 %v8182_v45, %v8181_v9  ;;  %v8035_v15 = vld [vmem:[%s11528_s5 + $0x148] sm:$0xf]  ;;  %v8063_v9 = vld [vmem:[%s10758_s28 + $0x24] sm:$0x7] }
 0x2d7   : >> { %9538 = vmatpush3.bf16.msra.mxu0 %v9537_v16  ;;  %8969 = vmatprep.subr.mxu1 %v9942_v8  ;;  %v8040_v16 = vld [vmem:[%s11528_s5 + $0x150] sm:$0xff] }
 0x2d8   : >> { %9185 = vmatprep.subr.mxu0 %v9942_v8  ;;  %8971 = vmatprep.mubr.msk.f32.mxu1 %vm9941_vm10, %v9942_v8 }
 0x2d9   : >> { %9187 = vmatprep.mubr.msk.f32.mxu0 %vm9941_vm10, %v9942_v8 }
 0x2da   : >> { %8970 = vmatpush3.msk.msra.mxu1 %vm893_vm3, %v7999_v17  ;;  %v8041_v17 = vld [vmem:[%s11528_s5 + $0x158] sm:$0xff] }
 0x2db   : >> { %9186 = vmatpush3.msk.msra.mxu0 %vm893_vm3, %v8146_v20  ;;  %9467 = vmatprep.subr.bf16.mxu1 %v9940_v40  ;;  %v8188_v20 = vld [vmem:[%s11528_s5 + $0x398] sm:$0xff]  ;;  %v9486_v53 = vpack.c.bf16 %v8041_v17, %v8040_v16  ;;  %v8224_v17 = vld [vmem:[%s11528_s5 + $0x420] sm:$0xff] }
 0x2dc   : >> { %9539 = vmatprep.subr.bf16.mxu0 %v9940_v40  ;;  %v8220_v16 = vld [vmem:[%s11528_s5 + $0x418] sm:$0xf] }
 0x2dd   : >> { %8972 = vmatmul.mubr.msk.f32.vlgmr.msra.gmra.mrb[0].mxu1 %vm3405_vm7, %v7996_v6  ;;  %v8180_v6 = vld [vmem:[%s10758_s28 + $0x52] sm:$0x7] }
 0x2de   : >> { %9188 = vmatmul.mubr.msk.f32.vlgmr.msra.gmra.mrb[0].mxu0 %vm3405_vm7, %v8143_v49  ;;  %9469 = vmatpush3.bf16.msra.mxu1 %v9468_v54  ;;  %v9558_v54 = vpack.c.bf16 %v8188_v20, %v8187_v19  ;;  %v8042_v49 = vld [vmem:[%s11528_s5 + $0x160] sm:$0xf]  ;;  %v8069_v19 = vld [vmem:[%s10758_s28 + $0x25] sm:$0x7] }
 0x2df   : >> { %9541 = vmatpush3.bf16.msra.mxu0 %v9540_v3  ;;  %8978 = vmatprep.subr.mxu1 %v9942_v8  ;;  %v8046_v3 = vld [vmem:[%s11528_s5 + $0x168] sm:$0xff] }
 0x2e0   : >> { %9194 = vmatprep.subr.mxu0 %v9942_v8  ;;  %8980 = vmatprep.mubr.msk.f32.mxu1 %vm9941_vm10, %v9942_v8 }
 0x2e1   : >> { %9196 = vmatprep.mubr.msk.f32.mxu0 %vm9941_vm10, %v9942_v8 }
 0x2e2   : >> { %8979 = vmatpush3.msk.msra.mxu1 %vm893_vm3, %v8005_v5  ;;  %v8047_v5 = vld [vmem:[%s11528_s5 + $0x170] sm:$0xff] }
 0x2e3   : >> { %9195 = vmatpush3.msk.msra.mxu0 %vm893_vm3, %v8152_v25  ;;  %9470 = vmatprep.subr.bf16.mxu1 %v9940_v40  ;;  %v8194_v25 = vld [vmem:[%s11528_s5 + $0x3b0] sm:$0xff]  ;;  %v9489_v27 = vpack.c.bf16 %v8047_v5, %v8046_v3  ;;  %v8230_v5 = vld [vmem:[%s11528_s5 + $0x438] sm:$0xff] }
 0x2e4   : >> { %9542 = vmatprep.subr.bf16.mxu0 %v9940_v40  ;;  %v8226_v3 = vld [vmem:[%s11528_s5 + $0x430] sm:$0xf] }
 0x2e5   : >> { %8981 = vmatmul.mubr.msk.f32.vlgmr.msra.gmra.mrb[0].mxu1 %vm3405_vm7, %v8002_v13  ;;  %v8186_v13 = vld [vmem:[%s10758_s28 + $0x53] sm:$0x7] }
 0x2e6   : >> { %9197 = vmatmul.mubr.msk.f32.vlgmr.msra.gmra.mrb[0].mxu0 %vm3405_vm7, %v8149_v28  ;;  %9472 = vmatpush3.bf16.msra.mxu1 %v9471_v14  ;;  %v9561_v14 = vpack.c.bf16 %v8194_v25, %v8193_v24  ;;  %v8048_v28 = vld [vmem:[%s11528_s5 + $0x178] sm:$0xf]  ;;  %v8075_v24 = vld [vmem:[%s10758_s28 + $0x26] sm:$0x7] }
 0x2e7   : >> { %9544 = vmatpush3.bf16.msra.mxu0 %v9543_v29  ;;  %8987 = vmatprep.subr.mxu1 %v9942_v8  ;;  %v8052_v29 = vld [vmem:[%s11528_s5 + $0x180] sm:$0xff] }
 0x2e8   : >> { %9203 = vmatprep.subr.mxu0 %v9942_v8  ;;  %8989 = vmatprep.mubr.msk.f32.mxu1 %vm9941_vm10, %v9942_v8 }
 0x2e9   : >> { %9205 = vmatprep.mubr.msk.f32.mxu0 %vm9941_vm10, %v9942_v8 }
 0x2ea   : >> { %8988 = vmatpush3.msk.msra.mxu1 %vm893_vm3, %v8011_v30  ;;  %v8053_v30 = vld [vmem:[%s11528_s5 + $0x188] sm:$0xff] }
 0x2eb   : >> { %9204 = vmatpush3.msk.msra.mxu0 %vm893_vm3, %v8158_v4  ;;  %9473 = vmatprep.subr.bf16.mxu1 %v9940_v40  ;;  %v8200_v4 = vld [vmem:[%s11528_s5 + $0x3c8] sm:$0xff]  ;;  %v9492_v34 = vpack.c.bf16 %v8053_v30, %v8052_v29  ;;  %v8236_v30 = vld [vmem:[%s11528_s5 + $0x450] sm:$0xff] }
 0x2ec   : >> { %9545 = vmatprep.subr.bf16.mxu0 %v9940_v40  ;;  %v8232_v29 = vld [vmem:[%s11528_s5 + $0x448] sm:$0xf] }
 0x2ed   : >> { %8990 = vmatmul.mubr.msk.f32.vlgmr.msra.gmra.mrb[0].mxu1 %vm3405_vm7, %v8008_v35  ;;  %v8192_v35 = vld [vmem:[%s10758_s28 + $0x54] sm:$0x7] }
 0x2ee   : >> { %9206 = vmatmul.mubr.msk.f32.vlgmr.msra.gmra.mrb[0].mxu0 %vm3405_vm7, %v8155_v21  ;;  %9475 = vmatpush3.bf16.msra.mxu1 %v9474_v36  ;;  %v9564_v36 = vpack.c.bf16 %v8200_v4, %v8199_v32  ;;  %v8054_v21 = vld [vmem:[%s11528_s5 + $0x190] sm:$0xf] }
 0x2ef   : >> { %9547 = vmatpush3.bf16.msra.mxu0 %v9546_v37  ;;  %8996 = vmatprep.subr.mxu1 %v9942_v8  ;;  %v8058_v37 = vld [vmem:[%s11528_s5 + $0x198] sm:$0xff]  ;;  %v8082_v32 = vld [vmem:[%s10758_s28 + $0x30] sm:$0x7] }
 0x2f0   : >> { %9212 = vmatprep.subr.mxu0 %v9942_v8  ;;  %8998 = vmatprep.mubr.msk.f32.mxu1 %vm9941_vm10, %v9942_v8 }
 0x2f1   : >> { %9214 = vmatprep.mubr.msk.f32.mxu0 %vm9941_vm10, %v9942_v8 }
 0x2f2   : >> { %8997 = vmatpush3.msk.msra.mxu1 %vm893_vm3, %v8017_v22  ;;  %v8059_v22 = vld [vmem:[%s11528_s5 + $0x1a0] sm:$0xff] }
 0x2f3   : >> { %9213 = vmatpush3.msk.msra.mxu0 %vm893_vm3, %v8164_v42  ;;  %9476 = vmatprep.subr.bf16.mxu1 %v9940_v40  ;;  %v8206_v42 = vld [vmem:[%s11528_s5 + $0x3e0] sm:$0xff]  ;;  %v9495_v52 = vpack.c.bf16 %v8059_v22, %v8058_v37  ;;  %v8242_v22 = vld [vmem:[%s11528_s5 + $0x468] sm:$0xff] }
 0x2f4   : >> { %9548 = vmatprep.subr.bf16.mxu0 %v9940_v40  ;;  %v8238_v37 = vld [vmem:[%s11528_s5 + $0x460] sm:$0xf] }
 0x2f5   : >> { %8999 = vmatmul.mubr.msk.f32.vlgmr.msra.gmra.mrb[0].mxu1 %vm3405_vm7, %v8014_v55  ;;  %v8198_v55 = vld [vmem:[%s10758_s28 + $0x55] sm:$0x7] }
 0x2f6   : >> { %9215 = vmatmul.mubr.msk.f32.vlgmr.msra.gmra.mrb[0].mxu0 %vm3405_vm7, %v8161_v57  ;;  %9478 = vmatpush3.bf16.msra.mxu1 %v9477_v56  ;;  %v9567_v56 = vpack.c.bf16 %v8206_v42, %v8205_v41  ;;  %v8060_v57 = vld [vmem:[%s11528_s5 + $0x1a8] sm:$0xf]  ;;  %v8088_v41 = vld [vmem:[%s10758_s28 + $0x31] sm:$0x7] }
 0x2f7   : >> { %9550 = vmatpush3.bf16.msra.mxu0 %v9549_v58  ;;  %9005 = vmatprep.subr.mxu1 %v9942_v8  ;;  %v8064_v58 = vld [vmem:[%s11528_s5 + $0x1b0] sm:$0xff] }
 0x2f8   : >> { %9221 = vmatprep.subr.mxu0 %v9942_v8  ;;  %9007 = vmatprep.mubr.msk.f32.mxu1 %vm9941_vm10, %v9942_v8 }
 0x2f9   : >> { %9223 = vmatprep.mubr.msk.f32.mxu0 %vm9941_vm10, %v9942_v8 }
 0x2fa   : >> { %9006 = vmatpush3.msk.msra.mxu1 %vm893_vm3, %v8023_v43  ;;  %v8065_v43 = vld [vmem:[%s11528_s5 + $0x1b8] sm:$0xff] }
 0x2fb   : >> { %9222 = vmatpush3.msk.msra.mxu0 %vm893_vm3, %v8171_v48  ;;  %9479 = vmatprep.subr.bf16.mxu1 %v9940_v40  ;;  %v8213_v48 = vld [vmem:[%s11528_s5 + $0x3f8] sm:$0xff]  ;;  %v9498_v60 = vpack.c.bf16 %v8065_v43, %v8064_v58  ;;  %v8249_v58 = vld [vmem:[%s11528_s5 + $0x488] sm:$0xff]  ;;  %v8094_v43 = vld [vmem:[%s10758_s28 + $0x32] sm:$0x7] }
 0x2fc   : >> { %9551 = vmatprep.subr.bf16.mxu0 %v9940_v40 }
 0x2fd   : >> { %9008 = vmatmul.mubr.msk.f32.vlgmr.msra.gmra.mrb[0].mxu1 %vm3405_vm7, %v8020_v0  ;;  %v8204_v0 = vld [vmem:[%s10758_s28 + $0x56] sm:$0x7] }
 0x2fe   : >> { %9224 = vmatmul.mubr.msk.f32.vlgmr.msra.gmra.mrb[0].mxu0 %vm3405_vm7, %v8168_v63  ;;  %9481 = vmatpush3.bf16.msra.mxu1 %v9480_v62  ;;  %v9570_v62 = vpack.c.bf16 %v8213_v48, %v8212_v47  ;;  %v8066_v63 = vld [vmem:[%s11528_s5 + $0x1c0] sm:$0xf]  ;;  %v8250_v48 = vld [vmem:[%s11528_s5 + $0x490] sm:$0xf] }
 0x2ff   : >> { %9553 = vmatpush3.bf16.msra.mxu0 %v9552_v1  ;;  %9014 = vmatprep.subr.mxu1 %v9942_v8  ;;  %v8070_v1 = vld [vmem:[%s11528_s5 + $0x1c8] sm:$0xff] }
 0x300   : >> { %9230 = vmatprep.subr.mxu0 %v9942_v8  ;;  %9016 = vmatprep.mubr.msk.f32.mxu1 %vm9941_vm10, %v9942_v8 }
 0x301   : >> { %9232 = vmatprep.mubr.msk.f32.mxu0 %vm9941_vm10, %v9942_v8 }
 0x302   : >> { %9015 = vmatpush3.msk.msra.mxu1 %vm893_vm3, %v8029_v39  ;;  %v8071_v39 = vld [vmem:[%s11528_s5 + $0x1d0] sm:$0xff] }
 0x303   : >> { %9231 = vmatpush3.msk.msra.mxu0 %vm893_vm3, %v8177_v7  ;;  %9482 = vmatprep.subr.bf16.mxu1 %v9940_v40  ;;  %v8219_v7 = vld [vmem:[%s11528_s5 + $0x410] sm:$0xff]  ;;  %v9501_v45 = vpack.c.bf16 %v8071_v39, %v8070_v1 }
 0x304   : >> { %9554 = vmatprep.subr.bf16.mxu0 %v9940_v40 }
 0x305   : >> { %9017 = vmatmul.mubr.msk.f32.vlgmr.msra.gmra.mrb[0].mxu1 %vm3405_vm7, %v8026_v11  ;;  %v8211_v11 = vld [vmem:[%s10758_s28 + $0x60] sm:$0x7] }
 0x306   : >> { %9233 = vmatmul.mubr.msk.f32.vlgmr.msra.gmra.mrb[0].mxu0 %vm3405_vm7, %v8174_v10  ;;  %9484 = vmatpush3.bf16.msra.mxu1 %v9483_v46  ;;  %v9573_v46 = vpack.c.bf16 %v8219_v7, %v8218_v61  ;;  %v8072_v10 = vld [vmem:[%s11528_s5 + $0x1d8] sm:$0xf] }
 0x307   : >> { %9556 = vmatpush3.bf16.msra.mxu0 %v9555_v12  ;;  %9023 = vmatprep.subr.mxu1 %v9942_v8  ;;  %v8076_v12 = vld [vmem:[%s11528_s5 + $0x1e0] sm:$0xff] }
 0x308   : >> { %9239 = vmatprep.subr.mxu0 %v9942_v8  ;;  %9025 = vmatprep.mubr.msk.f32.mxu1 %vm9941_vm10, %v9942_v8 }
 0x309   : >> { %9241 = vmatprep.mubr.msk.f32.mxu0 %vm9941_vm10, %v9942_v8 }
 0x30a   : >> { %9024 = vmatpush3.msk.msra.mxu1 %vm893_vm3, %v8035_v15  ;;  %v8077_v15 = vld [vmem:[%s11528_s5 + $0x1e8] sm:$0xff] }
 0x30b   : >> { %9240 = vmatpush3.msk.msra.mxu0 %vm893_vm3, %v8183_v18  ;;  %9485 = vmatprep.subr.bf16.mxu1 %v9940_v40  ;;  %v8225_v18 = vld [vmem:[%s11528_s5 + $0x428] sm:$0xff]  ;;  %v9504_v20 = vpack.c.bf16 %v8077_v15, %v8076_v12 }
 0x30c   : >> { %9557 = vmatprep.subr.bf16.mxu0 %v9940_v40 }
 0x30d   : >> { %9026 = vmatmul.mubr.msk.f32.vlgmr.msra.gmra.mrb[0].mxu1 %vm3405_vm7, %v8032_v2  ;;  %v8217_v2 = vld [vmem:[%s10758_s28 + $0x61] sm:$0x7] }
 0x30e   : >> { %9242 = vmatmul.mubr.msk.f32.vlgmr.msra.gmra.mrb[0].mxu0 %vm3405_vm7, %v8180_v6  ;;  %9487 = vmatpush3.bf16.msra.mxu1 %v9486_v53  ;;  %v9576_v53 = vpack.c.bf16 %v8225_v18, %v8224_v17  ;;  %v8078_v6 = vld [vmem:[%s11528_s5 + $0x1f0] sm:$0xf] }
 0x30f   : >> { %9559 = vmatpush3.bf16.msra.mxu0 %v9558_v54  ;;  %9032 = vmatprep.subr.mxu1 %v9942_v8  ;;  %v8083_v54 = vld [vmem:[%s11528_s5 + $0x1f8] sm:$0xff] }
 0x310   : >> { %9248 = vmatprep.subr.mxu0 %v9942_v8  ;;  %9034 = vmatprep.mubr.msk.f32.mxu1 %vm9941_vm10, %v9942_v8 }
 0x311   : >> { %9250 = vmatprep.mubr.msk.f32.mxu0 %vm9941_vm10, %v9942_v8 }
 0x312   : >> { %9033 = vmatpush3.msk.msra.mxu1 %vm893_vm3, %v8042_v49  ;;  %v8084_v49 = vld [vmem:[%s11528_s5 + $0x200] sm:$0xff] }
 0x313   : >> { %9249 = vmatpush3.msk.msra.mxu0 %vm893_vm3, %v8189_v23  ;;  %9488 = vmatprep.subr.bf16.mxu1 %v9940_v40  ;;  %v8231_v23 = vld [vmem:[%s11528_s5 + $0x440] sm:$0xff]  ;;  %v9507_v25 = vpack.c.bf16 %v8084_v49, %v8083_v54 }
 0x314   : >> { %9560 = vmatprep.subr.bf16.mxu0 %v9940_v40 }
 0x315   : >> { %9035 = vmatmul.mubr.msk.f32.vlgmr.msra.gmra.mrb[0].mxu1 %vm3405_vm7, %v8039_v26  ;;  %v8223_v26 = vld [vmem:[%s10758_s28 + $0x62] sm:$0x7] }
 0x316   : >> { %9251 = vmatmul.mubr.msk.f32.vlgmr.msra.gmra.mrb[0].mxu0 %vm3405_vm7, %v8186_v13  ;;  %9490 = vmatpush3.bf16.msra.mxu1 %v9489_v27  ;;  %v9579_v27 = vpack.c.bf16 %v8231_v23, %v8230_v5  ;;  %v8085_v13 = vld [vmem:[%s11528_s5 + $0x208] sm:$0xf] }
 0x317   : >> { %9562 = vmatpush3.bf16.msra.mxu0 %v9561_v14  ;;  %9041 = vmatprep.subr.mxu1 %v9942_v8  ;;  %v8089_v14 = vld [vmem:[%s11528_s5 + $0x210] sm:$0xff] }
 0x318   : >> { %9257 = vmatprep.subr.mxu0 %v9942_v8  ;;  %9043 = vmatprep.mubr.msk.f32.mxu1 %vm9941_vm10, %v9942_v8 }
 0x319   : >> { %9259 = vmatprep.mubr.msk.f32.mxu0 %vm9941_vm10, %v9942_v8 }
 0x31a   : >> { %9042 = vmatpush3.msk.msra.mxu1 %vm893_vm3, %v8048_v28  ;;  %v8090_v28 = vld [vmem:[%s11528_s5 + $0x218] sm:$0xff] }
 0x31b   : >> { %9258 = vmatpush3.msk.msra.mxu0 %vm893_vm3, %v8195_v31  ;;  %9491 = vmatprep.subr.bf16.mxu1 %v9940_v40  ;;  %v8237_v31 = vld [vmem:[%s11528_s5 + $0x458] sm:$0xff]  ;;  %v9510_v4 = vpack.c.bf16 %v8090_v28, %v8089_v14 }
 0x31c   : >> { %9563 = vmatprep.subr.bf16.mxu0 %v9940_v40 }
 0x31d   : >> { %9044 = vmatmul.mubr.msk.f32.vlgmr.msra.gmra.mrb[0].mxu1 %vm3405_vm7, %v8045_v33  ;;  %v8229_v33 = vld [vmem:[%s10758_s28 + $0x63] sm:$0x7] }
 0x31e   : >> { %9260 = vmatmul.mubr.msk.f32.vlgmr.msra.gmra.mrb[0].mxu0 %vm3405_vm7, %v8192_v35  ;;  %9493 = vmatpush3.bf16.msra.mxu1 %v9492_v34  ;;  %v9582_v34 = vpack.c.bf16 %v8237_v31, %v8236_v30  ;;  %v8091_v35 = vld [vmem:[%s11528_s5 + $0x220] sm:$0xf] }
 0x31f   : >> { %9565 = vmatpush3.bf16.msra.mxu0 %v9564_v36  ;;  %9050 = vmatprep.subr.mxu1 %v9942_v8  ;;  %v8095_v36 = vld [vmem:[%s11528_s5 + $0x228] sm:$0xff] }
 0x320   : >> { %9266 = vmatprep.subr.mxu0 %v9942_v8  ;;  %9052 = vmatprep.mubr.msk.f32.mxu1 %vm9941_vm10, %v9942_v8 }
 0x321   : >> { %9268 = vmatprep.mubr.msk.f32.mxu0 %vm9941_vm10, %v9942_v8 }
 0x322   : >> { %9051 = vmatpush3.msk.msra.mxu1 %vm893_vm3, %v8054_v21  ;;  %v8096_v21 = vld [vmem:[%s11528_s5 + $0x230] sm:$0xff] }
 0x323   : >> { %9267 = vmatpush3.msk.msra.mxu0 %vm893_vm3, %v8201_v38  ;;  %9494 = vmatprep.subr.bf16.mxu1 %v9940_v40  ;;  %v8243_v38 = vld [vmem:[%s11528_s5 + $0x470] sm:$0xff]  ;;  %v9513_v42 = vpack.c.bf16 %v8096_v21, %v8095_v36 }
 0x324   : >> { %9566 = vmatprep.subr.bf16.mxu0 %v9940_v40 }
 0x325   : >> { %9053 = vmatmul.mubr.msk.f32.vlgmr.msra.gmra.mrb[0].mxu1 %vm3405_vm7, %v8051_v51  ;;  %v8235_v51 = vld [vmem:[%s10758_s28 + $0x64] sm:$0x7] }
 0x326   : >> { %9269 = vmatmul.mubr.msk.f32.vlgmr.msra.gmra.mrb[0].mxu0 %vm3405_vm7, %v8198_v55  ;;  %9496 = vmatpush3.bf16.msra.mxu1 %v9495_v52  ;;  %v9585_v52 = vpack.c.bf16 %v8243_v38, %v8242_v22  ;;  %v8097_v55 = vld [vmem:[%s11528_s5 + $0x238] sm:$0xf] }
 0x327   : >> { %9568 = vmatpush3.bf16.msra.mxu0 %v9567_v56  ;;  %9059 = vmatprep.subr.mxu1 %v9942_v8  ;;  %v8244_v56 = vld [vmem:[%s11528_s5 + $0x478] sm:$0xf] }
 0x328   : >> { %9275 = vmatprep.subr.mxu0 %v9942_v8  ;;  %9061 = vmatprep.mubr.msk.f32.mxu1 %vm9941_vm10, %v9942_v8 }
 0x329   : >> { %9277 = vmatprep.mubr.msk.f32.mxu0 %vm9941_vm10, %v9942_v8 }
 0x32a   : >> { %9060 = vmatpush3.msk.msra.mxu1 %vm893_vm3, %v8060_v57  ;;  %v8248_v57 = vld [vmem:[%s11528_s5 + $0x480] sm:$0xff] }
 0x32b   : >> { %9276 = vmatpush3.msk.msra.mxu0 %vm893_vm3, %v8207_v44  ;;  %9497 = vmatprep.subr.bf16.mxu1 %v9940_v40  ;;  %v8241_v44 = vld [vmem:[%s10758_s28 + $0x65] sm:$0x7]  ;;  %v9588_v47 = vpack.c.bf16 %v8249_v58, %v8248_v57 }
 0x32c   : >> { %9569 = vmatprep.subr.bf16.mxu0 %v9940_v40 }
 0x32d   : >> { %9062 = vmatmul.mubr.msk.f32.vlgmr.msra.gmra.mrb[0].mxu1 %vm3405_vm7, %v8057_v59  ;;  %v8247_v59 = vld [vmem:[%s10758_s28 + $0x66] sm:$0x7] }
 0x32e   : >> { %9278 = vmatmul.mubr.msk.f32.vlgmr.msra.gmra.mrb[0].mxu0 %vm3405_vm7, %v8204_v0  ;;  %9499 = vmatpush3.bf16.msra.mxu1 %v9498_v60 }
 0x32f   : >> { %9571 = vmatpush3.bf16.msra.mxu0 %v9570_v62  ;;  %9068 = vmatprep.subr.mxu1 %v9942_v8 }
 0x330   : >> { %9284 = vmatprep.subr.mxu0 %v9942_v8  ;;  %9070 = vmatprep.mubr.msk.f32.mxu1 %vm9941_vm10, %v9942_v8 }
 0x331   : >> { %9286 = vmatprep.mubr.msk.f32.mxu0 %vm9941_vm10, %v9942_v8 }
 0x332   : >> { %9069 = vmatpush3.msk.msra.mxu1 %vm893_vm3, %v8066_v63 }
 0x333   : >> { %9285 = vmatpush3.msk.msra.mxu0 %vm893_vm3, %v8214_v50  ;;  %9500 = vmatprep.subr.bf16.mxu1 %v9940_v40 }
 0x334   : >> { %9572 = vmatprep.subr.bf16.mxu0 %v9940_v40 }
 0x335   : >> { %9071 = vmatmul.mubr.msk.f32.vlgmr.msra.gmra.mrb[0].mxu1 %vm3405_vm7, %v8063_v9  ;;  %v7516_v9 = vld [vmem:[%s11529_s6] sm:$0x1] (%p3461_p8) }
 0x336   : >> { %9287 = vmatmul.mubr.msk.f32.vlgmr.msra.gmra.mrb[0].mxu0 %vm3405_vm7, %v8211_v11  ;;  %9502 = vmatpush3.bf16.msra.mxu1 %v9501_v45 }
 0x337   : >> { %9574 = vmatpush3.bf16.msra.mxu0 %v9573_v46  ;;  %9077 = vmatprep.subr.mxu1 %v9942_v8 }
 0x338   : >> { %9293 = vmatprep.subr.mxu0 %v9942_v8  ;;  %9079 = vmatprep.mubr.msk.f32.mxu1 %vm9941_vm10, %v9942_v8 }
 0x339   : >> { %9295 = vmatprep.mubr.msk.f32.mxu0 %vm9941_vm10, %v9942_v8 }
 0x33a   : >> { %9078 = vmatpush3.msk.msra.mxu1 %vm893_vm3, %v8072_v10 }
 0x33b   : >> { %9294 = vmatpush3.msk.msra.mxu0 %vm893_vm3, %v8220_v16  ;;  %9503 = vmatprep.subr.bf16.mxu1 %v9940_v40 }
 0x33c   : >> { %9575 = vmatprep.subr.bf16.mxu0 %v9940_v40 }
 0x33d   : >> { %9080 = vmatmul.mubr.msk.f32.vlgmr.msra.gmra.mrb[0].mxu1 %vm3405_vm7, %v8069_v19 }
 0x33e   : >> { %9296 = vmatmul.mubr.msk.f32.vlgmr.msra.gmra.mrb[0].mxu0 %vm3405_vm7, %v8217_v2  ;;  %9505 = vmatpush3.bf16.msra.mxu1 %v9504_v20 }
 0x33f   : >> { %9577 = vmatpush3.bf16.msra.mxu0 %v9576_v53  ;;  %9086 = vmatprep.subr.mxu1 %v9942_v8 }
 0x340   : >> { %9302 = vmatprep.subr.mxu0 %v9942_v8  ;;  %9088 = vmatprep.mubr.msk.f32.mxu1 %vm9941_vm10, %v9942_v8 }
 0x341   : >> { %9304 = vmatprep.mubr.msk.f32.mxu0 %vm9941_vm10, %v9942_v8 }
 0x342   : >> { %9087 = vmatpush3.msk.msra.mxu1 %vm893_vm3, %v8078_v6 }
 0x343   : >> { %9303 = vmatpush3.msk.msra.mxu0 %vm893_vm3, %v8226_v3  ;;  %9506 = vmatprep.subr.bf16.mxu1 %v9940_v40 }
 0x344   : >> { %9578 = vmatprep.subr.bf16.mxu0 %v9940_v40 }
 0x345   : >> { %9089 = vmatmul.mubr.msk.f32.vlgmr.msra.gmra.mrb[0].mxu1 %vm3405_vm7, %v8075_v24 }
 0x346   : >> { %9305 = vmatmul.mubr.msk.f32.vlgmr.msra.gmra.mrb[0].mxu0 %vm3405_vm7, %v8223_v26  ;;  %9508 = vmatpush3.bf16.msra.mxu1 %v9507_v25 }
 0x347   : >> { %9580 = vmatpush3.bf16.msra.mxu0 %v9579_v27  ;;  %9095 = vmatprep.subr.mxu1 %v9942_v8 }
 0x348   : >> { %9311 = vmatprep.subr.mxu0 %v9942_v8  ;;  %9097 = vmatprep.mubr.msk.f32.mxu1 %vm9941_vm10, %v9942_v8 }
 0x349   : >> { %9313 = vmatprep.mubr.msk.f32.mxu0 %vm9941_vm10, %v9942_v8 }
 0x34a   : >> { %9096 = vmatpush3.msk.msra.mxu1 %vm893_vm3, %v8085_v13 }
 0x34b   : >> { %9312 = vmatpush3.msk.msra.mxu0 %vm893_vm3, %v8232_v29  ;;  %9509 = vmatprep.subr.bf16.mxu1 %v9940_v40 }
 0x34c   : >> { %9581 = vmatprep.subr.bf16.mxu0 %v9940_v40 }
 0x34d   : >> { %9098 = vmatmul.mubr.msk.f32.vlgmr.msra.gmra.mrb[0].mxu1 %vm3405_vm7, %v8082_v32 }
 0x34e   : >> { %9314 = vmatmul.mubr.msk.f32.vlgmr.msra.gmra.mrb[0].mxu0 %vm3405_vm7, %v8229_v33  ;;  %9511 = vmatpush3.bf16.msra.mxu1 %v9510_v4 }
 0x34f   : >> { %9583 = vmatpush3.bf16.msra.mxu0 %v9582_v34  ;;  %9104 = vmatprep.subr.mxu1 %v9942_v8 }
 0x350   : >> { %9320 = vmatprep.subr.mxu0 %v9942_v8  ;;  %9106 = vmatprep.mubr.msk.f32.mxu1 %vm9941_vm10, %v9942_v8 }
 0x351   : >> { %9322 = vmatprep.mubr.msk.f32.mxu0 %vm9941_vm10, %v9942_v8 }
 0x352   : >> { %9105 = vmatpush3.msk.msra.mxu1 %vm893_vm3, %v8091_v35 }
 0x353   : >> { %9321 = vmatpush3.msk.msra.mxu0 %vm893_vm3, %v8238_v37  ;;  %9512 = vmatprep.subr.bf16.mxu1 %v9940_v40 }
 0x354   : >> { %9584 = vmatprep.subr.bf16.mxu0 %v9940_v40 }
 0x355   : >> { %9107 = vmatmul.mubr.msk.f32.vlgmr.msra.gmra.mrb[0].mxu1 %vm3405_vm7, %v8088_v41 }
 0x356   : >> { %9323 = vmatmul.mubr.msk.f32.vlgmr.msra.gmra.mrb[0].mxu0 %vm3405_vm7, %v8235_v51  ;;  %9514 = vmatpush3.bf16.msra.mxu1 %v9513_v42 }
 0x357   : >> { %9586 = vmatpush3.bf16.msra.mxu0 %v9585_v52  ;;  %9113 = vmatprep.subr.mxu1 %v9942_v8 }
 0x358   : >> { %9329 = vmatprep.subr.mxu0 %v9942_v8  ;;  %9115 = vmatprep.mubr.msk.f32.mxu1 %vm9941_vm10, %v9942_v8 }
 0x359   : >> { %9331 = vmatprep.mubr.msk.f32.mxu0 %vm9941_vm10, %v9942_v8 }
 0x35a   : >> { %9114 = vmatpush3.msk.msra.mxu1 %vm893_vm3, %v8097_v55 }
 0x35b   : >> { %9330 = vmatpush3.msk.msra.mxu0 %vm893_vm3, %v8244_v56 }
 0x35c   : >> { %9587 = vmatprep.subr.bf16.mxu0 %v9940_v40 }
 0x35d   : >> { %9116 = vmatmul.mubr.msk.f32.vlgmr.msra.gmra.mrb[0].mxu1 %vm3405_vm7, %v8094_v43 }
 0x35e   : >> { %9332 = vmatmul.mubr.msk.f32.vlgmr.msra.gmra.mrb[0].mxu0 %vm3405_vm7, %v8241_v44 }
 0x35f   : >> { %9589 = vmatpush3.bf16.msra.mxu0 %v9588_v47  ;;  %9340 = vmatprep.mubr.msk.f32.mxu0 %vm9941_vm10, %v9942_v8 }
 0x360   : >> { %9338 = vmatprep.subr.mxu0 %v9942_v8 }
 0x363   : >> { %9339 = vmatpush3.msk.msra.mxu0 %vm893_vm3, %v8250_v48 }
 0x366   : >> { %9341 = vmatmul.mubr.msk.f32.vlgmr.msra.gmra.mrb[0].mxu0 %vm3405_vm7, %v8247_v59 }
 0x430   : >> { %v5438_v40 = vpop.f32.mrb[0].mxu1 }
 0x431   : >> { %v9117_v60 = vpop.f32.mrb[1].mxu1 }
 0x436   : > { %3463 = sbr.rel (!%p3461_p8) target bundleno = 669 (0x29d), region = 280 }
 0x439   : >> { %v7497_v0 = vpop.f32.mrb[0].mxu0 }
 0x43a   : >> { %v9733_v62 = vadd.f32 %v7497_v0, %v5438_v40  ;;  %v9342_v63 = vpop.f32.mrb[1].mxu0 }
 0x43c   : >> { %7505 = vst.msk [vmem:[%s7503_s15] sm:$0x7] %vm3408_vm8, %v9733_v62 }
 0x443   : > { %v7506_v8 = vld [vmem:[#allocation6] ss:$2 sm:$0x1]  ;;  %v7508_v1 = vld [vmem:[#allocation6 + $0x1] ss:$2 sm:$0x1] }
 0x444   : > { %v7510_v39 = vld [vmem:[#allocation6 + $0x4] ss:$2 sm:$0x1]  ;;  %v7512_v50 = vld [vmem:[#allocation6 + $0x5] ss:$2 sm:$0x1]  ;;  %v7513_v61 = vmax.f32 %v7506_v8, %v7508_v1 }
 0x445   : > { %v7514_v7 = vmax.f32 %v7510_v39, %v7512_v50 }
 0x447   : > { %v7515_v45 = vmax.f32 %v7513_v61, %v7514_v7 }
 0x449   : > { %v7517_v11 = vadd.f32 %v7516_v9, %v7515_v45 }
 0x44b   : > { %v7518_v46 = vmax.f32 %v7517_v11, 0.0 }
 0x44d   : > { %7520 = vst.msk [vmem:[%s274_s29] sm:$0x1] %vm3457_vm9, %v7518_v46 }
 0x44e PF: > { %s17_s24 = sadd.s32 1, %s9913_s24  }
 0x44f   : > { %p14_p9 = scmp.ge.s32.totalorder %s17_s24, 4  }
 0x451   :  { %16 = sbr.rel (!%p14_p9) target bundleno = 1 (0x1), region = 291 }

</bundles_post_ra>
